<compile_context>
chip_gen: v5e
topology: v5e:2x2
jax: 0.10.0
libtpu: 0.0.40
codegen_flags: <defaults>
</compile_context>

<pallas_src>
import functools

import numpy as np
import jax
import jax.numpy as jnp
from jax.experimental import pallas as pl
from jax.experimental.pallas import tpu as pltpu


# ---------------------------------------------------------------------------
# Static (shape-only) helpers -- pure numpy, evaluated at trace time.
# ---------------------------------------------------------------------------
def _pool_positions(w):
    """Output-x column order for a conv that is followed by MaxPool2d(2):
    even x's first, then odd x's, so the x-pool is a max of two contiguous
    lane halves.  Drops the last column when w is odd (floor pooling)."""
    lim = w - (w % 2)
    return list(range(0, lim, 2)) + list(range(1, lim, 2))


def _x_selector(w_in, x_positions):
    """sel[kw, x_in, p] = 1 if x_in == x_positions[p] + kw - 1 (pad=1 conv)."""
    sel = np.zeros((3, w_in, len(x_positions)), np.float32)
    for kw in range(3):
        for p, xo in enumerate(x_positions):
            xi = xo + kw - 1
            if 0 <= xi < w_in:
                sel[kw, xi, p] = 1.0
    return sel


def _edge_mask(h, bt):
    """(bt*h, 2) f32.  Rows are (image, y) with y minor.
    col 0 = 1 if the y-1 neighbour exists, col 1 = 1 if y+1 exists."""
    y = np.arange(bt * h) % h
    m = np.stack([(y != 0), (y != h - 1)], axis=1).astype(np.float32)
    return jnp.asarray(m)


def _pool_row_select(h, bt):
    """(2, bt*(h//2), bt*h) one-hot: [0] picks rows (b, 2*yo), [1] (b, 2*yo+1)."""
    ho = h // 2
    e = np.zeros((2, bt * ho, bt * h), np.float32)
    for b in range(bt):
        for yo in range(ho):
            e[0, b * ho + yo, b * h + 2 * yo] = 1.0
            e[1, b * ho + yo, b * h + 2 * yo + 1] = 1.0
    return jnp.asarray(e)


def _fc_row_select(bt):
    """(2, 3, bt, bt*7) one-hot: [s, yo, b] picks row b*7 + 2*yo + s."""
    f = np.zeros((2, 3, bt, bt * 7), np.float32)
    for s in range(2):
        for yo in range(3):
            for b in range(bt):
                f[s, yo, b, b * 7 + 2 * yo + s] = 1.0
    return jnp.asarray(f)


def _band_matrices(w, w_in, x_positions):
    """w: (Cout, Cin, 3, 3).  Returns (3, w_in*Cin, P*Cout) with
    A[kh, x_in*Cin + i, p*Cout + o] = w[o, i, kh, x_positions[p] - x_in + 1]
    (0 when that kw is out of range) -- i.e. one banded x-mixing matrix per
    kernel row, in the (even-x, odd-x) output-column order."""
    cout, cin = w.shape[0], w.shape[1]
    sel = jnp.asarray(_x_selector(w_in, x_positions))
    a = jnp.einsum("kxp,oihk->hxipo", sel, w)          # (3, w_in, cin, P, cout)
    return a.reshape(3, w_in * cin, len(x_positions) * cout)


# ---------------------------------------------------------------------------
# The fused Pallas kernel (one batch tile of `bt` images per grid step).
# ---------------------------------------------------------------------------
def _mnist_kernel(x_ref, a1_ref, b1_ref, m1_ref, p1_ref,
                  a2_ref, b2_ref, m2_ref, p2_ref,
                  a4_ref, b4_ref, m4_ref, fe_ref, fo_ref,
                  wfc_ref, bfc_ref, out_ref, *, bt):
    f32 = jnp.float32

    def band_conv(x, a_ref, mask_ref):
        # x: (rows, Lin) with rows = (image, y), y minor; lanes = x*Cin + cin.
        # 3x3 / pad-1 conv as three banded GEMMs (one per kernel row); the
        # y +/- 1 neighbours are sublane shifts, masked at image boundaries.
        L = x.shape[1]
        zrow = jnp.zeros((1, L), f32)
        up = jnp.concatenate([zrow, x[:-1, :]], axis=0)    # row r -> x[r-1]
        dn = jnp.concatenate([x[1:, :], zrow], axis=0)     # row r -> x[r+1]
        acc = jnp.dot(up * mask_ref[:, 0:1], a_ref[0],
                      preferred_element_type=f32)
        acc = acc + jnp.dot(x, a_ref[1], preferred_element_type=f32)
        acc = acc + jnp.dot(dn * mask_ref[:, 1:2], a_ref[2],
                            preferred_element_type=f32)
        return acc

    def pool_rows(xp, sel_ref):
        # 2x2 maxpool, y direction: one-hot row-selection matmuls (exact).
        even = jnp.dot(sel_ref[0], xp, preferred_element_type=f32)
        odd = jnp.dot(sel_ref[1], xp, preferred_element_type=f32)
        return jnp.maximum(even, odd)

    # Stage 1: conv1 (1->4, 3x3, pad 1) + ReLU + maxpool 28 -> 14.
    c1 = jnp.maximum(band_conv(x_ref[...], a1_ref, m1_ref) + b1_ref[...], 0.0)
    h = c1.shape[1] // 2
    p1 = pool_rows(jnp.maximum(c1[:, :h], c1[:, h:]), p1_ref)   # (bt*14, 56)

    # Stage 2: conv2 (4->8, 3x3, pad 1) + ReLU + maxpool 14 -> 7.
    c2 = jnp.maximum(band_conv(p1, a2_ref, m2_ref) + b2_ref[...], 0.0)
    h = c2.shape[1] // 2
    p2 = pool_rows(jnp.maximum(c2[:, :h], c2[:, h:]), p2_ref)   # (bt*7, 56)

    # Stage 3: conv3 (1x1, folded) o conv4 (->16, 3x3, pad 1) + ReLU + pool 7->3.
    c4 = jnp.maximum(band_conv(p2, a4_ref, m4_ref) + b4_ref[...], 0.0)
    h = c4.shape[1] // 2
    xp4 = jnp.maximum(c4[:, :h], c4[:, h:])                     # (bt*7, 48)

    # y-pool (7 -> 3, floor) fused with the FC layer.
    acc = None
    for yo in range(3):
        ev = jnp.dot(fe_ref[yo], xp4, preferred_element_type=f32)
        od = jnp.dot(fo_ref[yo], xp4, preferred_element_type=f32)
        feat = jnp.maximum(ev, od)                              # (bt, 48)
        term = jnp.dot(feat, wfc_ref[yo], preferred_element_type=f32)
        acc = term if acc is None else acc + term
    out_ref[...] = acc + bfc_ref[...]                           # (bt, 10)


# ---------------------------------------------------------------------------
# Wrapper: parameter preprocessing + pallas_call.
# ---------------------------------------------------------------------------
def mnist_forward_pallas(x_nchw, params, *, bt=8):
    B = x_nchw.shape[0]
    pad = (-B) % bt
    x = x_nchw.astype(jnp.float32)
    if pad:
        x = jnp.concatenate(
            [x, jnp.zeros((pad,) + x.shape[1:], jnp.float32)], axis=0)
    Bp = B + pad
    x2d = x.reshape(Bp * 28, 28)                      # rows = (image, y), lanes = x

    w1, b1 = params["w1"], params["b1"]
    w2, b2 = params["w2"], params["b2"]
    w3, b3 = params["w3"], params["b3"]
    w4, b4 = params["w4"], params["b4"]
    wfc, bfc = params["wfc"], params["bfc"]

    # ---- fold the 1x1 conv3 (linear, no ReLU) into conv4 ---------------------
    w4f = jnp.einsum("omhk,mi->oihk", w4, w3[:, :, 0, 0])       # (16, 8, 3, 3)
    # conv4 zero-pads conv3's output, so b3's contribution varies at the 7x7
    # border -> exact position-dependent bias map.
    valid = np.zeros((7, 7, 3, 3), np.float32)
    for yy in range(7):
        for xx in range(7):
            for hh in range(3):
                for kk in range(3):
                    if 0 <= yy + hh - 1 < 7 and 0 <= xx + kk - 1 < 7:
                        valid[yy, xx, hh, kk] = 1.0
    b3c = jnp.einsum("yxhk,omhk,m->oyx", jnp.asarray(valid), w4, b3)
    bias4 = b3c + b4[:, None, None]                             # (16, 7, 7)

    # ---- banded conv matrices, biases, masks, pooling selectors --------------
    pos1, pos2, pos4 = _pool_positions(28), _pool_positions(14), _pool_positions(7)
    a1 = _band_matrices(w1, 28, pos1)                           # (3, 28, 112)
    a2 = _band_matrices(w2, 14, pos2)                           # (3, 56, 112)
    a4 = _band_matrices(w4f, 7, pos4)                           # (3, 56, 96)

    b1c = jnp.tile(b1, 28).reshape(1, 112)
    b2c = jnp.tile(b2, 14).reshape(1, 112)
    b4map = jnp.tile(
        jnp.transpose(bias4, (1, 2, 0))[:, np.array(pos4), :].reshape(7, 96),
        (bt, 1))                                                # (bt*7, 96)

    m1, m2, m4 = _edge_mask(28, bt), _edge_mask(14, bt), _edge_mask(7, bt)
    p1sel = _pool_row_select(28, bt)                            # (2, bt*14, bt*28)
    p2sel = _pool_row_select(14, bt)                            # (2, bt*7,  bt*14)
    fsel = _fc_row_select(bt)                                   # (2, 3, bt, bt*7)
    fe, fo = fsel[0], fsel[1]

    # FC weights reordered to the kernel's (yo, xo*16 + o) feature layout
    # (PyTorch flattens NCHW, i.e. feature index = o*9 + yo*3 + xo).
    wfc_r = jnp.transpose(wfc.reshape(10, 16, 3, 3), (2, 3, 1, 0)).reshape(3, 48, 10)
    bfc_r = bfc.reshape(1, 10)

    def _const_spec(arr):
        nd = arr.ndim
        return pl.BlockSpec(arr.shape, lambda i, nd=nd: (0,) * nd)

    grid = (Bp // bt,)
    out = pl.pallas_call(
        functools.partial(_mnist_kernel, bt=bt),
        out_shape=jax.ShapeDtypeStruct((Bp, 10), jnp.float32),
        grid=grid,
        in_specs=[
            pl.BlockSpec((bt * 28, 28), lambda i: (i, 0)),      # input tile
            _const_spec(a1), _const_spec(b1c), _const_spec(m1), _const_spec(p1sel),
            _const_spec(a2), _const_spec(b2c), _const_spec(m2), _const_spec(p2sel),
            _const_spec(a4), _const_spec(b4map), _const_spec(m4),
            _const_spec(fe), _const_spec(fo),
            _const_spec(wfc_r), _const_spec(bfc_r),
        ],
        out_specs=pl.BlockSpec((bt, 10), lambda i: (i, 0)),
        compiler_params=pltpu.CompilerParams(
            dimension_semantics=("parallel",)),                 # v7x: 2 TCs
    )(x2d, a1, b1c, m1, p1sel, a2, b2c, m2, p2sel,
      a4, b4map, m4, fe, fo, wfc_r, bfc_r)
    return out[:B]


# ---------------------------------------------------------------------------
# Deterministic init (PyTorch-default-style uniform) and a pure-JAX reference.
# ---------------------------------------------------------------------------
def init_params(key):
    def u(k, shape, fan_in):
        bound = 1.0 / float(fan_in) ** 0.5
        return jax.random.uniform(k, shape, jnp.float32, -bound, bound)

    ks = jax.random.split(key, 10)
    return {
        "w1": u(ks[0], (4, 1, 3, 3), 1 * 9),  "b1": u(ks[1], (4,), 1 * 9),
        "w2": u(ks[2], (8, 4, 3, 3), 4 * 9),  "b2": u(ks[3], (8,), 4 * 9),
        "w3": u(ks[4], (4, 8, 1, 1), 8 * 1),  "b3": u(ks[5], (4,), 8 * 1),
        "w4": u(ks[6], (16, 4, 3, 3), 4 * 9), "b4": u(ks[7], (16,), 4 * 9),
        "wfc": u(ks[8], (10, 144), 144),      "bfc": u(ks[9], (10,), 144),
    }


def mnist_forward_ref(x_nchw, params):
    x = jnp.transpose(x_nchw, (0, 2, 3, 1)).astype(jnp.float32)

    def conv(x, w, b, pad):
        out = jax.lax.conv_general_dilated(
            x, w, window_strides=(1, 1),
            padding=((pad, pad), (pad, pad)),
            dimension_numbers=("NHWC", "OIHW", "NHWC"))
        return out + b.reshape(1, 1, 1, -1)

    def pool(x):
        return jax.lax.reduce_window(
            x, -jnp.inf, jax.lax.max, (1, 2, 2, 1), (1, 2, 2, 1), "VALID")

    x = pool(jax.nn.relu(conv(x, params["w1"], params["b1"], 1)))
    x = pool(jax.nn.relu(conv(x, params["w2"], params["b2"], 1)))
    x = conv(x, params["w3"], params["b3"], 0)
    x = pool(jax.nn.relu(conv(x, params["w4"], params["b4"], 1)))
    B = x.shape[0]
    xf = jnp.transpose(x, (0, 3, 1, 2)).reshape(B, -1)
    return xf @ params["wfc"].T + params["bfc"]


if __name__ == "__main__":
    key = jax.random.PRNGKey(0)
    k_param, k_x = jax.random.split(key)
    params = init_params(k_param)
    # MNIST-shaped input (28x28 is required by the 144-feature FC layer);
    # batch 16 = two grid steps of the batch-parallel grid.
    x = jax.random.normal(k_x, (16, 1, 28, 28), dtype=jnp.float32)

    fwd = jax.jit(mnist_forward_pallas)
    logits = jax.block_until_ready(fwd(x, params))

    ref = jax.block_until_ready(jax.jit(mnist_forward_ref)(x, params))
    assert logits.shape == (16, 10)
    err = float(jnp.max(jnp.abs(logits - ref)))
    assert jnp.allclose(logits, ref, atol=2e-4, rtol=2e-4), err

    print("KERNEL_OK")
</pallas_src>

<mosaic_0001>
module attributes {stable_mosaic.version = 11 : i64} {
  func.func @_mnist_kernel(%arg0: i32, %arg1: memref<224x28xf32, #tpu.memory_space<vmem>>, %arg2: memref<3x28x112xf32, #tpu.memory_space<vmem>>, %arg3: memref<1x112xf32, #tpu.memory_space<vmem>>, %arg4: memref<224x2xf32, #tpu.memory_space<vmem>>, %arg5: memref<2x112x224xf32, #tpu.memory_space<vmem>>, %arg6: memref<3x56x112xf32, #tpu.memory_space<vmem>>, %arg7: memref<1x112xf32, #tpu.memory_space<vmem>>, %arg8: memref<112x2xf32, #tpu.memory_space<vmem>>, %arg9: memref<2x56x112xf32, #tpu.memory_space<vmem>>, %arg10: memref<3x56x96xf32, #tpu.memory_space<vmem>>, %arg11: memref<56x96xf32, #tpu.memory_space<vmem>>, %arg12: memref<56x2xf32, #tpu.memory_space<vmem>>, %arg13: memref<3x8x56xf32, #tpu.memory_space<vmem>>, %arg14: memref<3x8x56xf32, #tpu.memory_space<vmem>>, %arg15: memref<3x48x10xf32, #tpu.memory_space<vmem>>, %arg16: memref<1x10xf32, #tpu.memory_space<vmem>>, %arg17: memref<8x10xf32, #tpu.memory_space<vmem>>) attributes {dimension_semantics = [#tpu.dimension_semantics<parallel>], iteration_bounds = array<i64: 2>, scalar_prefetch = 0 : i64, scratch_operands = 0 : i64, tpu.core_type = #tpu.core_type<tc>, window_params = [{transform_indices = @transform_0, window_bounds = array<i64: 224, 28>}, {pipeline_mode = #tpu.pipeline_mode<synchronous>, transform_indices = @transform_1, window_bounds = array<i64: 3, 28, 112>}, {pipeline_mode = #tpu.pipeline_mode<synchronous>, transform_indices = @transform_2, window_bounds = array<i64: 1, 112>}, {pipeline_mode = #tpu.pipeline_mode<synchronous>, transform_indices = @transform_3, window_bounds = array<i64: 224, 2>}, {pipeline_mode = #tpu.pipeline_mode<synchronous>, transform_indices = @transform_4, window_bounds = array<i64: 2, 112, 224>}, {pipeline_mode = #tpu.pipeline_mode<synchronous>, transform_indices = @transform_5, window_bounds = array<i64: 3, 56, 112>}, {pipeline_mode = #tpu.pipeline_mode<synchronous>, transform_indices = @transform_6, window_bounds = array<i64: 1, 112>}, {pipeline_mode = #tpu.pipeline_mode<synchronous>, transform_indices = @transform_7, window_bounds = array<i64: 112, 2>}, {pipeline_mode = #tpu.pipeline_mode<synchronous>, transform_indices = @transform_8, window_bounds = array<i64: 2, 56, 112>}, {pipeline_mode = #tpu.pipeline_mode<synchronous>, transform_indices = @transform_9, window_bounds = array<i64: 3, 56, 96>}, {pipeline_mode = #tpu.pipeline_mode<synchronous>, transform_indices = @transform_10, window_bounds = array<i64: 56, 96>}, {pipeline_mode = #tpu.pipeline_mode<synchronous>, transform_indices = @transform_11, window_bounds = array<i64: 56, 2>}, {pipeline_mode = #tpu.pipeline_mode<synchronous>, transform_indices = @transform_12, window_bounds = array<i64: 3, 8, 56>}, {pipeline_mode = #tpu.pipeline_mode<synchronous>, transform_indices = @transform_13, window_bounds = array<i64: 3, 8, 56>}, {pipeline_mode = #tpu.pipeline_mode<synchronous>, transform_indices = @transform_14, window_bounds = array<i64: 3, 48, 10>}, {pipeline_mode = #tpu.pipeline_mode<synchronous>, transform_indices = @transform_15, window_bounds = array<i64: 1, 10>}, {transform_indices = @transform_16, window_bounds = array<i64: 8, 10>}]} {
    %c0 = arith.constant 0 : index
    %c0_0 = arith.constant 0 : index
    %0 = vector.load %arg1[%c0, %c0_0] : memref<224x28xf32, #tpu.memory_space<vmem>>, vector<224x28xf32>
    %cst = arith.constant 0.000000e+00 : f32
    %1 = vector.broadcast %cst : f32 to vector<1x28xf32>
    %2 = vector.extract_strided_slice %0 {offsets = [0, 0], sizes = [223, 28], strides = [1, 1]} : vector<224x28xf32> to vector<223x28xf32>
    %3 = tpu.concatenate %1, %2 in 0 : vector<1x28xf32>, vector<223x28xf32> -> vector<224x28xf32>
    %4 = vector.extract_strided_slice %0 {offsets = [1, 0], sizes = [223, 28], strides = [1, 1]} : vector<224x28xf32> to vector<223x28xf32>
    %5 = tpu.concatenate %4, %1 in 0 : vector<223x28xf32>, vector<1x28xf32> -> vector<224x28xf32>
    %c0_1 = arith.constant 0 : index
    %c0_2 = arith.constant 0 : index
    %6 = vector.load %arg4[%c0_1, %c0_2] : memref<224x2xf32, #tpu.memory_space<vmem>>, vector<224x1xf32>
    %7 = vector.broadcast %6 : vector<224x1xf32> to vector<224x28xf32>
    %8 = arith.mulf %3, %7 : vector<224x28xf32>
    %c0_3 = arith.constant 0 : index
    %c0_4 = arith.constant 0 : index
    %c0_5 = arith.constant 0 : index
    %9 = vector.load %arg2[%c0_3, %c0_4, %c0_5] : memref<3x28x112xf32, #tpu.memory_space<vmem>>, vector<1x28x112xf32>
    %10 = vector.shape_cast %9 : vector<1x28x112xf32> to vector<28x112xf32>
    %cst_6 = arith.constant dense<0.000000e+00> : vector<224x112xf32>
    %11 = tpu.matmul %8, %10, %cst_6 {dimension_numbers = #tpu.dot_dimension_numbers<[1], [0], [0], [1], [0, 0, 1, 1], [], []>} : vector<224x28xf32>, vector<28x112xf32>, vector<224x112xf32> -> vector<224x112xf32>
    %c1 = arith.constant 1 : index
    %c0_7 = arith.constant 0 : index
    %c0_8 = arith.constant 0 : index
    %12 = vector.load %arg2[%c1, %c0_7, %c0_8] : memref<3x28x112xf32, #tpu.memory_space<vmem>>, vector<1x28x112xf32>
    %13 = vector.shape_cast %12 : vector<1x28x112xf32> to vector<28x112xf32>
    %cst_9 = arith.constant dense<0.000000e+00> : vector<224x112xf32>
    %14 = tpu.matmul %0, %13, %cst_9 {dimension_numbers = #tpu.dot_dimension_numbers<[1], [0], [0], [1], [0, 0, 1, 1], [], []>} : vector<224x28xf32>, vector<28x112xf32>, vector<224x112xf32> -> vector<224x112xf32>
    %15 = arith.addf %11, %14 : vector<224x112xf32>
    %c0_10 = arith.constant 0 : index
    %c1_11 = arith.constant 1 : index
    %16 = vector.load %arg4[%c0_10, %c1_11] : memref<224x2xf32, #tpu.memory_space<vmem>>, vector<224x1xf32>
    %17 = vector.broadcast %16 : vector<224x1xf32> to vector<224x28xf32>
    %18 = arith.mulf %5, %17 : vector<224x28xf32>
    %c2 = arith.constant 2 : index
    %c0_12 = arith.constant 0 : index
    %c0_13 = arith.constant 0 : index
    %19 = vector.load %arg2[%c2, %c0_12, %c0_13] : memref<3x28x112xf32, #tpu.memory_space<vmem>>, vector<1x28x112xf32>
    %20 = vector.shape_cast %19 : vector<1x28x112xf32> to vector<28x112xf32>
    %cst_14 = arith.constant dense<0.000000e+00> : vector<224x112xf32>
    %21 = tpu.matmul %18, %20, %cst_14 {dimension_numbers = #tpu.dot_dimension_numbers<[1], [0], [0], [1], [0, 0, 1, 1], [], []>} : vector<224x28xf32>, vector<28x112xf32>, vector<224x112xf32> -> vector<224x112xf32>
    %22 = arith.addf %15, %21 : vector<224x112xf32>
    %c0_15 = arith.constant 0 : index
    %c0_16 = arith.constant 0 : index
    %23 = vector.load %arg3[%c0_15, %c0_16] : memref<1x112xf32, #tpu.memory_space<vmem>>, vector<1x112xf32>
    %24 = vector.broadcast %23 : vector<1x112xf32> to vector<224x112xf32>
    %25 = arith.addf %22, %24 : vector<224x112xf32>
    %cst_17 = arith.constant 0.000000e+00 : f32
    %26 = vector.broadcast %cst_17 : f32 to vector<224x112xf32>
    %27 = arith.maximumf %25, %26 : vector<224x112xf32>
    %28 = vector.extract_strided_slice %27 {offsets = [0, 0], sizes = [224, 56], strides = [1, 1]} : vector<224x112xf32> to vector<224x56xf32>
    %29 = vector.extract_strided_slice %27 {offsets = [0, 56], sizes = [224, 56], strides = [1, 1]} : vector<224x112xf32> to vector<224x56xf32>
    %30 = arith.maximumf %28, %29 : vector<224x56xf32>
    %c0_18 = arith.constant 0 : index
    %c0_19 = arith.constant 0 : index
    %c0_20 = arith.constant 0 : index
    %31 = vector.load %arg5[%c0_18, %c0_19, %c0_20] : memref<2x112x224xf32, #tpu.memory_space<vmem>>, vector<1x112x224xf32>
    %32 = vector.shape_cast %31 : vector<1x112x224xf32> to vector<112x224xf32>
    %cst_21 = arith.constant dense<0.000000e+00> : vector<112x56xf32>
    %33 = tpu.matmul %32, %30, %cst_21 {dimension_numbers = #tpu.dot_dimension_numbers<[1], [0], [0], [1], [0, 0, 1, 1], [], []>} : vector<112x224xf32>, vector<224x56xf32>, vector<112x56xf32> -> vector<112x56xf32>
    %c1_22 = arith.constant 1 : index
    %c0_23 = arith.constant 0 : index
    %c0_24 = arith.constant 0 : index
    %34 = vector.load %arg5[%c1_22, %c0_23, %c0_24] : memref<2x112x224xf32, #tpu.memory_space<vmem>>, vector<1x112x224xf32>
    %35 = vector.shape_cast %34 : vector<1x112x224xf32> to vector<112x224xf32>
    %cst_25 = arith.constant dense<0.000000e+00> : vector<112x56xf32>
    %36 = tpu.matmul %35, %30, %cst_25 {dimension_numbers = #tpu.dot_dimension_numbers<[1], [0], [0], [1], [0, 0, 1, 1], [], []>} : vector<112x224xf32>, vector<224x56xf32>, vector<112x56xf32> -> vector<112x56xf32>
    %37 = arith.maximumf %33, %36 : vector<112x56xf32>
    %cst_26 = arith.constant 0.000000e+00 : f32
    %38 = vector.broadcast %cst_26 : f32 to vector<1x56xf32>
    %39 = vector.extract_strided_slice %37 {offsets = [0, 0], sizes = [111, 56], strides = [1, 1]} : vector<112x56xf32> to vector<111x56xf32>
    %40 = tpu.concatenate %38, %39 in 0 : vector<1x56xf32>, vector<111x56xf32> -> vector<112x56xf32>
    %41 = vector.extract_strided_slice %37 {offsets = [1, 0], sizes = [111, 56], strides = [1, 1]} : vector<112x56xf32> to vector<111x56xf32>
    %42 = tpu.concatenate %41, %38 in 0 : vector<111x56xf32>, vector<1x56xf32> -> vector<112x56xf32>
    %c0_27 = arith.constant 0 : index
    %c0_28 = arith.constant 0 : index
    %43 = vector.load %arg8[%c0_27, %c0_28] : memref<112x2xf32, #tpu.memory_space<vmem>>, vector<112x1xf32>
    %44 = vector.broadcast %43 : vector<112x1xf32> to vector<112x56xf32>
    %45 = arith.mulf %40, %44 : vector<112x56xf32>
    %c0_29 = arith.constant 0 : index
    %c0_30 = arith.constant 0 : index
    %c0_31 = arith.constant 0 : index
    %46 = vector.load %arg6[%c0_29, %c0_30, %c0_31] : memref<3x56x112xf32, #tpu.memory_space<vmem>>, vector<1x56x112xf32>
    %47 = vector.shape_cast %46 : vector<1x56x112xf32> to vector<56x112xf32>
    %cst_32 = arith.constant dense<0.000000e+00> : vector<112x112xf32>
    %48 = tpu.matmul %45, %47, %cst_32 {dimension_numbers = #tpu.dot_dimension_numbers<[1], [0], [0], [1], [0, 0, 1, 1], [], []>} : vector<112x56xf32>, vector<56x112xf32>, vector<112x112xf32> -> vector<112x112xf32>
    %c1_33 = arith.constant 1 : index
    %c0_34 = arith.constant 0 : index
    %c0_35 = arith.constant 0 : index
    %49 = vector.load %arg6[%c1_33, %c0_34, %c0_35] : memref<3x56x112xf32, #tpu.memory_space<vmem>>, vector<1x56x112xf32>
    %50 = vector.shape_cast %49 : vector<1x56x112xf32> to vector<56x112xf32>
    %cst_36 = arith.constant dense<0.000000e+00> : vector<112x112xf32>
    %51 = tpu.matmul %37, %50, %cst_36 {dimension_numbers = #tpu.dot_dimension_numbers<[1], [0], [0], [1], [0, 0, 1, 1], [], []>} : vector<112x56xf32>, vector<56x112xf32>, vector<112x112xf32> -> vector<112x112xf32>
    %52 = arith.addf %48, %51 : vector<112x112xf32>
    %c0_37 = arith.constant 0 : index
    %c1_38 = arith.constant 1 : index
    %53 = vector.load %arg8[%c0_37, %c1_38] : memref<112x2xf32, #tpu.memory_space<vmem>>, vector<112x1xf32>
    %54 = vector.broadcast %53 : vector<112x1xf32> to vector<112x56xf32>
    %55 = arith.mulf %42, %54 : vector<112x56xf32>
    %c2_39 = arith.constant 2 : index
    %c0_40 = arith.constant 0 : index
    %c0_41 = arith.constant 0 : index
    %56 = vector.load %arg6[%c2_39, %c0_40, %c0_41] : memref<3x56x112xf32, #tpu.memory_space<vmem>>, vector<1x56x112xf32>
    %57 = vector.shape_cast %56 : vector<1x56x112xf32> to vector<56x112xf32>
    %cst_42 = arith.constant dense<0.000000e+00> : vector<112x112xf32>
    %58 = tpu.matmul %55, %57, %cst_42 {dimension_numbers = #tpu.dot_dimension_numbers<[1], [0], [0], [1], [0, 0, 1, 1], [], []>} : vector<112x56xf32>, vector<56x112xf32>, vector<112x112xf32> -> vector<112x112xf32>
    %59 = arith.addf %52, %58 : vector<112x112xf32>
    %c0_43 = arith.constant 0 : index
    %c0_44 = arith.constant 0 : index
    %60 = vector.load %arg7[%c0_43, %c0_44] : memref<1x112xf32, #tpu.memory_space<vmem>>, vector<1x112xf32>
    %61 = vector.broadcast %60 : vector<1x112xf32> to vector<112x112xf32>
    %62 = arith.addf %59, %61 : vector<112x112xf32>
    %cst_45 = arith.constant 0.000000e+00 : f32
    %63 = vector.broadcast %cst_45 : f32 to vector<112x112xf32>
    %64 = arith.maximumf %62, %63 : vector<112x112xf32>
    %65 = vector.extract_strided_slice %64 {offsets = [0, 0], sizes = [112, 56], strides = [1, 1]} : vector<112x112xf32> to vector<112x56xf32>
    %66 = vector.extract_strided_slice %64 {offsets = [0, 56], sizes = [112, 56], strides = [1, 1]} : vector<112x112xf32> to vector<112x56xf32>
    %67 = arith.maximumf %65, %66 : vector<112x56xf32>
    %c0_46 = arith.constant 0 : index
    %c0_47 = arith.constant 0 : index
    %c0_48 = arith.constant 0 : index
    %68 = vector.load %arg9[%c0_46, %c0_47, %c0_48] : memref<2x56x112xf32, #tpu.memory_space<vmem>>, vector<1x56x112xf32>
    %69 = vector.shape_cast %68 : vector<1x56x112xf32> to vector<56x112xf32>
    %cst_49 = arith.constant dense<0.000000e+00> : vector<56x56xf32>
    %70 = tpu.matmul %69, %67, %cst_49 {dimension_numbers = #tpu.dot_dimension_numbers<[1], [0], [0], [1], [0, 0, 1, 1], [], []>} : vector<56x112xf32>, vector<112x56xf32>, vector<56x56xf32> -> vector<56x56xf32>
    %c1_50 = arith.constant 1 : index
    %c0_51 = arith.constant 0 : index
    %c0_52 = arith.constant 0 : index
    %71 = vector.load %arg9[%c1_50, %c0_51, %c0_52] : memref<2x56x112xf32, #tpu.memory_space<vmem>>, vector<1x56x112xf32>
    %72 = vector.shape_cast %71 : vector<1x56x112xf32> to vector<56x112xf32>
    %cst_53 = arith.constant dense<0.000000e+00> : vector<56x56xf32>
    %73 = tpu.matmul %72, %67, %cst_53 {dimension_numbers = #tpu.dot_dimension_numbers<[1], [0], [0], [1], [0, 0, 1, 1], [], []>} : vector<56x112xf32>, vector<112x56xf32>, vector<56x56xf32> -> vector<56x56xf32>
    %74 = arith.maximumf %70, %73 : vector<56x56xf32>
    %cst_54 = arith.constant 0.000000e+00 : f32
    %75 = vector.broadcast %cst_54 : f32 to vector<1x56xf32>
    %76 = vector.extract_strided_slice %74 {offsets = [0, 0], sizes = [55, 56], strides = [1, 1]} : vector<56x56xf32> to vector<55x56xf32>
    %77 = tpu.concatenate %75, %76 in 0 : vector<1x56xf32>, vector<55x56xf32> -> vector<56x56xf32>
    %78 = vector.extract_strided_slice %74 {offsets = [1, 0], sizes = [55, 56], strides = [1, 1]} : vector<56x56xf32> to vector<55x56xf32>
    %79 = tpu.concatenate %78, %75 in 0 : vector<55x56xf32>, vector<1x56xf32> -> vector<56x56xf32>
    %c0_55 = arith.constant 0 : index
    %c0_56 = arith.constant 0 : index
    %80 = vector.load %arg12[%c0_55, %c0_56] : memref<56x2xf32, #tpu.memory_space<vmem>>, vector<56x1xf32>
    %81 = vector.broadcast %80 : vector<56x1xf32> to vector<56x56xf32>
    %82 = arith.mulf %77, %81 : vector<56x56xf32>
    %c0_57 = arith.constant 0 : index
    %c0_58 = arith.constant 0 : index
    %c0_59 = arith.constant 0 : index
    %83 = vector.load %arg10[%c0_57, %c0_58, %c0_59] : memref<3x56x96xf32, #tpu.memory_space<vmem>>, vector<1x56x96xf32>
    %84 = vector.shape_cast %83 : vector<1x56x96xf32> to vector<56x96xf32>
    %cst_60 = arith.constant dense<0.000000e+00> : vector<56x96xf32>
    %85 = tpu.matmul %82, %84, %cst_60 {dimension_numbers = #tpu.dot_dimension_numbers<[1], [0], [0], [1], [0, 0, 1, 1], [], []>} : vector<56x56xf32>, vector<56x96xf32>, vector<56x96xf32> -> vector<56x96xf32>
    %c1_61 = arith.constant 1 : index
    %c0_62 = arith.constant 0 : index
    %c0_63 = arith.constant 0 : index
    %86 = vector.load %arg10[%c1_61, %c0_62, %c0_63] : memref<3x56x96xf32, #tpu.memory_space<vmem>>, vector<1x56x96xf32>
    %87 = vector.shape_cast %86 : vector<1x56x96xf32> to vector<56x96xf32>
    %cst_64 = arith.constant dense<0.000000e+00> : vector<56x96xf32>
    %88 = tpu.matmul %74, %87, %cst_64 {dimension_numbers = #tpu.dot_dimension_numbers<[1], [0], [0], [1], [0, 0, 1, 1], [], []>} : vector<56x56xf32>, vector<56x96xf32>, vector<56x96xf32> -> vector<56x96xf32>
    %89 = arith.addf %85, %88 : vector<56x96xf32>
    %c0_65 = arith.constant 0 : index
    %c1_66 = arith.constant 1 : index
    %90 = vector.load %arg12[%c0_65, %c1_66] : memref<56x2xf32, #tpu.memory_space<vmem>>, vector<56x1xf32>
    %91 = vector.broadcast %90 : vector<56x1xf32> to vector<56x56xf32>
    %92 = arith.mulf %79, %91 : vector<56x56xf32>
    %c2_67 = arith.constant 2 : index
    %c0_68 = arith.constant 0 : index
    %c0_69 = arith.constant 0 : index
    %93 = vector.load %arg10[%c2_67, %c0_68, %c0_69] : memref<3x56x96xf32, #tpu.memory_space<vmem>>, vector<1x56x96xf32>
    %94 = vector.shape_cast %93 : vector<1x56x96xf32> to vector<56x96xf32>
    %cst_70 = arith.constant dense<0.000000e+00> : vector<56x96xf32>
    %95 = tpu.matmul %92, %94, %cst_70 {dimension_numbers = #tpu.dot_dimension_numbers<[1], [0], [0], [1], [0, 0, 1, 1], [], []>} : vector<56x56xf32>, vector<56x96xf32>, vector<56x96xf32> -> vector<56x96xf32>
    %96 = arith.addf %89, %95 : vector<56x96xf32>
    %c0_71 = arith.constant 0 : index
    %c0_72 = arith.constant 0 : index
    %97 = vector.load %arg11[%c0_71, %c0_72] : memref<56x96xf32, #tpu.memory_space<vmem>>, vector<56x96xf32>
    %98 = arith.addf %96, %97 : vector<56x96xf32>
    %cst_73 = arith.constant 0.000000e+00 : f32
    %99 = vector.broadcast %cst_73 : f32 to vector<56x96xf32>
    %100 = arith.maximumf %98, %99 : vector<56x96xf32>
    %101 = vector.extract_strided_slice %100 {offsets = [0, 0], sizes = [56, 48], strides = [1, 1]} : vector<56x96xf32> to vector<56x48xf32>
    %102 = vector.extract_strided_slice %100 {offsets = [0, 48], sizes = [56, 48], strides = [1, 1]} : vector<56x96xf32> to vector<56x48xf32>
    %103 = arith.maximumf %101, %102 : vector<56x48xf32>
    %c0_74 = arith.constant 0 : index
    %c0_75 = arith.constant 0 : index
    %c0_76 = arith.constant 0 : index
    %104 = vector.load %arg13[%c0_74, %c0_75, %c0_76] : memref<3x8x56xf32, #tpu.memory_space<vmem>>, vector<1x8x56xf32>
    %105 = vector.shape_cast %104 : vector<1x8x56xf32> to vector<8x56xf32>
    %cst_77 = arith.constant dense<0.000000e+00> : vector<8x48xf32>
    %106 = tpu.matmul %105, %103, %cst_77 {dimension_numbers = #tpu.dot_dimension_numbers<[1], [0], [0], [1], [0, 0, 1, 1], [], []>} : vector<8x56xf32>, vector<56x48xf32>, vector<8x48xf32> -> vector<8x48xf32>
    %c0_78 = arith.constant 0 : index
    %c0_79 = arith.constant 0 : index
    %c0_80 = arith.constant 0 : index
    %107 = vector.load %arg14[%c0_78, %c0_79, %c0_80] : memref<3x8x56xf32, #tpu.memory_space<vmem>>, vector<1x8x56xf32>
    %108 = vector.shape_cast %107 : vector<1x8x56xf32> to vector<8x56xf32>
    %cst_81 = arith.constant dense<0.000000e+00> : vector<8x48xf32>
    %109 = tpu.matmul %108, %103, %cst_81 {dimension_numbers = #tpu.dot_dimension_numbers<[1], [0], [0], [1], [0, 0, 1, 1], [], []>} : vector<8x56xf32>, vector<56x48xf32>, vector<8x48xf32> -> vector<8x48xf32>
    %110 = arith.maximumf %106, %109 : vector<8x48xf32>
    %c0_82 = arith.constant 0 : index
    %c0_83 = arith.constant 0 : index
    %c0_84 = arith.constant 0 : index
    %111 = vector.load %arg15[%c0_82, %c0_83, %c0_84] : memref<3x48x10xf32, #tpu.memory_space<vmem>>, vector<1x48x10xf32>
    %112 = vector.shape_cast %111 : vector<1x48x10xf32> to vector<48x10xf32>
    %cst_85 = arith.constant dense<0.000000e+00> : vector<8x10xf32>
    %113 = tpu.matmul %110, %112, %cst_85 {dimension_numbers = #tpu.dot_dimension_numbers<[1], [0], [0], [1], [0, 0, 1, 1], [], []>} : vector<8x48xf32>, vector<48x10xf32>, vector<8x10xf32> -> vector<8x10xf32>
    %c1_86 = arith.constant 1 : index
    %c0_87 = arith.constant 0 : index
    %c0_88 = arith.constant 0 : index
    %114 = vector.load %arg13[%c1_86, %c0_87, %c0_88] : memref<3x8x56xf32, #tpu.memory_space<vmem>>, vector<1x8x56xf32>
    %115 = vector.shape_cast %114 : vector<1x8x56xf32> to vector<8x56xf32>
    %cst_89 = arith.constant dense<0.000000e+00> : vector<8x48xf32>
    %116 = tpu.matmul %115, %103, %cst_89 {dimension_numbers = #tpu.dot_dimension_numbers<[1], [0], [0], [1], [0, 0, 1, 1], [], []>} : vector<8x56xf32>, vector<56x48xf32>, vector<8x48xf32> -> vector<8x48xf32>
    %c1_90 = arith.constant 1 : index
    %c0_91 = arith.constant 0 : index
    %c0_92 = arith.constant 0 : index
    %117 = vector.load %arg14[%c1_90, %c0_91, %c0_92] : memref<3x8x56xf32, #tpu.memory_space<vmem>>, vector<1x8x56xf32>
    %118 = vector.shape_cast %117 : vector<1x8x56xf32> to vector<8x56xf32>
    %cst_93 = arith.constant dense<0.000000e+00> : vector<8x48xf32>
    %119 = tpu.matmul %118, %103, %cst_93 {dimension_numbers = #tpu.dot_dimension_numbers<[1], [0], [0], [1], [0, 0, 1, 1], [], []>} : vector<8x56xf32>, vector<56x48xf32>, vector<8x48xf32> -> vector<8x48xf32>
    %120 = arith.maximumf %116, %119 : vector<8x48xf32>
    %c1_94 = arith.constant 1 : index
    %c0_95 = arith.constant 0 : index
    %c0_96 = arith.constant 0 : index
    %121 = vector.load %arg15[%c1_94, %c0_95, %c0_96] : memref<3x48x10xf32, #tpu.memory_space<vmem>>, vector<1x48x10xf32>
    %122 = vector.shape_cast %121 : vector<1x48x10xf32> to vector<48x10xf32>
    %cst_97 = arith.constant dense<0.000000e+00> : vector<8x10xf32>
    %123 = tpu.matmul %120, %122, %cst_97 {dimension_numbers = #tpu.dot_dimension_numbers<[1], [0], [0], [1], [0, 0, 1, 1], [], []>} : vector<8x48xf32>, vector<48x10xf32>, vector<8x10xf32> -> vector<8x10xf32>
    %124 = arith.addf %113, %123 : vector<8x10xf32>
    %c2_98 = arith.constant 2 : index
    %c0_99 = arith.constant 0 : index
    %c0_100 = arith.constant 0 : index
    %125 = vector.load %arg13[%c2_98, %c0_99, %c0_100] : memref<3x8x56xf32, #tpu.memory_space<vmem>>, vector<1x8x56xf32>
    %126 = vector.shape_cast %125 : vector<1x8x56xf32> to vector<8x56xf32>
    %cst_101 = arith.constant dense<0.000000e+00> : vector<8x48xf32>
    %127 = tpu.matmul %126, %103, %cst_101 {dimension_numbers = #tpu.dot_dimension_numbers<[1], [0], [0], [1], [0, 0, 1, 1], [], []>} : vector<8x56xf32>, vector<56x48xf32>, vector<8x48xf32> -> vector<8x48xf32>
    %c2_102 = arith.constant 2 : index
    %c0_103 = arith.constant 0 : index
    %c0_104 = arith.constant 0 : index
    %128 = vector.load %arg14[%c2_102, %c0_103, %c0_104] : memref<3x8x56xf32, #tpu.memory_space<vmem>>, vector<1x8x56xf32>
    %129 = vector.shape_cast %128 : vector<1x8x56xf32> to vector<8x56xf32>
    %cst_105 = arith.constant dense<0.000000e+00> : vector<8x48xf32>
    %130 = tpu.matmul %129, %103, %cst_105 {dimension_numbers = #tpu.dot_dimension_numbers<[1], [0], [0], [1], [0, 0, 1, 1], [], []>} : vector<8x56xf32>, vector<56x48xf32>, vector<8x48xf32> -> vector<8x48xf32>
    %131 = arith.maximumf %127, %130 : vector<8x48xf32>
    %c2_106 = arith.constant 2 : index
    %c0_107 = arith.constant 0 : index
    %c0_108 = arith.constant 0 : index
    %132 = vector.load %arg15[%c2_106, %c0_107, %c0_108] : memref<3x48x10xf32, #tpu.memory_space<vmem>>, vector<1x48x10xf32>
    %133 = vector.shape_cast %132 : vector<1x48x10xf32> to vector<48x10xf32>
    %cst_109 = arith.constant dense<0.000000e+00> : vector<8x10xf32>
    %134 = tpu.matmul %131, %133, %cst_109 {dimension_numbers = #tpu.dot_dimension_numbers<[1], [0], [0], [1], [0, 0, 1, 1], [], []>} : vector<8x48xf32>, vector<48x10xf32>, vector<8x10xf32> -> vector<8x10xf32>
    %135 = arith.addf %124, %134 : vector<8x10xf32>
    %c0_110 = arith.constant 0 : index
    %c0_111 = arith.constant 0 : index
    %136 = vector.load %arg16[%c0_110, %c0_111] : memref<1x10xf32, #tpu.memory_space<vmem>>, vector<1x10xf32>
    %137 = vector.broadcast %136 : vector<1x10xf32> to vector<8x10xf32>
    %138 = arith.addf %135, %137 : vector<8x10xf32>
    %c0_112 = arith.constant 0 : index
    %c0_113 = arith.constant 0 : index
    %139 = vector.load %arg17[%c0_112, %c0_113] : memref<8x10xf32, #tpu.memory_space<vmem>>, vector<8x10xf32>
    tpu.vector_store %arg17[%c0_112, %c0_113], %138 {strides = array<i32>} : memref<8x10xf32, #tpu.memory_space<vmem>>, vector<8x10xf32>,
    return
  }
  func.func @transform_0(%arg0: i32) -> (i32, i32) {
    %c0_i32 = arith.constant 0 : i32
    %c0_i32_0 = arith.constant 0 : i32
    return %arg0, %c0_i32 : i32, i32
  }
  func.func @transform_1(%arg0: i32) -> (i32, i32, i32) {
    %c0_i32 = arith.constant 0 : i32
    %c0_i32_0 = arith.constant 0 : i32
    %c0_i32_1 = arith.constant 0 : i32
    %c0_i32_2 = arith.constant 0 : i32
    return %c0_i32, %c0_i32_0, %c0_i32_1 : i32, i32, i32
  }
  func.func @transform_2(%arg0: i32) -> (i32, i32) {
    %c0_i32 = arith.constant 0 : i32
    %c0_i32_0 = arith.constant 0 : i32
    %c0_i32_1 = arith.constant 0 : i32
    return %c0_i32, %c0_i32_0 : i32, i32
  }
  func.func @transform_3(%arg0: i32) -> (i32, i32) {
    %c0_i32 = arith.constant 0 : i32
    %c0_i32_0 = arith.constant 0 : i32
    %c0_i32_1 = arith.constant 0 : i32
    return %c0_i32, %c0_i32_0 : i32, i32
  }
  func.func @transform_4(%arg0: i32) -> (i32, i32, i32) {
    %c0_i32 = arith.constant 0 : i32
    %c0_i32_0 = arith.constant 0 : i32
    %c0_i32_1 = arith.constant 0 : i32
    %c0_i32_2 = arith.constant 0 : i32
    return %c0_i32, %c0_i32_0, %c0_i32_1 : i32, i32, i32
  }
  func.func @transform_5(%arg0: i32) -> (i32, i32, i32) {
    %c0_i32 = arith.constant 0 : i32
    %c0_i32_0 = arith.constant 0 : i32
    %c0_i32_1 = arith.constant 0 : i32
    %c0_i32_2 = arith.constant 0 : i32
    return %c0_i32, %c0_i32_0, %c0_i32_1 : i32, i32, i32
  }
  func.func @transform_6(%arg0: i32) -> (i32, i32) {
    %c0_i32 = arith.constant 0 : i32
    %c0_i32_0 = arith.constant 0 : i32
    %c0_i32_1 = arith.constant 0 : i32
    return %c0_i32, %c0_i32_0 : i32, i32
  }
  func.func @transform_7(%arg0: i32) -> (i32, i32) {
    %c0_i32 = arith.constant 0 : i32
    %c0_i32_0 = arith.constant 0 : i32
    %c0_i32_1 = arith.constant 0 : i32
    return %c0_i32, %c0_i32_0 : i32, i32
  }
  func.func @transform_8(%arg0: i32) -> (i32, i32, i32) {
    %c0_i32 = arith.constant 0 : i32
    %c0_i32_0 = arith.constant 0 : i32
    %c0_i32_1 = arith.constant 0 : i32
    %c0_i32_2 = arith.constant 0 : i32
    return %c0_i32, %c0_i32_0, %c0_i32_1 : i32, i32, i32
  }
  func.func @transform_9(%arg0: i32) -> (i32, i32, i32) {
    %c0_i32 = arith.constant 0 : i32
    %c0_i32_0 = arith.constant 0 : i32
    %c0_i32_1 = arith.constant 0 : i32
    %c0_i32_2 = arith.constant 0 : i32
    return %c0_i32, %c0_i32_0, %c0_i32_1 : i32, i32, i32
  }
  func.func @transform_10(%arg0: i32) -> (i32, i32) {
    %c0_i32 = arith.constant 0 : i32
    %c0_i32_0 = arith.constant 0 : i32
    %c0_i32_1 = arith.constant 0 : i32
    return %c0_i32, %c0_i32_0 : i32, i32
  }
  func.func @transform_11(%arg0: i32) -> (i32, i32) {
    %c0_i32 = arith.constant 0 : i32
    %c0_i32_0 = arith.constant 0 : i32
    %c0_i32_1 = arith.constant 0 : i32
    return %c0_i32, %c0_i32_0 : i32, i32
  }
  func.func @transform_12(%arg0: i32) -> (i32, i32, i32) {
    %c0_i32 = arith.constant 0 : i32
    %c0_i32_0 = arith.constant 0 : i32
    %c0_i32_1 = arith.constant 0 : i32
    %c0_i32_2 = arith.constant 0 : i32
    return %c0_i32, %c0_i32_0, %c0_i32_1 : i32, i32, i32
  }
  func.func @transform_13(%arg0: i32) -> (i32, i32, i32) {
    %c0_i32 = arith.constant 0 : i32
    %c0_i32_0 = arith.constant 0 : i32
    %c0_i32_1 = arith.constant 0 : i32
    %c0_i32_2 = arith.constant 0 : i32
    return %c0_i32, %c0_i32_0, %c0_i32_1 : i32, i32, i32
  }
  func.func @transform_14(%arg0: i32) -> (i32, i32, i32) {
    %c0_i32 = arith.constant 0 : i32
    %c0_i32_0 = arith.constant 0 : i32
    %c0_i32_1 = arith.constant 0 : i32
    %c0_i32_2 = arith.constant 0 : i32
    return %c0_i32, %c0_i32_0, %c0_i32_1 : i32, i32, i32
  }
  func.func @transform_15(%arg0: i32) -> (i32, i32) {
    %c0_i32 = arith.constant 0 : i32
    %c0_i32_0 = arith.constant 0 : i32
    %c0_i32_1 = arith.constant 0 : i32
    return %c0_i32, %c0_i32_0 : i32, i32
  }
  func.func @transform_16(%arg0: i32) -> (i32, i32) {
    %c0_i32 = arith.constant 0 : i32
    %c0_i32_0 = arith.constant 0 : i32
    return %arg0, %c0_i32 : i32, i32
  }
}

</mosaic_0001>

<bundles_post_ra>
// kernel: tile.27
= control target key start
LH: loop header
LB: loop body
LE: loop exit
PB: predicated region body
PF: predicated region fallthrough
CT: control target
= control target key end

     0   :  { %vm3_vm0 = vcmask 785408   ;;  %s120_s0 = inlined_call_operand.vmem [shape: f32[8,7,96], index: 0, kind: input, shape index: {}]   ;;  %s121_s1 = inlined_call_operand.vmem [shape: f32[56,96], index: 1, kind: output, shape index: {}]  }
   0x1   :  { %v2_v0 = vld [vmem:[%s120_s0] sm:$0x7f]   ;;  %v40_v1 = vld [vmem:[%s120_s0 + $0x8] sm:$0x7f]   ;;  %v42_v2 = vld [vmem:[%s120_s0 + $0x10] sm:$0x7f]  }
   0x2   :  { %4 = vst.msk [vmem:[%s121_s1] sm:$0x7f] %vm3_vm0, %v2_v0   ;;  %v44_v3 = vld [vmem:[%s120_s0 + $0x18] sm:$0x7f]   ;;  %v46_v4 = vld [vmem:[%s120_s0 + $0x20] sm:$0x7f]  }
   0x3   :  { %41 = vst.msk [vmem:[%s121_s1 + $0x7] sm:$0x7f] %vm3_vm0, %v40_v1   ;;  %v48_v5 = vld [vmem:[%s120_s0 + $0x28] sm:$0x7f]   ;;  %v50_v6 = vld [vmem:[%s120_s0 + $0x30] sm:$0x7f]  }
   0x4   :  { %43 = vst.msk [vmem:[%s121_s1 + $0xe] sm:$0x7f] %vm3_vm0, %v42_v2   ;;  %v52_v7 = vld [vmem:[%s120_s0 + $0x38] sm:$0x7f]  }
   0x5   :  { %45 = vst.msk [vmem:[%s121_s1 + $0x15] sm:$0x7f] %vm3_vm0, %v44_v3  }
   0x6   :  { %47 = vst.msk [vmem:[%s121_s1 + $0x1c] sm:$0x7f] %vm3_vm0, %v46_v4  }
   0x7   :  { %49 = vst.msk [vmem:[%s121_s1 + $0x23] sm:$0x7f] %vm3_vm0, %v48_v5  }
   0x8   :  { %51 = vst.msk [vmem:[%s121_s1 + $0x2a] sm:$0x7f] %vm3_vm0, %v50_v6  }
   0x9   :  { %53 = vst.msk [vmem:[%s121_s1 + $0x31] sm:$0x7f] %vm3_vm0, %v52_v7  }

// kernel: tile.17
= control target key start
LH: loop header
LB: loop body
LE: loop exit
PB: predicated region body
PF: predicated region fallthrough
CT: control target
= control target key end

     0   :  { %s40_s0 = inlined_call_operand.vmem [shape: f32[4], index: 0, kind: input, shape index: {}]   ;;  %s41_s1 = inlined_call_operand.vmem [shape: f32[28,4], index: 1, kind: output, shape index: {}]  }
   0x1   :  { %v4_v0 = vld [vmem:[%s40_s0] ss:$0 sm:$0xff] }
   0x2   :  { %5 = vst [vmem:[%s41_s1] sm:$0xff] %v4_v0 }
   0x3   :  { %12 = vst [vmem:[%s41_s1 + $0x8] sm:$0xff] %v4_v0 }
   0x4   :  { %13 = vst [vmem:[%s41_s1 + $0x10] sm:$0xff] %v4_v0 }
   0x5   :  { %14 = vst [vmem:[%s41_s1 + $0x18] sm:$0xff] %v4_v0 }

// kernel: tile.22
= control target key start
LH: loop header
LB: loop body
LE: loop exit
PB: predicated region body
PF: predicated region fallthrough
CT: control target
= control target key end

     0   :  { %s28_s0 = inlined_call_operand.vmem [shape: f32[8], index: 0, kind: input, shape index: {}]   ;;  %s29_s1 = inlined_call_operand.vmem [shape: f32[14,8], index: 1, kind: output, shape index: {}]  }
   0x1   :  { %v4_v0 = vld [vmem:[%s28_s0] ss:$0 sm:$0xff] }
   0x2   :  { %5 = vst [vmem:[%s29_s1] sm:$0xff] %v4_v0 }
   0x3   :  { %8 = vst [vmem:[%s29_s1 + $0x8] sm:$0xff] %v4_v0 }

// kernel: tile.23
= control target key start
LH: loop header
LB: loop body
LE: loop exit
PB: predicated region body
PF: predicated region fallthrough
CT: control target
= control target key end

     0   :  { %s115_s10 = smov 104   ;;  %s116_s11 = smov 88   ;;  %vm3_vm0 = vcmask 64512   ;;  %vm9_vm1 = vcmask 917312   ;;  %vm15_vm2 = vcmask 851712   ;;  %vm21_vm3 = vcmask 786112   ;;  %s183_s0 = inlined_call_operand.vmem [shape: f32[14,8], index: 0, kind: input, shape index: {}]   ;;  %s184_s1 = inlined_call_operand.vmem [shape: f32[1,112], index: 1, kind: output, shape index: {}]  }
   0x1   :  { %v89_v0 = vld [vmem:[%s183_s0 + $0xd] sm:$0x1]   ;;  %v91_v1 = vld [vmem:[%s183_s0 + $0xb] sm:$0x1]   ;;  %v93_v2 = vld [vmem:[%s183_s0 + $0x9] sm:$0x1]  }
   0x2   :  { %7 = vrot.lane.b32.xlu0 %v89_v0, %s115_s10  ;;  %19 = vrot.lane.b32.xlu1 %v91_v1, %s116_s11  ;;  %s117_s14 = smov 72   ;;  %v90_v3 = vld [vmem:[%s183_s0 + $0xc] sm:$0x1]   ;;  %v92_v4 = vld [vmem:[%s183_s0 + $0xa] sm:$0x1]   ;;  %s118_s19 = smov 96  }
   0x3   :  { %31 = vrot.lane.b32.xlu2 %v93_v2, %s117_s14  ;;  %s119_s20 = smov 80   ;;  %v94_v5 = vld [vmem:[%s183_s0 + $0x8] sm:$0x1]   ;;  %s120_s23 = smov 64   ;;  %v95_v6 = vld [vmem:[%s183_s0 + $0x7] sm:$0x1]  }
   0x4   :  { %v96_v7 = vld [vmem:[%s183_s0 + $0x6] sm:$0x1]   ;;  %s121_s28 = smov 56   ;;  %s122_s29 = smov 48   ;;  %v97_v8 = vld [vmem:[%s183_s0 + $0x5] sm:$0x1]  }
   0x5   :  { %s123_s3 = smov 40   ;;  %v98_v9 = vld [vmem:[%s183_s0 + $0x4] sm:$0x1]   ;;  %v99_v10 = vld [vmem:[%s183_s0 + $0x3] sm:$0x1]   ;;  %s124_s8 = smov 32  }
   0x6   :  { %s125_s9 = smov 24   ;;  %v100_v11 = vld [vmem:[%s183_s0 + $0x2] sm:$0x1]   ;;  %s126_s12 = smov 16   ;;  %v101_v12 = vld [vmem:[%s183_s0 + $0x1] sm:$0x1]  }
   0x7   :  { %s127_s15 = smov 8   ;;  %v2_v13 = vld [vmem:[%s183_s0] sm:$0x1]   ;;  %vm27_vm4 = vcmask 720512   ;;  %vm33_vm5 = vcmask 654912   ;;  %vm39_vm6 = vcmask 589312  }
   0x8   :  { %4 = vst.msk [vmem:[#allocation0] sm:$0x1] %vm3_vm0, %v2_v13   ;;  %vm45_vm7 = vcmask 523712   ;;  %vm51_vm8 = vcmask 458112   ;;  %vm57_vm9 = vcmask 392512   ;;  %vm63_vm10 = vcmask 326912  }
   0x9   :  { %vm69_vm11 = vcmask 261312   ;;  %vm75_vm12 = vcmask 195712   ;;  %vm81_vm13 = vcmask 130112  }
   0xa   :  { %13 = vrot.lane.b32.xlu0 %v90_v3, %s118_s19  ;;  %25 = vrot.lane.b32.xlu1 %v92_v4, %s119_s20 }
   0xb   :  { %37 = vrot.lane.b32.xlu2 %v94_v5, %s120_s23 }
  0x12   :  { %43 = vrot.lane.b32.xlu0 %v95_v6, %s121_s28  ;;  %49 = vrot.lane.b32.xlu1 %v96_v7, %s122_s29 }
  0x13   :  { %55 = vrot.lane.b32.xlu2 %v97_v8, %s123_s3 }
  0x1a   :  { %61 = vrot.lane.b32.xlu0 %v98_v9, %s124_s8  ;;  %67 = vrot.lane.b32.xlu1 %v99_v10, %s125_s9 }
  0x1b   :  { %73 = vrot.lane.b32.xlu2 %v100_v11, %s126_s12 }
  0x22   :  { %79 = vrot.lane.b32.xlu0 %v101_v12, %s127_s15 }
  0x5d   :  { %v32_v14 = vpop.permute.xlu2 %31  }
  0x65   :  { %v38_v15 = vpop.permute.xlu2 %37  }
  0x6d   :  { %v56_v16 = vpop.permute.xlu2 %55  }
  0x74   :  { %v8_v17 = vpop.permute.xlu0 %7   ;;  %v20_v18 = vpop.permute.xlu1 %19  }
  0x75   :  { %10 = vst.msk [vmem:[#allocation0] sm:$0x1] %vm9_vm1, %v8_v17   ;;  %v74_v19 = vpop.permute.xlu2 %73  }
  0x7c   :  { %v14_v20 = vpop.permute.xlu0 %13   ;;  %v26_v21 = vpop.permute.xlu1 %25  }
  0x7d   :  { %16 = vst.msk [vmem:[#allocation0] sm:$0x1] %vm15_vm2, %v14_v20  }
  0x7e   :  { %22 = vst.msk [vmem:[#allocation0] sm:$0x1] %vm21_vm3, %v20_v18  }
  0x7f   :  { %28 = vst.msk [vmem:[#allocation0] sm:$0x1] %vm27_vm4, %v26_v21  }
  0x80   :  { %34 = vst.msk [vmem:[#allocation0] sm:$0x1] %vm33_vm5, %v32_v14  }
  0x81   :  { %40 = vst.msk [vmem:[#allocation0] sm:$0x1] %vm39_vm6, %v38_v15  }
  0x84   :  { %v44_v22 = vpop.permute.xlu0 %43   ;;  %v50_v23 = vpop.permute.xlu1 %49  }
  0x85   :  { %46 = vst.msk [vmem:[#allocation0] sm:$0x1] %vm45_vm7, %v44_v22  }
  0x86   :  { %52 = vst.msk [vmem:[#allocation0] sm:$0x1] %vm51_vm8, %v50_v23  }
  0x87   :  { %58 = vst.msk [vmem:[#allocation0] sm:$0x1] %vm57_vm9, %v56_v16  }
  0x8c   :  { %v62_v24 = vpop.permute.xlu0 %61   ;;  %v68_v25 = vpop.permute.xlu1 %67  }
  0x8d   :  { %64 = vst.msk [vmem:[#allocation0] sm:$0x1] %vm63_vm10, %v62_v24  }
  0x8e   :  { %70 = vst.msk [vmem:[#allocation0] sm:$0x1] %vm69_vm11, %v68_v25  }
  0x8f   :  { %76 = vst.msk [vmem:[#allocation0] sm:$0x1] %vm75_vm12, %v74_v19  }
  0x94   :  { %v80_v26 = vpop.permute.xlu0 %79  }
  0x95   :  { %82 = vst.msk [vmem:[#allocation0] sm:$0x1] %vm81_vm13, %v80_v26  }
  0x9c   :  { %v85_v27 = vld [vmem:[#allocation0] sm:$0x1] }
  0x9d   :  { %88 = vst [vmem:[%s184_s1] sm:$0x1] %v85_v27 }

// kernel: tile.18
= control target key start
LH: loop header
LB: loop body
LE: loop exit
PB: predicated region body
PF: predicated region fallthrough
CT: control target
= control target key end

     0   :  { %s227_s10 = smov 108   ;;  %s228_s11 = smov 100   ;;  %vm3_vm0 = vcmask 31744   ;;  %vm9_vm1 = vcmask 917344   ;;  %vm15_vm2 = vcmask 884544   ;;  %vm21_vm3 = vcmask 851744   ;;  %s351_s0 = inlined_call_operand.vmem [shape: f32[28,4], index: 0, kind: input, shape index: {}]   ;;  %s352_s1 = inlined_call_operand.vmem [shape: f32[1,112], index: 1, kind: output, shape index: {}]  }
   0x1   :  { %v173_v0 = vld [vmem:[%s351_s0 + $0x1b] sm:$0x1]   ;;  %v175_v1 = vld [vmem:[%s351_s0 + $0x19] sm:$0x1]   ;;  %v177_v2 = vld [vmem:[%s351_s0 + $0x17] sm:$0x1]  }
   0x2   :  { %7 = vrot.lane.b32.xlu0 %v173_v0, %s227_s10  ;;  %19 = vrot.lane.b32.xlu1 %v175_v1, %s228_s11  ;;  %s229_s14 = smov 92   ;;  %v174_v3 = vld [vmem:[%s351_s0 + $0x1a] sm:$0x1]   ;;  %v176_v4 = vld [vmem:[%s351_s0 + $0x18] sm:$0x1]   ;;  %s230_s19 = smov 104  }
   0x3   :  { %31 = vrot.lane.b32.xlu2 %v177_v2, %s229_s14  ;;  %s231_s20 = smov 96   ;;  %v178_v5 = vld [vmem:[%s351_s0 + $0x16] sm:$0x1]   ;;  %s232_s23 = smov 88   ;;  %v179_v6 = vld [vmem:[%s351_s0 + $0x15] sm:$0x1]  }
   0x4   :  { %v180_v7 = vld [vmem:[%s351_s0 + $0x14] sm:$0x1]   ;;  %s233_s28 = smov 84   ;;  %s234_s29 = smov 80   ;;  %v181_v8 = vld [vmem:[%s351_s0 + $0x13] sm:$0x1]  }
   0x5   :  { %s235_s3 = smov 76   ;;  %v182_v9 = vld [vmem:[%s351_s0 + $0x12] sm:$0x1]   ;;  %v183_v10 = vld [vmem:[%s351_s0 + $0x11] sm:$0x1]   ;;  %s236_s8 = smov 72  }
   0x6   :  { %s237_s9 = smov 68   ;;  %v184_v11 = vld [vmem:[%s351_s0 + $0x10] sm:$0x1]   ;;  %s238_s12 = smov 64   ;;  %v185_v12 = vld [vmem:[%s351_s0 + $0xf] sm:$0x1]  }
   0x7   :  { %v186_v13 = vld [vmem:[%s351_s0 + $0xe] sm:$0x1]   ;;  %s239_s17 = smov 60   ;;  %s240_s18 = smov 56   ;;  %v187_v14 = vld [vmem:[%s351_s0 + $0xd] sm:$0x1]  }
   0x8   :  { %s241_s21 = smov 52   ;;  %v188_v15 = vld [vmem:[%s351_s0 + $0xc] sm:$0x1]   ;;  %v189_v16 = vld [vmem:[%s351_s0 + $0xb] sm:$0x1]   ;;  %s242_s26 = smov 48  }
   0x9   :  { %s243_s27 = smov 44   ;;  %v190_v17 = vld [vmem:[%s351_s0 + $0xa] sm:$0x1]   ;;  %s244_s30 = smov 40   ;;  %v191_v18 = vld [vmem:[%s351_s0 + $0x9] sm:$0x1]  }
   0xa   :  { %13 = vrot.lane.b32.xlu0 %v174_v3, %s230_s19  ;;  %25 = vrot.lane.b32.xlu1 %v176_v4, %s231_s20  ;;  %v192_v19 = vld [vmem:[%s351_s0 + $0x8] sm:$0x1]   ;;  %s245_s6 = smov 36   ;;  %s246_s7 = smov 32   ;;  %v193_v20 = vld [vmem:[%s351_s0 + $0x7] sm:$0x1]  }
   0xb   :  { %37 = vrot.lane.b32.xlu2 %v178_v5, %s232_s23  ;;  %s247_s10 = smov 28   ;;  %v194_v21 = vld [vmem:[%s351_s0 + $0x6] sm:$0x1]   ;;  %v195_v22 = vld [vmem:[%s351_s0 + $0x5] sm:$0x1]   ;;  %s248_s15 = smov 24  }
   0xc   :  { %s249_s16 = smov 20   ;;  %v196_v23 = vld [vmem:[%s351_s0 + $0x4] sm:$0x1]   ;;  %s250_s19 = smov 16   ;;  %v197_v24 = vld [vmem:[%s351_s0 + $0x3] sm:$0x1]  }
   0xd   :  { %v198_v25 = vld [vmem:[%s351_s0 + $0x2] sm:$0x1]   ;;  %s251_s24 = smov 12   ;;  %s252_s25 = smov 8   ;;  %v199_v26 = vld [vmem:[%s351_s0 + $0x1] sm:$0x1]  }
   0xe   :  { %v2_v27 = vld [vmem:[%s351_s0] sm:$0x1]   ;;  %vm27_vm4 = vcmask 818944   ;;  %vm33_vm5 = vcmask 786144   ;;  %vm39_vm6 = vcmask 753344   ;;  %vm45_vm7 = vcmask 720544  }
   0xf   :  { %4 = vst.msk [vmem:[#allocation0] sm:$0x1] %vm3_vm0, %v2_v27   ;;  %vm51_vm8 = vcmask 687744   ;;  %vm57_vm9 = vcmask 654944   ;;  %vm63_vm10 = vcmask 622144   ;;  %vm69_vm11 = vcmask 589344  }
  0x10   :  { %vm75_vm12 = vcmask 556544   ;;  %vm81_vm13 = vcmask 523744   ;;  %vm87_vm14 = vcmask 490944   ;;  %vm93_vm15 = vcmask 458144  }
  0x11   :  { %vm99_vm0 = vcmask 425344  }
  0x12   :  { %43 = vrot.lane.b32.xlu0 %v179_v6, %s233_s28  ;;  %49 = vrot.lane.b32.xlu1 %v180_v7, %s234_s29  ;;  %s253_s28 = smov 4  }
  0x13   :  { %55 = vrot.lane.b32.xlu2 %v181_v8, %s235_s3 }
  0x1a   :  { %61 = vrot.lane.b32.xlu0 %v182_v9, %s236_s8  ;;  %67 = vrot.lane.b32.xlu1 %v183_v10, %s237_s9 }
  0x1b   :  { %73 = vrot.lane.b32.xlu2 %v184_v11, %s238_s12 }
  0x22   :  { %79 = vrot.lane.b32.xlu0 %v185_v12, %s239_s17  ;;  %85 = vrot.lane.b32.xlu1 %v186_v13, %s240_s18 }
  0x23   :  { %91 = vrot.lane.b32.xlu2 %v187_v14, %s241_s21 }
  0x2a   :  { %97 = vrot.lane.b32.xlu0 %v188_v15, %s242_s26  ;;  %103 = vrot.lane.b32.xlu1 %v189_v16, %s243_s27 }
  0x2b   :  { %109 = vrot.lane.b32.xlu2 %v190_v17, %s244_s30 }
  0x32   :  { %115 = vrot.lane.b32.xlu0 %v191_v18, %s245_s6  ;;  %121 = vrot.lane.b32.xlu1 %v192_v19, %s246_s7 }
  0x33   :  { %127 = vrot.lane.b32.xlu2 %v193_v20, %s247_s10 }
  0x3a   :  { %133 = vrot.lane.b32.xlu0 %v194_v21, %s248_s15  ;;  %139 = vrot.lane.b32.xlu1 %v195_v22, %s249_s16 }
  0x3b   :  { %145 = vrot.lane.b32.xlu2 %v196_v23, %s250_s19 }
  0x42   :  { %151 = vrot.lane.b32.xlu0 %v197_v24, %s251_s24  ;;  %157 = vrot.lane.b32.xlu1 %v198_v25, %s252_s25 }
  0x43   :  { %163 = vrot.lane.b32.xlu2 %v199_v26, %s253_s28 }
  0x5d   :  { %v32_v28 = vpop.permute.xlu2 %31  }
  0x65   :  { %v38_v29 = vpop.permute.xlu2 %37  }
  0x6d   :  { %v56_v30 = vpop.permute.xlu2 %55  }
  0x74   :  { %v8_v31 = vpop.permute.xlu0 %7   ;;  %v20_v32 = vpop.permute.xlu1 %19  }
  0x75   :  { %10 = vst.msk [vmem:[#allocation0] sm:$0x1] %vm9_vm1, %v8_v31   ;;  %v74_v33 = vpop.permute.xlu2 %73   ;;  %vm105_vm1 = vcmask 392544  }
  0x7c   :  { %v14_v34 = vpop.permute.xlu0 %13   ;;  %v26_v35 = vpop.permute.xlu1 %25  }
  0x7d   :  { %16 = vst.msk [vmem:[#allocation0] sm:$0x1] %vm15_vm2, %v14_v34   ;;  %v92_v36 = vpop.permute.xlu2 %91   ;;  %vm111_vm2 = vcmask 359744  }
  0x7e   :  { %22 = vst.msk [vmem:[#allocation0] sm:$0x1] %vm21_vm3, %v20_v32   ;;  %vm117_vm3 = vcmask 326944  }
  0x7f   :  { %28 = vst.msk [vmem:[#allocation0] sm:$0x1] %vm27_vm4, %v26_v35   ;;  %vm123_vm4 = vcmask 294144  }
  0x80   :  { %34 = vst.msk [vmem:[#allocation0] sm:$0x1] %vm33_vm5, %v32_v28   ;;  %vm129_vm5 = vcmask 261344  }
  0x81   :  { %40 = vst.msk [vmem:[#allocation0] sm:$0x1] %vm39_vm6, %v38_v29   ;;  %vm135_vm6 = vcmask 228544  }
  0x84   :  { %v44_v37 = vpop.permute.xlu0 %43   ;;  %v50_v38 = vpop.permute.xlu1 %49  }
  0x85   :  { %46 = vst.msk [vmem:[#allocation0] sm:$0x1] %vm45_vm7, %v44_v37   ;;  %v110_v39 = vpop.permute.xlu2 %109   ;;  %vm141_vm7 = vcmask 195744  }
  0x86   :  { %52 = vst.msk [vmem:[#allocation0] sm:$0x1] %vm51_vm8, %v50_v38   ;;  %vm147_vm8 = vcmask 162944  }
  0x87   :  { %58 = vst.msk [vmem:[#allocation0] sm:$0x1] %vm57_vm9, %v56_v30   ;;  %vm153_vm9 = vcmask 130144  }
  0x8c   :  { %v62_v40 = vpop.permute.xlu0 %61   ;;  %v68_v41 = vpop.permute.xlu1 %67  }
  0x8d   :  { %64 = vst.msk [vmem:[#allocation0] sm:$0x1] %vm63_vm10, %v62_v40   ;;  %v128_v42 = vpop.permute.xlu2 %127   ;;  %vm159_vm10 = vcmask 97344  }
  0x8e   :  { %70 = vst.msk [vmem:[#allocation0] sm:$0x1] %vm69_vm11, %v68_v41   ;;  %vm165_vm11 = vcmask 64544  }
  0x8f   :  { %76 = vst.msk [vmem:[#allocation0] sm:$0x1] %vm75_vm12, %v74_v33  }
  0x94   :  { %v80_v43 = vpop.permute.xlu0 %79   ;;  %v86_v44 = vpop.permute.xlu1 %85  }
  0x95   :  { %82 = vst.msk [vmem:[#allocation0] sm:$0x1] %vm81_vm13, %v80_v43   ;;  %v146_v45 = vpop.permute.xlu2 %145  }
  0x96   :  { %88 = vst.msk [vmem:[#allocation0] sm:$0x1] %vm87_vm14, %v86_v44  }
  0x97   :  { %94 = vst.msk [vmem:[#allocation0] sm:$0x1] %vm93_vm15, %v92_v36  }
  0x9c   :  { %v98_v46 = vpop.permute.xlu0 %97   ;;  %v104_v47 = vpop.permute.xlu1 %103  }
  0x9d   :  { %100 = vst.msk [vmem:[#allocation0] sm:$0x1] %vm99_vm0, %v98_v46   ;;  %v164_v48 = vpop.permute.xlu2 %163  }
  0x9e   :  { %106 = vst.msk [vmem:[#allocation0] sm:$0x1] %vm105_vm1, %v104_v47  }
  0x9f   :  { %112 = vst.msk [vmem:[#allocation0] sm:$0x1] %vm111_vm2, %v110_v39  }
  0xa4   :  { %v116_v49 = vpop.permute.xlu0 %115   ;;  %v122_v50 = vpop.permute.xlu1 %121  }
  0xa5   :  { %118 = vst.msk [vmem:[#allocation0] sm:$0x1] %vm117_vm3, %v116_v49  }
  0xa6   :  { %124 = vst.msk [vmem:[#allocation0] sm:$0x1] %vm123_vm4, %v122_v50  }
  0xa7   :  { %130 = vst.msk [vmem:[#allocation0] sm:$0x1] %vm129_vm5, %v128_v42  }
  0xac   :  { %v134_v51 = vpop.permute.xlu0 %133   ;;  %v140_v52 = vpop.permute.xlu1 %139  }
  0xad   :  { %136 = vst.msk [vmem:[#allocation0] sm:$0x1] %vm135_vm6, %v134_v51  }
  0xae   :  { %142 = vst.msk [vmem:[#allocation0] sm:$0x1] %vm141_vm7, %v140_v52  }
  0xaf   :  { %148 = vst.msk [vmem:[#allocation0] sm:$0x1] %vm147_vm8, %v146_v45  }
  0xb4   :  { %v152_v53 = vpop.permute.xlu0 %151   ;;  %v158_v54 = vpop.permute.xlu1 %157  }
  0xb5   :  { %154 = vst.msk [vmem:[#allocation0] sm:$0x1] %vm153_vm9, %v152_v53  }
  0xb6   :  { %160 = vst.msk [vmem:[#allocation0] sm:$0x1] %vm159_vm10, %v158_v54  }
  0xb7   :  { %166 = vst.msk [vmem:[#allocation0] sm:$0x1] %vm165_vm11, %v164_v48  }
  0xbe   :  { %v169_v55 = vld [vmem:[#allocation0] sm:$0x1] }
  0xbf   :  { %172 = vst [vmem:[%s352_s1] sm:$0x1] %v169_v55 }

// kernel: mnist_forward_pallas.1
= control target key start
LH: loop header
LB: loop body
LE: loop exit
PB: predicated region body
PF: predicated region fallthrough
CT: control target
= control target key end

     0   :  { %s6152_s0 = inlined_call_operand.vmem [shape: f32[448,28], index: 0, kind: input, shape index: {}]   ;;  %s6153_s1 = inlined_call_operand.vmem [shape: f32[3,28,112], index: 1, kind: input, shape index: {}]   ;;  %s6154_s2 = inlined_call_operand.vmem [shape: f32[1,112], index: 2, kind: input, shape index: {}]   ;;  %s6155_s3 = inlined_call_operand.vmem [shape: f32[224,2], index: 3, kind: input, shape index: {}]   ;;  %s6156_s4 = inlined_call_operand.vmem [shape: f32[2,112,224], index: 4, kind: input, shape index: {}]   ;;  %s6157_s5 = inlined_call_operand.vmem [shape: f32[3,56,112], index: 5, kind: input, shape index: {}]   ;;  %s6158_s6 = inlined_call_operand.vmem [shape: f32[1,112], index: 6, kind: input, shape index: {}]   ;;  %s6159_s7 = inlined_call_operand.vmem [shape: f32[112,2], index: 7, kind: input, shape index: {}]   ;;  %s6160_s8 = inlined_call_operand.vmem [shape: f32[2,56,112], index: 8, kind: input, shape index: {}]   ;;  %s6161_s9 = inlined_call_operand.vmem [shape: f32[3,56,96], index: 9, kind: input, shape index: {}]   ;;  %s6162_s10 = inlined_call_operand.vmem [shape: f32[56,96], index: 10, kind: input, shape index: {}]   ;;  %s6163_s11 = inlined_call_operand.vmem [shape: f32[56,2], index: 11, kind: input, shape index: {}]   ;;  %s6164_s12 = inlined_call_operand.vmem [shape: f32[3,8,56], index: 12, kind: input, shape index: {}]   ;;  %s6165_s13 = inlined_call_operand.vmem [shape: f32[3,8,56], index: 13, kind: input, shape index: {}]   ;;  %s6166_s14 = inlined_call_operand.vmem [shape: f32[3,48,10], index: 14, kind: input, shape index: {}]   ;;  %s6167_s15 = inlined_call_operand.vmem [shape: f32[1,10], index: 15, kind: input, shape index: {}]   ;;  %s6168_s16 = inlined_call_operand.hbm [shape: f32[16,10], index: 16, kind: output, shape index: {}]  }
   0x1   :  { %6181 = sst [smem:[#allocation11_spill]] %s6152_s0 }
   0x2   :  { %6182 = sst [smem:[#allocation12_spill]] %s6153_s1 }
   0x3   :  { %21 = vsyncpa [#allocation3], 0 }
   0x4   :  { %23 = vsyncpa [#allocation3 + $0x1], 0  ;;  %s4484_s21 = smov 0   ;;  %s4486_s22 = smov 0  }
   0x5   :  { %s4488_s23 = smov 0   ;;  %s4490_s24 = smov 0  }
   0x6 LB: > { %6183 = sst [smem:[#allocation5_spill]] %s4381_s21  ;;  %s4505_s25 = sadd.s32 4294967295, %s4393_s24   ;;  %s4393_s24 = sphi %s4490_s24, %s6202_s24   ;;  %s4389_s23 = sphi %s4488_s23, %s6204_s23   ;;  %s4385_s22 = sphi %s4486_s22, %s6206_s22   ;;  %s4381_s21 = sphi %s4484_s21, %s6205_s21  }
   0x7   : > { %6184 = sst [smem:[#allocation6_spill]] %s4389_s23  ;;  %s3805_s26 = sadd.s32 4294967294, %s4393_s24  }
   0x8   : > { %6185 = sst [smem:[#allocation7_spill]] %s4393_s24  ;;  %s4509_s27 = sadd.s32 1, %s4393_s24  }
   0x9   : > { %6186 = sst [smem:[#allocation8_spill]] %s4509_s27  ;;  %s377_s28 = sadd.s32 1, %s4389_s23 }
   0xa   : > { %s374_s29 = ssub.s32 %s4393_s24, %s4509_s27  ;;  %p387_p0 = scmp.ne.s32.totalorder %s4389_s23, %s4385_s22 }
   0xb   : > { %p375_p1 = scmp.eq.s32.totalorder %s374_s29, 0  ;;  %p388_p2 = scmp.eq.s32.totalorder %s4505_s25, 1 }
   0xc   : > { %p393_p3 = scmp.ne.s32.totalorder %s4385_s22, %s4381_s21  ;;  %p394_p4 = scmp.eq.s32.totalorder %s3805_s26, 1 }
   0xd   : > { %s4520_s30 = scalar_select %p375_p1, %s4389_s23, %s377_s28  }
   0xe   : > { %p4522_p5 = por %p388_p2, %p387_p0  ;;  %p4526_p6 = por %p394_p4, %p393_p3 }
   0xf   : > { %6187 = sst [smem:[#allocation9_spill]] %s4520_s30  ;;  %p3808_p7 = scmp.ge.s32.totalorder %s4393_s24, 1 }
  0x10   : > { %s6189_s17 = scalar_select %p4526_p6, 1, 0 }
  0x11   : > { %p466_p8 = scmp.lt.s32.totalorder %s4393_s24, 3 }
  0x12   : > { %6190 = sst [smem:[#allocation10_spill]] %s6189_s17 }
  0x13   : > { %p467_p9 = pnand %p3808_p7, %p466_p8 }
  0x14   : > { %s6191_s1 = sld [smem:[#allocation12_spill]] (!%p467_p9)  ;;  %s516_s18 = smul.u32 (!%p467_p9), 28, %s4505_s25 }
  0x15   : > { %470 = sbr.rel (%p467_p9) target bundleno = 1941 (0x795), region = 84  ;;  %s6192_s29 = sld [smem:[#allocation11_spill]] (!%p467_p9) }
  0x16   : > { %p517_p10 = scmp.lt.s32.totalorder (!%p467_p9), %s516_s18, 55  ;;  %s4397_s17 = smov (!%p467_p9), 72  }
  0x1a   : > { %v748_v0 = vld [vmem:[%s6155_s3] sm:$0xff]  ;;  %v749_v1 = vld [vmem:[%s6155_s3 + $0x8] sm:$0xff]  ;;  %v4395_v2 = vmov 1   ;;  %v750_v3 = vld [vmem:[%s6155_s3 + $0x10] sm:$0xff]  ;;  %v4396_v4 = vmov 0   ;;  %vm1010_vm0 = vcmask 1043456  }
  0x1b   : > { %4146 = vset.pattern.permute.xlu0 %v4395_v2  ;;  %4148 = vset.pattern.permute.xlu1 %v4395_v2  ;;  %v751_v5 = vld [vmem:[%s6155_s3 + $0x18] sm:$0xff]  ;;  %v752_v6 = vld [vmem:[%s6155_s3 + $0x20] sm:$0xff]  ;;  %v754_v7 = vld [vmem:[%s6155_s3 + $0x30] sm:$0xff]  ;;  %s6208_s18 = smov (!%p517_p10, %s516_s18), 55  ;;  %vm953_vm1 = vcmask 228352   ;;  %vm663_vm2 = vcmask 1046528  }
  0x1c   : > { %1304 = vperm.xlu0 %4146, %v748_v0   ;;  %1308 = vperm.xlu1 %4148, %v749_v1   ;;  %v753_v8 = vld [vmem:[%s6155_s3 + $0x28] sm:$0xff]  ;;  %v755_v10 = vld [vmem:[%s6155_s3 + $0x38] sm:$0xff]  ;;  %v756_v12 = vld [vmem:[%s6155_s3 + $0x40] sm:$0xff]  ;;  %s3810_s26 = sshll.u32 %s6208_s18, 3  ;;  %vm578_vm3 = vcmask 1040384   ;;  %vm1892_vm4 = vcmask 785408  }
  0x1d   : > { %4150 = vset.pattern.permute.xlu2 %v4395_v2  ;;  %v757_v9 = vld [vmem:[%s6155_s3 + $0x48] sm:$0xff]  ;;  %v759_v11 = vld [vmem:[%s6155_s3 + $0x58] sm:$0xff]  ;;  %v3875_v14 = vld [vmem:[%s6191_s1 + $0x50] sm:$0xff]  ;;  %s4635_s24 = scalar_lea.vmem %s6192_s29, %s3810_s26  ;;  %vm2467_vm5 = vcmask 457728   ;;  %vm2958_vm6 = vcmask 916480   ;;  %vm3594_vm7 = vcmask 392192  }
  0x1e   : > { %1312 = vperm.xlu2 %4150, %v750_v3   ;;  %v3876_v13 = vld [vmem:[%s6191_s1 + $0x58] sm:$0xf]  ;;  %v758_v15 = vld [vmem:[%s6155_s3 + $0x50] sm:$0xff]  ;;  %v3874_v17 = vld [vmem:[%s6191_s1 + $0x48] sm:$0xff]  ;;  %s513_s29 = sand.u32 1, %s4385_s22   ;;  %s4100_s18 = sshll.u32 %s4505_s25, 3 }
  0x1f   : > { %3877 = vmatpush.msk.msra.mxu2 %vm1010_vm0, %v3876_v13  ;;  %v762_v16 = vld [vmem:[%s6155_s3 + $0x70] sm:$0xff]  ;;  %v760_v18 = vld [vmem:[%s6155_s3 + $0x60] sm:$0xff]  ;;  %v761_v19 = vld [vmem:[%s6155_s3 + $0x68] sm:$0xff]  ;;  %s3741_s23 = scalar_lea.hbm %s6168_s16, %s4100_s18  ;;  %vm3728_vm8 = vcmask 80896   ;;  %s3731_s25 = scalar_lea.sflag [#allocation3], %s513_s29 }
  0x20   : > { %v3873_v20 = vld [vmem:[%s6191_s1 + $0x40] sm:$0xff]  ;;  %v3814_v21 = vld [vmem:[%s6191_s1 + $0x38] sm:$0xf]  ;;  %v3813_v23 = vld [vmem:[%s6191_s1 + $0x30] sm:$0xff] }
  0x21   : > { %1548 = vmatpush.msra.mxu2 %v3875_v14  ;;  %v947_v22 = vld [vmem:[%s6191_s1 + $0x18] sm:$0xf]  ;;  %3815 = vmatpush.msk.msra.mxu0 %vm1010_vm0, %v3814_v21  ;;  %v946_v24 = vld [vmem:[%s6191_s1 + $0x10] sm:$0xff]  ;;  %v3812_v25 = vld [vmem:[%s6191_s1 + $0x28] sm:$0xff] }
  0x22   : > { %3844 = vmatpush.msk.msra.mxu1 %vm1010_vm0, %v947_v22  ;;  %v945_v26 = vld [vmem:[%s6191_s1 + $0x8] sm:$0xff]  ;;  %v3811_v27 = vld [vmem:[%s6191_s1 + $0x20] sm:$0xff]  ;;  %v763_v30 = vld [vmem:[%s6155_s3 + $0x78] sm:$0xff] }
  0x23   : > { %1549 = vmatpush.msra.mxu2 %v3874_v17  ;;  %1027 = vmatpush.msra.mxu0 %v3813_v23  ;;  %v944_v28 = vld [vmem:[%s6191_s1] sm:$0xff]  ;;  %v4651_v31 = vld [vmem:[%s4635_s24 + $0x8] sm:$0xff]  ;;  %v4660_v35 = vld [vmem:[%s4635_s24 + $0x10] sm:$0xff] }
  0x24   : > { %4147 = vset.pattern.permute.xlu0 %v4396_v4  ;;  %4149 = vset.pattern.permute.xlu1 %v4396_v4  ;;  %v522_v29 = vld [vmem:[%s4635_s24] sm:$0xff]  ;;  %v665_v34 = vrot.slane %v4651_v31, 1  ;;  %v765_v36 = vld [vmem:[%s6155_s3 + $0x88] sm:$0xff]  ;;  %v667_v40 = vrot.slane %v4660_v35, 1  ;;  %v4674_v42 = vld [vmem:[%s4635_s24 + $0x18] sm:$0xff]  ;;  %v580_v52 = vrot.slane %v4651_v31, 7 }
  0x25   : > { %778 = vperm.xlu0 %4147, %v748_v0   ;;  %783 = vperm.xlu1 %4149, %v749_v1   ;;  %v764_v32 = vld [vmem:[%s6155_s3 + $0x80] sm:$0xff]  ;;  %v664_v33 = vrot.slane %v522_v29, 1  ;;  %v579_v43 = vrot.slane %v522_v29, 7  ;;  %v766_v44 = vld [vmem:[%s6155_s3 + $0x90] sm:$0xff]  ;;  %v767_v46 = vld [vmem:[%s6155_s3 + $0x98] sm:$0xff]  ;;  %v669_v50 = vrot.slane %v4674_v42, 1 }
  0x26   : > { %4151 = vset.pattern.permute.xlu2 %v4396_v4  ;;  %1550 = vmatpush.msra.mxu2 %v3873_v20  ;;  %v668_v45 = vsel %vm663_vm2, %v665_v34, %v667_v40  ;;  %v4690_v55 = vld [vmem:[%s4635_s24 + $0x20] sm:$0xff]  ;;  %v582_v62 = vrot.slane %v4660_v35, 7  ;;  %v4707_v0 = vld [vmem:[%s4635_s24 + $0x28] sm:$0xff]  ;;  %v4736_v22 = vld [vmem:[%s4635_s24 + $0x38] sm:$0xff] }
  0x27   : > { %788 = vperm.xlu2 %4151, %v750_v3   ;;  %1215 = vmatpush.msra.mxu1 %v946_v24  ;;  %v666_v37 = vsel %vm663_vm2, %v664_v33, %v665_v34  ;;  %v662_v48 = vsel %vm578_vm3, 0.0, %v579_v43  ;;  %v670_v56 = vsel %vm663_vm2, %v667_v40, %v669_v50  ;;  %v581_v57 = vsel %vm578_vm3, %v579_v43, %v580_v52  ;;  %v768_v61 = vld [vmem:[%s6155_s3 + $0xa0] sm:$0xff]  ;;  %v769_v14 = vld [vmem:[%s6155_s3 + $0xa8] sm:$0xff] }
  0x28   : > { %1028 = vmatpush.msra.mxu0 %v3812_v25  ;;  %v671_v60 = vrot.slane %v4690_v55, 1  ;;  %v772_v33 = vld [vmem:[%s6155_s3 + $0xc0] sm:$0xff] }
  0x29   : > { %1216 = vmatpush.msra.mxu1 %v945_v26  ;;  %v771_v26 = vld [vmem:[%s6155_s3 + $0xb8] sm:$0xff] }
  0x2a   : > { %1029 = vmatpush.msra.mxu0 %v3811_v27  ;;  %v672_v3 = vsel %vm663_vm2, %v669_v50, %v671_v60 }
  0x2b   : > { %1217 = vmatpush.msra.mxu1 %v944_v28  ;;  %3816 = vmatmul.msk.f32.vlgmr.msra.gmra.mxu0 %vm953_vm1, %v522_v29  ;;  %v677_v29 = vrot.slane %v4736_v22, 1 }
  0x2d   : > { %4152 = vset.pattern.permute.xlu1 %v4395_v2  ;;  %4153 = vset.pattern.permute.xlu0 %v4395_v2 }
  0x2e   : > { %1316 = vperm.xlu1 %4152, %v751_v5   ;;  %1320 = vperm.xlu0 %4153, %v752_v6  }
  0x2f   : > { %793 = vperm.xlu2 %4151, %v751_v5   ;;  %v583_v5 = vsel %vm578_vm3, %v580_v52, %v582_v62  ;;  %v4783_v52 = vld [vmem:[%s4635_s24 + $0x50] sm:$0xff] }
  0x33   : > { %3817 = vmatmul.msk.f32.gmra.mxu0 %vm953_vm1, %v4651_v31  ;;  %v4752_v31 = vld [vmem:[%s4635_s24 + $0x40] sm:$0xff] }
  0x36   : > { %4154 = vset.pattern.permute.xlu1 %v4396_v4  ;;  %4156 = vset.pattern.permute.xlu0 %v4396_v4 }
  0x37   : > { %798 = vperm.xlu1 %4154, %v752_v6   ;;  %808 = vperm.xlu0 %4156, %v754_v7  }
  0x38   : > { %4155 = vset.pattern.permute.xlu2 %v4395_v2 }
  0x39   : > { %1324 = vperm.xlu2 %4155, %v753_v8  }
  0x3b   : > { %3818 = vmatmul.msk.f32.gmra.mxu0 %vm953_vm1, %v4660_v35 }
  0x3f   : > { %803 = vperm.xlu1 %4154, %v753_v8   ;;  %4159 = vset.pattern.permute.xlu0 %v4395_v2  ;;  %v673_v8 = vrot.slane %v4707_v0, 1 }
  0x40   : > { %1340 = vperm.xlu0 %4159, %v757_v9  }
  0x41   : > { %1328 = vperm.xlu2 %4155, %v754_v7   ;;  %v674_v13 = vsel %vm663_vm2, %v671_v60, %v673_v8  ;;  %v4795_v60 = vld [vmem:[%s4635_s24 + $0x58] sm:$0xff] }
  0x43   : > { %3819 = vmatmul.msk.f32.gmra.mxu0 %vm953_vm1, %v4674_v42 }
  0x47   : > { %4157 = vset.pattern.permute.xlu1 %v4395_v2 }
  0x48   : > { %1332 = vperm.xlu1 %4157, %v755_v10   ;;  %4162 = vset.pattern.permute.xlu0 %v4396_v4 }
  0x49   : > { %4158 = vset.pattern.permute.xlu2 %v4396_v4  ;;  %833 = vperm.xlu0 %4162, %v759_v11  }
  0x4a   : > { %813 = vperm.xlu2 %4158, %v755_v10   ;;  %v4718_v10 = vld [vmem:[%s4635_s24 + $0x30] sm:$0xff] }
  0x4b   : > { %3820 = vmatmul.msk.f32.gmra.mxu0 %vm953_vm1, %v4690_v55 }
  0x50   : > { %1336 = vperm.xlu1 %4157, %v756_v12  }
  0x51   : > { %4165 = vset.pattern.permute.xlu0 %v4395_v2 }
  0x52   : > { %818 = vperm.xlu2 %4158, %v756_v12   ;;  %1360 = vperm.xlu0 %4165, %v762_v16  }
  0x53   : > { %3821 = vmatmul.msk.f32.gmra.mxu0 %vm953_vm1, %v4707_v0 }
  0x58   : > { %4160 = vset.pattern.permute.xlu1 %v4396_v4 }
  0x59   : > { %823 = vperm.xlu1 %4160, %v757_v9   ;;  %v584_v9 = vrot.slane %v4674_v42, 7 }
  0x5a   : > { %4161 = vset.pattern.permute.xlu2 %v4395_v2  ;;  %4168 = vset.pattern.permute.xlu0 %v4396_v4 }
  0x5b   : > { %1344 = vperm.xlu2 %4161, %v758_v15   ;;  %858 = vperm.xlu0 %4168, %v764_v32  }
  0x5c   : > { %3822 = vmatmul.msk.f32.gmra.mxu0 %vm953_vm1, %v4718_v10 }
  0x61   : > { %828 = vperm.xlu1 %4160, %v758_v15   ;;  %v770_v15 = vld [vmem:[%s6155_s3 + $0xb0] sm:$0xff] }
  0x63   : > { %1348 = vperm.xlu2 %4161, %v759_v11   ;;  %4171 = vset.pattern.permute.xlu0 %v4395_v2 }
  0x64   : > { %1380 = vperm.xlu0 %4171, %v767_v46   ;;  %3823 = vmatmul.msk.f32.gmra.mxu0 %vm953_vm1, %v4736_v22 }
  0x69   : > { %4163 = vset.pattern.permute.xlu1 %v4395_v2 }
  0x6a   : > { %1352 = vperm.xlu1 %4163, %v760_v18  }
  0x6b   : > { %4164 = vset.pattern.permute.xlu2 %v4396_v4 }
  0x6c   : > { %838 = vperm.xlu2 %4164, %v760_v18   ;;  %4174 = vset.pattern.permute.xlu0 %v4396_v4  ;;  %v675_v18 = vrot.slane %v4718_v10, 1 }
  0x6d   : > { %883 = vperm.xlu0 %4174, %v769_v14   ;;  %3824 = vmatmul.msk.f32.gmra.mxu0 %vm953_vm1, %v4752_v31 }
  0x6e   : > { %v676_v24 = vsel %vm663_vm2, %v673_v8, %v675_v18  ;;  %v678_v35 = vsel %vm663_vm2, %v675_v18, %v677_v29  ;;  %v535_v18 = vld [vmem:[%s4635_s24 + $0x68] sm:$0xff] }
  0x72   : > { %1356 = vperm.xlu1 %4163, %v761_v19  }
  0x74   : > { %843 = vperm.xlu2 %4164, %v761_v19   ;;  %v586_v19 = vrot.slane %v4690_v55, 7 }
  0x75   : > { %4177 = vset.pattern.permute.xlu0 %v4395_v2 }
  0x76   : > { %v587_v25 = vsel %vm578_vm3, %v584_v9, %v586_v19  ;;  %1400 = vperm.xlu0 %4177, %v772_v33  }
  0x78   : > { %v1313_v49 = vpop.permute.xlu2 %1312 }
  0x79   : > { %v1417_v58 = vmul.f32 %v1313_v49, %v670_v56  ;;  %v592_v49 = vrot.slane %v4736_v22, 7 }
  0x7a   : > { %4166 = vset.pattern.permute.xlu1 %v4396_v4 }
  0x7b   : > { %848 = vperm.xlu1 %4166, %v762_v16   ;;  %v585_v16 = vsel %vm578_vm3, %v582_v62, %v584_v9 }
  0x7c   : > { %4167 = vset.pattern.permute.xlu2 %v4395_v2 }
  0x7d   : > { %1364 = vperm.xlu2 %4167, %v763_v30  }
  0x7e   : > { %4180 = vset.pattern.permute.xlu0 %v4396_v4 }
  0x81   : > { %v789_v63 = vpop.permute.xlu2 %788 }
  0x82   : > { %v918_v7 = vmul.f32 %v789_v63, %v583_v5 }
  0x83   : > { %853 = vperm.xlu1 %4166, %v763_v30   ;;  %v588_v30 = vrot.slane %v4707_v0, 7  ;;  %v774_v0 = vld [vmem:[%s6155_s3 + $0xd0] sm:$0xff] }
  0x84   : > { %908 = vperm.xlu0 %4180, %v774_v0  }
  0x85   : > { %1368 = vperm.xlu2 %4167, %v764_v32  }
  0x89   : > { %v794_v11 = vpop.permute.xlu2 %793 }
  0x8a   : > { %v919_v20 = vmul.f32 %v794_v11, %v585_v16 }
  0x8b   : > { %4169 = vset.pattern.permute.xlu1 %v4395_v2 }
  0x8c   : > { %1372 = vperm.xlu1 %4169, %v765_v36  }
  0x8d   : > { %4170 = vset.pattern.permute.xlu2 %v4396_v4 }
  0x8e   : > { %v1305_v38 = vpop.permute.xlu0 %1304  ;;  %v1309_v39 = vpop.permute.xlu1 %1308  ;;  %863 = vperm.xlu2 %4170, %v765_v36   ;;  %v589_v36 = vsel %vm578_vm3, %v586_v19, %v588_v30 }
  0x8f   : > { %v1415_v41 = vmul.f32 %v1305_v38, %v666_v37  ;;  %v1416_v47 = vmul.f32 %v1309_v39, %v668_v45  ;;  %v679_v37 = vrot.slane %v4752_v31, 1  ;;  %v590_v39 = vrot.slane %v4718_v10, 7  ;;  %v534_v10 = vld [vmem:[%s4635_s24 + $0x60] sm:$0xff] }
  0x90   : > { %v687_v16 = vrot.slane %v534_v10, 1 }
  0x91   : > { %3878 = vmatmul.msk.f32.vlgmr.msra.gmra.mxu2 %vm953_vm1, %v1415_v41  ;;  %v4767_v41 = vld [vmem:[%s4635_s24 + $0x48] sm:$0xff]  ;;  %v680_v43 = vsel %vm663_vm2, %v677_v29, %v679_v37  ;;  %v591_v45 = vsel %vm578_vm3, %v588_v30, %v590_v39 }
  0x92   : > { %3825 = vmatmul.msk.f32.gmra.mxu0 %vm953_vm1, %v4767_v41 }
  0x93   : > { %v1325_v23 = vpop.permute.xlu2 %1324 }
  0x94   : > { %1376 = vperm.xlu1 %4169, %v766_v44   ;;  %v1420_v27 = vmul.f32 %v1325_v23, %v676_v24  ;;  %v689_v23 = vrot.slane %v535_v18, 1 }
  0x96   : > { %868 = vperm.xlu2 %4170, %v766_v44   ;;  %v690_v29 = vsel %vm663_vm2, %v687_v16, %v689_v23 }
  0x97   : > { %v779_v51 = vpop.permute.xlu0 %778  ;;  %v784_v54 = vpop.permute.xlu1 %783 }
  0x98   : > { %v916_v53 = vmul.f32 %v779_v51, %v662_v48  ;;  %v917_v59 = vmul.f32 %v784_v54, %v581_v57  ;;  %v681_v51 = vrot.slane %v4767_v41, 1  ;;  %v683_v57 = vrot.slane %v4783_v52, 1 }
  0x99   : > { %3879 = vmatmul.msk.f32.gmra.mxu2 %vm953_vm1, %v1416_v47 }
  0x9a   : > { %3845 = vmatmul.msk.f32.vlgmr.msra.gmra.mxu1 %vm953_vm1, %v916_v53  ;;  %3826 = vmatmul.msk.f32.gmra.mxu0 %vm953_vm1, %v4783_v52  ;;  %v593_v53 = vsel %vm578_vm3, %v590_v39, %v592_v49  ;;  %v682_v55 = vsel %vm663_vm2, %v679_v37, %v681_v51  ;;  %v684_v63 = vsel %vm663_vm2, %v681_v51, %v683_v57  ;;  %v537_v37 = vld [vmem:[%s4635_s24 + $0x78] sm:$0xff] }
  0x9b   : > { %v1329_v34 = vpop.permute.xlu2 %1328 }
  0x9c   : > { %4172 = vset.pattern.permute.xlu1 %v4396_v4  ;;  %v1421_v38 = vmul.f32 %v1329_v34, %v678_v35  ;;  %v602_v34 = vrot.slane %v534_v10, 7 }
  0x9d   : > { %873 = vperm.xlu1 %4172, %v767_v46   ;;  %v773_v46 = vld [vmem:[%s6155_s3 + $0xc8] sm:$0xff] }
  0x9e   : > { %4173 = vset.pattern.permute.xlu2 %v4395_v2 }
  0x9f   : > { %1384 = vperm.xlu2 %4173, %v768_v61  }
  0xa0   : > { %v1317_v1 = vpop.permute.xlu1 %1316  ;;  %v1321_v12 = vpop.permute.xlu0 %1320 }
  0xa1   : > { %3880 = vmatmul.msk.f32.gmra.mxu2 %vm953_vm1, %v1417_v58  ;;  %v1418_v6 = vmul.f32 %v1317_v1, %v672_v3  ;;  %v1419_v17 = vmul.f32 %v1321_v12, %v674_v13  ;;  %v775_v1 = vld [vmem:[%s6155_s3 + $0xd8] sm:$0xff] }
  0xa2   : > { %3846 = vmatmul.msk.f32.gmra.mxu1 %vm953_vm1, %v917_v59  ;;  %v594_v59 = vrot.slane %v4752_v31, 7  ;;  %3827 = vmatmul.msk.f32.gmra.mxu0 %vm953_vm1, %v4795_v60 }
  0xa4   : > { %v814_v50 = vpop.permute.xlu2 %813  ;;  %v595_v3 = vsel %vm578_vm3, %v592_v49, %v594_v59 }
  0xa5   : > { %878 = vperm.xlu1 %4172, %v768_v61   ;;  %v923_v56 = vmul.f32 %v814_v50, %v593_v53 }
  0xa7   : > { %1388 = vperm.xlu2 %4173, %v769_v14  }
  0xa9   : > { %3881 = vmatmul.msk.f32.gmra.mxu2 %vm953_vm1, %v1418_v6  ;;  %v799_v21 = vpop.permute.xlu1 %798  ;;  %v809_v44 = vpop.permute.xlu0 %808  ;;  %v685_v6 = vrot.slane %v4795_v60, 1 }
  0xaa   : > { %3847 = vmatmul.msk.f32.gmra.mxu1 %vm953_vm1, %v918_v7  ;;  %v920_v28 = vmul.f32 %v799_v21, %v587_v25  ;;  %v922_v48 = vmul.f32 %v809_v44, %v591_v45  ;;  %v596_v7 = vrot.slane %v4767_v41, 7  ;;  %3828 = vmatmul.msk.f32.gmra.mxu0 %vm953_vm1, %v534_v10  ;;  %v600_v25 = vrot.slane %v4795_v60, 7  ;;  %v1031_v44 = vpop.f32.mrf.mxu0 }
  0xab   : > { %v686_v12 = vsel %vm663_vm2, %v683_v57, %v685_v6  ;;  %v688_v21 = vsel %vm663_vm2, %v685_v6, %v687_v16  ;;  %v604_v45 = vrot.slane %v535_v18, 7  ;;  %v4851_v57 = vld [vmem:[%s4635_s24 + $0x88] sm:$0xff] }
  0xac   : > { %v819_v61 = vpop.permute.xlu2 %818  ;;  %v597_v13 = vsel %vm578_vm3, %v594_v59, %v596_v7 }
  0xad   : > { %4175 = vset.pattern.permute.xlu1 %v4395_v2  ;;  %v924_v8 = vmul.f32 %v819_v61, %v595_v3  ;;  %v605_v50 = vsel %vm578_vm3, %v602_v34, %v604_v45  ;;  %v608_v3 = vrot.slane %v537_v37, 7 }
  0xae   : > { %1392 = vperm.xlu1 %4175, %v770_v15  }
  0xaf   : > { %4176 = vset.pattern.permute.xlu2 %v4396_v4 }
  0xb0   : > { %888 = vperm.xlu2 %4176, %v770_v15  }
  0xb1   : > { %3882 = vmatmul.msk.f32.gmra.mxu2 %vm953_vm1, %v1419_v17  ;;  %v804_v32 = vpop.permute.xlu1 %803  ;;  %v598_v17 = vrot.slane %v4783_v52, 7 }
  0xb2   : > { %3848 = vmatmul.msk.f32.gmra.mxu1 %vm953_vm1, %v919_v20  ;;  %v921_v40 = vmul.f32 %v804_v32, %v589_v36  ;;  %v1341_v62 = vpop.permute.xlu0 %1340  ;;  %3829 = vmatmul.msk.f32.gmra.mxu0 %vm953_vm1, %v535_v18 }
  0xb3   : > { %v1424_v5 = vmul.f32 %v1341_v62, %v684_v63  ;;  %v599_v22 = vsel %vm578_vm3, %v596_v7, %v598_v17  ;;  %v601_v31 = vsel %vm578_vm3, %v598_v17, %v600_v25 }
  0xb5   : > { %v1345_v11 = vpop.permute.xlu2 %1344 }
  0xb6   : > { %1396 = vperm.xlu1 %4175, %v771_v26   ;;  %v1425_v14 = vmul.f32 %v1345_v11, %v686_v12 }
  0xb8   : > { %893 = vperm.xlu2 %4176, %v771_v26  }
  0xb9   : > { %3883 = vmatmul.msk.f32.gmra.mxu2 %vm953_vm1, %v1420_v27  ;;  %v536_v27 = vld [vmem:[%s4635_s24 + $0x70] sm:$0xff] }
  0xba   : > { %3849 = vmatmul.msk.f32.gmra.mxu1 %vm953_vm1, %v920_v28  ;;  %v1333_v42 = vpop.permute.xlu1 %1332  ;;  %3830 = vmatmul.msk.f32.gmra.mxu0 %vm953_vm1, %v536_v27  ;;  %v691_v36 = vrot.slane %v536_v27, 1 }
  0xbb   : > { %v1422_v47 = vmul.f32 %v1333_v42, %v680_v43  ;;  %v834_v30 = vpop.permute.xlu0 %833  ;;  %v693_v42 = vrot.slane %v537_v37, 1 }
  0xbd   : > { %v1349_v20 = vpop.permute.xlu2 %1348  ;;  %v694_v49 = vsel %vm663_vm2, %v691_v36, %v693_v42 }
  0xbe   : > { %4178 = vset.pattern.permute.xlu1 %v4396_v4  ;;  %v1426_v24 = vmul.f32 %v1349_v20, %v688_v21 }
  0xbf   : > { %898 = vperm.xlu1 %4178, %v772_v33   ;;  %v927_v33 = vmul.f32 %v834_v30, %v601_v31 }
  0xc0   : > { %4179 = vset.pattern.permute.xlu2 %v4395_v2 }
  0xc1   : > { %3884 = vmatmul.msk.f32.gmra.mxu2 %vm953_vm1, %v1421_v38  ;;  %1404 = vperm.xlu2 %4179, %v773_v46   ;;  %v603_v38 = vsel %vm578_vm3, %v600_v25, %v602_v34 }
  0xc2   : > { %3850 = vmatmul.msk.f32.gmra.mxu1 %vm953_vm1, %v921_v40  ;;  %v1337_v54 = vpop.permute.xlu1 %1336  ;;  %3831 = vmatmul.msk.f32.gmra.mxu0 %vm953_vm1, %v537_v37  ;;  %v692_v40 = vsel %vm663_vm2, %v689_v23, %v691_v36 }
  0xc3   : > { %v1423_v58 = vmul.f32 %v1337_v54, %v682_v55  ;;  %v606_v54 = vrot.slane %v536_v27, 7  ;;  %v1034_v55 = vpop.f32.mrf.mxu0 }
  0xc5   : > { %v607_v60 = vsel %vm578_vm3, %v604_v45, %v606_v54 }
  0xc6   : > { %v839_v35 = vpop.permute.xlu2 %838 }
  0xc7   : > { %903 = vperm.xlu1 %4178, %v773_v46   ;;  %v928_v41 = vmul.f32 %v839_v35, %v603_v38  ;;  %v4841_v46 = vld [vmem:[%s4635_s24 + $0x80] sm:$0xff] }
  0xc8   : > { %v695_v53 = vrot.slane %v4841_v46, 1  ;;  %v610_v11 = vrot.slane %v4841_v46, 7 }
  0xc9   : > { %3885 = vmatmul.msk.f32.gmra.mxu2 %vm953_vm1, %v1422_v47  ;;  %1408 = vperm.xlu2 %4179, %v774_v0  }
  0xca   : > { %3851 = vmatmul.msk.f32.gmra.mxu1 %vm953_vm1, %v922_v48  ;;  %v1361_v48 = vpop.permute.xlu0 %1360  ;;  %3832 = vmatmul.msk.f32.gmra.mxu0 %vm953_vm1, %v4841_v46  ;;  %v696_v59 = vsel %vm663_vm2, %v693_v42, %v695_v53  ;;  %v611_v18 = vsel %vm578_vm3, %v608_v3, %v610_v11  ;;  %v4904_v42 = vld [vmem:[%s4635_s24 + $0xa8] sm:$0xff] }
  0xcb   : > { %v824_v9 = vpop.permute.xlu1 %823  ;;  %v1429_v51 = vmul.f32 %v1361_v48, %v694_v49  ;;  %v4858_v63 = vpop.f32.mrf.mxu0 }
  0xcc   : > { %v925_v15 = vmul.f32 %v824_v9, %v597_v13 }
  0xce   : > { %v844_v47 = vpop.permute.xlu2 %843 }
  0xcf   : > { %4181 = vset.pattern.permute.xlu1 %v4395_v2 }
  0xd0   : > { %1412 = vperm.xlu1 %4181, %v775_v1  }
  0xd1   : > { %3886 = vmatmul.msk.f32.gmra.mxu2 %vm953_vm1, %v1423_v58  ;;  %4182 = vset.pattern.permute.xlu2 %v4396_v4 }
  0xd2   : > { %3852 = vmatmul.msk.f32.gmra.mxu1 %vm953_vm1, %v923_v56  ;;  %913 = vperm.xlu2 %4182, %v775_v1   ;;  %v929_v56 = vmul.f32 %v844_v47, %v605_v50  ;;  %v697_v1 = vrot.slane %v4851_v57, 1  ;;  %v859_v17 = vpop.permute.xlu0 %858 }
  0xd3   : > { %v829_v19 = vpop.permute.xlu1 %828  ;;  %3833 = vmatmul.msk.f32.gmra.mxu0 %vm953_vm1, %v4851_v57  ;;  %v4872_v12 = vpop.f32.mrf.mxu0 }
  0xd4   : > { %v926_v26 = vmul.f32 %v829_v19, %v599_v22  ;;  %v698_v7 = vsel %vm663_vm2, %v695_v53, %v697_v1  ;;  %v932_v22 = vmul.f32 %v859_v17, %v611_v18  ;;  %v620_v18 = vrot.slane %v4904_v42, 7 }
  0xd7   : > { %v1365_v58 = vpop.permute.xlu2 %1364 }
  0xd8   : > { %4253 = vset.pattern.permute.xlu1 %v4396_v4  ;;  %v1430_v61 = vmul.f32 %v1365_v58, %v696_v59 }
  0xd9   : > { %3887 = vmatmul.msk.f32.gmra.mxu2 %vm953_vm1, %v1424_v5  ;;  %v4863_v5 = vld [vmem:[%s4635_s24 + $0x90] sm:$0xff] }
  0xda   : > { %3853 = vmatmul.msk.f32.gmra.mxu1 %vm953_vm1, %v924_v8  ;;  %4254 = vset.pattern.permute.xlu2 %v4395_v2  ;;  %v609_v8 = vsel %vm578_vm3, %v606_v54, %v608_v3  ;;  %v699_v9 = vrot.slane %v4863_v5, 1  ;;  %v614_v37 = vrot.slane %v4863_v5, 7 }
  0xdb   : > { %3834 = vmatmul.msk.f32.gmra.mxu0 %vm953_vm1, %v4863_v5  ;;  %v4885_v27 = vpop.f32.mrf.mxu0 }
  0xdc   : > { %v1353_v28 = vpop.permute.xlu1 %1352  ;;  %v700_v16 = vsel %vm663_vm2, %v697_v1, %v699_v9 }
  0xdd   : > { %v1427_v32 = vmul.f32 %v1353_v28, %v690_v29  ;;  %v4889_v28 = vld [vmem:[%s4635_s24 + $0xa0] sm:$0xff] }
  0xde   : > { %v703_v36 = vrot.slane %v4889_v28, 1  ;;  %v618_v1 = vrot.slane %v4889_v28, 7 }
  0xdf   : > { %v1369_v6 = vpop.permute.xlu2 %1368 }
  0xe0   : > { %v1431_v10 = vmul.f32 %v1369_v6, %v698_v7 }
  0xe1   : > { %3888 = vmatmul.msk.f32.gmra.mxu2 %vm953_vm1, %v1425_v14 }
  0xe2   : > { %3854 = vmatmul.msk.f32.gmra.mxu1 %vm953_vm1, %v925_v15  ;;  %v4876_v15 = vld [vmem:[%s4635_s24 + $0x98] sm:$0xff] }
  0xe3   : > { %3835 = vmatmul.msk.f32.gmra.mxu0 %vm953_vm1, %v4876_v15  ;;  %v701_v23 = vrot.slane %v4876_v15, 1 }
  0xe4   : > { %v1357_v39 = vpop.permute.xlu1 %1356 }
  0xe5   : > { %v1428_v43 = vmul.f32 %v1357_v39, %v692_v40  ;;  %v702_v31 = vsel %vm663_vm2, %v699_v9, %v701_v23  ;;  %v704_v45 = vsel %vm663_vm2, %v701_v23, %v703_v36 }
  0xe8   : > { %v864_v21 = vpop.permute.xlu2 %863 }
  0xe9   : > { %3889 = vmatmul.msk.f32.gmra.mxu2 %vm953_vm1, %v1426_v24  ;;  %v612_v24 = vrot.slane %v4851_v57, 7  ;;  %v4920_v57 = vld [vmem:[%s4635_s24 + $0xb0] sm:$0xff] }
  0xea   : > { %3855 = vmatmul.msk.f32.gmra.mxu1 %vm953_vm1, %v926_v26 }
  0xeb   : > { %3836 = vmatmul.msk.f32.gmra.mxu0 %vm953_vm1, %v4889_v28  ;;  %v615_v46 = vsel %vm578_vm3, %v612_v24, %v614_v37 }
  0xed   : > { %v849_v52 = vpop.permute.xlu1 %848 }
  0xee   : > { %v930_v62 = vmul.f32 %v849_v52, %v607_v60  ;;  %v616_v52 = vrot.slane %v4876_v15, 7 }
  0xf0   : > { %v869_v39 = vpop.permute.xlu2 %868  ;;  %v617_v60 = vsel %vm578_vm3, %v614_v37, %v616_v52 }
  0xf1   : > { %3890 = vmatmul.msk.f32.gmra.mxu2 %vm953_vm1, %v1427_v32  ;;  %v613_v32 = vsel %vm578_vm3, %v610_v11, %v612_v24  ;;  %v934_v49 = vmul.f32 %v869_v39, %v615_v46  ;;  %v621_v24 = vsel %vm578_vm3, %v618_v1, %v620_v18 }
  0xf2   : > { %3856 = vmatmul.msk.f32.gmra.mxu1 %vm953_vm1, %v927_v33  ;;  %v933_v35 = vmul.f32 %v864_v21, %v613_v32  ;;  %v4955_v21 = vld [vmem:[%s4635_s24 + $0xc0] sm:$0xff]  ;;  %v622_v32 = vrot.slane %v4920_v57, 7 }
  0xf3   : > { %3837 = vmatmul.msk.f32.gmra.mxu0 %vm953_vm1, %v4904_v42 }
  0xf5   : > { %v854_v0 = vpop.permute.xlu1 %853 }
  0xf6   : > { %v931_v13 = vmul.f32 %v854_v0, %v609_v8  ;;  %v707_v0 = vrot.slane %v4920_v57, 1  ;;  %v4936_v8 = vld [vmem:[%s4635_s24 + $0xb8] sm:$0xff] }
  0xf9   : > { %3891 = vmatmul.msk.f32.gmra.mxu2 %vm953_vm1, %v1428_v43 }
  0xfa   : > { %3857 = vmatmul.msk.f32.gmra.mxu1 %vm953_vm1, %v928_v41  ;;  %v4900_v41 = vpop.f32.mrf.mxu0 }
  0xfb   : > { %3838 = vmatmul.msk.f32.gmra.mxu0 %vm953_vm1, %v4920_v57 }
  0xfe   : > { %v1373_v14 = vpop.permute.xlu1 %1372 }
  0xff   : > { %v1432_v20 = vmul.f32 %v1373_v14, %v700_v16  ;;  %v709_v16 = vrot.slane %v4936_v8, 1 }
 0x101   : > { %3892 = vmatmul.msk.f32.gmra.mxu2 %vm953_vm1, %v1429_v51  ;;  %v705_v51 = vrot.slane %v4904_v42, 1 }
 0x102   : > { %3858 = vmatmul.msk.f32.gmra.mxu1 %vm953_vm1, %v929_v56  ;;  %v4916_v56 = vpop.f32.mrf.mxu0 }
 0x103   : > { %v706_v59 = vsel %vm663_vm2, %v703_v36, %v705_v51  ;;  %v708_v11 = vsel %vm663_vm2, %v705_v51, %v707_v0  ;;  %3839 = vmatmul.msk.f32.gmra.mxu0 %vm953_vm1, %v4936_v8 }
 0x106   : > { %v1377_v30 = vpop.permute.xlu1 %1376 }
 0x107   : > { %v1433_v34 = vmul.f32 %v1377_v30, %v702_v31  ;;  %v711_v31 = vrot.slane %v4955_v21, 1 }
 0x109   : > { %3893 = vmatmul.msk.f32.gmra.mxu2 %vm953_vm1, %v1430_v61  ;;  %v712_v37 = vsel %vm663_vm2, %v709_v16, %v711_v31 }
 0x10a   : > { %3859 = vmatmul.msk.f32.gmra.mxu1 %vm953_vm1, %v930_v62  ;;  %v4932_v7 = vpop.f32.mrf.mxu0 }
 0x10b   : > { %3840 = vmatmul.msk.f32.gmra.mxu0 %vm953_vm1, %v4955_v21 }
 0x10f   : > { %v874_v50 = vpop.permute.xlu1 %873 }
 0x111   : > { %3894 = vmatmul.msk.f32.gmra.mxu2 %vm953_vm1, %v1431_v10 }
 0x112   : > { %3860 = vmatmul.msk.f32.gmra.mxu1 %vm953_vm1, %v931_v13  ;;  %v619_v13 = vsel %vm578_vm3, %v616_v52, %v618_v1 }
 0x114   : > { %v1552_v19 = vpop.f32.mrf.mxu2 }
 0x117   : > { %v1219_v25 = vpop.f32.mrf.mxu1  ;;  %v879_v5 = vpop.permute.xlu1 %878 }
 0x118   : > { %v1220_v26 = vadd.f32 %v1219_v25, %v1031_v44  ;;  %v1381_v44 = vpop.permute.xlu0 %1380  ;;  %v936_v15 = vmul.f32 %v879_v5, %v619_v13 }
 0x119   : > { %3895 = vmatmul.msk.f32.gmra.mxu2 %vm953_vm1, %v1432_v20  ;;  %v1434_v48 = vmul.f32 %v1381_v44, %v704_v45  ;;  %v4951_v20 = vpop.f32.mrf.mxu0  ;;  %v624_v45 = vrot.slane %v4936_v8, 7 }
 0x11a   : > { %v4891_v29 = vadd.f32 %v1552_v19, %v1220_v26  ;;  %3861 = vmatmul.msk.f32.gmra.mxu1 %vm953_vm1, %v932_v22  ;;  %v710_v22 = vsel %vm663_vm2, %v707_v0, %v709_v16  ;;  %v549_v0 = vld [vmem:[%s4635_s24 + $0xd8] sm:$0xff] }
 0x11b   : > { %v625_v52 = vsel %vm578_vm3, %v622_v32, %v624_v45 }
 0x11c   : > { %v1555_v33 = vpop.f32.mrf.mxu2 }
 0x11f   : > { %v1222_v38 = vpop.f32.mrf.mxu1 }
 0x120   : > { %v1223_v40 = vadd.f32 %v1222_v38, %v1034_v55  ;;  %v1385_v55 = vpop.permute.xlu2 %1384  ;;  %v1393_v19 = vpop.permute.xlu1 %1392  ;;  %v623_v38 = vsel %vm578_vm3, %v620_v18, %v622_v32 }
 0x121   : > { %3896 = vmatmul.msk.f32.gmra.mxu2 %vm953_vm1, %v1433_v34  ;;  %v1435_v62 = vmul.f32 %v1385_v55, %v706_v59  ;;  %v884_v23 = vpop.permute.xlu0 %883  ;;  %v1437_v26 = vmul.f32 %v1393_v19, %v710_v22  ;;  %v4968_v34 = vpop.f32.mrf.mxu0 }
 0x122   : > { %v4906_v43 = vadd.f32 %v1555_v33, %v1223_v40  ;;  %3862 = vmatmul.msk.f32.gmra.mxu1 %vm953_vm1, %v933_v35  ;;  %v937_v30 = vmul.f32 %v884_v23, %v621_v24  ;;  %v547_v35 = vld [vmem:[%s4635_s24 + $0xc8] sm:$0xff] }
 0x123   : > { %3841 = vmatmul.msk.f32.gmra.mxu0 %vm953_vm1, %v547_v35  ;;  %v713_v44 = vrot.slane %v547_v35, 1 }
 0x124   : > { %v1558_v47 = vpop.f32.mrf.mxu2 }
 0x125   : > { %v714_v51 = vsel %vm663_vm2, %v711_v31, %v713_v44 }
 0x127   : > { %v1225_v53 = vpop.f32.mrf.mxu1 }
 0x128   : > { %v1226_v54 = vadd.f32 %v1225_v53, %v4858_v63  ;;  %v935_v63 = vmul.f32 %v874_v50, %v617_v60  ;;  %v1389_v10 = vpop.permute.xlu2 %1388  ;;  %v1397_v36 = vpop.permute.xlu1 %1396  ;;  %v626_v60 = vrot.slane %v4955_v21, 7 }
 0x129   : > { %3897 = vmatmul.msk.f32.gmra.mxu2 %vm953_vm1, %v1434_v48  ;;  %v1436_v14 = vmul.f32 %v1389_v10, %v708_v11  ;;  %v1438_v40 = vmul.f32 %v1397_v36, %v712_v37  ;;  %v1061_v48 = vpop.f32.mrf.mxu0  ;;  %v1401_v50 = vpop.permute.xlu0 %1400  ;;  %v717_v10 = vrot.slane %v549_v0, 1  ;;  %v628_v11 = vrot.slane %v547_v35, 7 }
 0x12a   : > { %v4922_v58 = vadd.f32 %v1558_v47, %v1226_v54  ;;  %3863 = vmatmul.msk.f32.gmra.mxu1 %vm953_vm1, %v934_v49  ;;  %v548_v49 = vld [vmem:[%s4635_s24 + $0xd0] sm:$0xff]  ;;  %v1439_v54 = vmul.f32 %v1401_v50, %v714_v51  ;;  %s3745_s24 = sshll.u32 %s3741_s23, 4  ;;  %s3746_s24 = int_to_ptr.hbm [resolvable:$true] %s3745_s24 }
 0x12b   : > { %3842 = vmatmul.msk.f32.gmra.mxu0 %vm953_vm1, %v548_v49  ;;  %v715_v57 = vrot.slane %v548_v49, 1  ;;  %v629_v19 = vsel %vm578_vm3, %v626_v60, %v628_v11  ;;  %v747_v31 = vsel %vm663_vm2, %v717_v10, 0.0  ;;  %s4345_s21 = sshra.s32 %s3746_s24, 4  ;;  %s4346_s21 = int_to_ptr.hbm [resolvable:$true] %s4345_s21 }
 0x12c   : > { %v1561_v61 = vpop.f32.mrf.mxu2  ;;  %s4347_s18 = scalar_lea.hbm %s4346_s21, 8  ;;  %p4352_p0 = scmp.lt.s32.totalorder %s4346_s21, %s6168_s16 }
 0x12d   : > { %v716_v1 = vsel %vm663_vm2, %v713_v44, %v715_v57  ;;  %v718_v18 = vsel %vm663_vm2, %v715_v57, %v717_v10  ;;  %p4348_p11 = scmp.ne.s32.totalorder %s4346_s21, %s4347_s18 }
 0x12f   : > { %v1228_v3 = vpop.f32.mrf.mxu1  ;;  %p4349_p12 = pnand %p4348_p11, %p4522_p5 }
 0x130   : > { %v1229_v6 = vadd.f32 %v1228_v3, %v4872_v12  ;;  %v889_v28 = vpop.permute.xlu2 %888  ;;  %v627_v3 = vsel %vm578_vm3, %v624_v45, %v626_v60 }
 0x131   : > { %3898 = vmatmul.msk.f32.gmra.mxu2 %vm953_vm1, %v1435_v62  ;;  %v938_v42 = vmul.f32 %v889_v28, %v623_v38  ;;  %v899_v59 = vpop.permute.xlu1 %898  ;;  %v909_v32 = vpop.permute.xlu0 %908  ;;  %p4350_p13 = pneg %p4349_p12 }
 0x132   : > { %v4938_v9 = vadd.f32 %v1561_v61, %v1229_v6  ;;  %3864 = vmatmul.msk.f32.gmra.mxu1 %vm953_vm1, %v935_v63  ;;  %v1064_v63 = vpop.f32.mrf.mxu0  ;;  %v940_v8 = vmul.f32 %v899_v59, %v627_v3 }
 0x133   : > { %3843 = vmatmul.msk.f32.gmra.mxu0 %vm953_vm1, %v549_v0 }
 0x134   : > { %v4945_v12 = vpop.f32.mrf.mxu2 }
 0x137   : > { %v4948_v17 = vpop.f32.mrf.mxu1 }
 0x138   : > { %v894_v47 = vpop.permute.xlu2 %893 }
 0x139   : > { %3899 = vmatmul.msk.f32.gmra.mxu2 %vm953_vm1, %v1436_v14  ;;  %v939_v55 = vmul.f32 %v894_v47, %v625_v52 }
 0x13a   : > { %3865 = vmatmul.msk.f32.gmra.mxu1 %vm953_vm1, %v936_v15  ;;  %v1067_v14 = vpop.f32.mrf.mxu0  ;;  %v904_v15 = vpop.permute.xlu1 %903 }
 0x13b   : > { %v941_v23 = vmul.f32 %v904_v15, %v629_v19 }
 0x13c   : > { %v4962_v25 = vpop.f32.mrf.mxu2 }
 0x13f   : > { %v4966_v33 = vpop.f32.mrf.mxu1 }
 0x140   : > { %v1405_v62 = vpop.permute.xlu2 %1404  ;;  %v1235_v57 = vadd.f32 %v4966_v33, %v4900_v41 }
 0x141   : > { %3900 = vmatmul.msk.f32.gmra.mxu2 %vm953_vm1, %v1437_v26  ;;  %v1440_v6 = vmul.f32 %v1405_v62, %v716_v1  ;;  %v630_v26 = vrot.slane %v548_v49, 7 }
 0x142   : > { %3866 = vmatmul.msk.f32.gmra.mxu1 %vm953_vm1, %v937_v30  ;;  %v1070_v28 = vpop.f32.mrf.mxu0  ;;  %v1413_v30 = vpop.permute.xlu1 %1412 }
 0x143   : > { %v631_v35 = vsel %vm578_vm3, %v628_v11, %v630_v26  ;;  %v1442_v37 = vmul.f32 %v1413_v30, %v747_v31 }
 0x144   : > { %v4976_v39 = vpop.f32.mrf.mxu2  ;;  %v942_v38 = vmul.f32 %v909_v32, %v631_v35 }
 0x147   : > { %v4979_v46 = vpop.f32.mrf.mxu1 }
 0x148   : > { %v1409_v16 = vpop.permute.xlu2 %1408 }
 0x149   : > { %3901 = vmatmul.msk.f32.gmra.mxu2 %vm953_vm1, %v1438_v40  ;;  %v1441_v22 = vmul.f32 %v1409_v16, %v718_v18 }
 0x14a   : > { %3867 = vmatmul.msk.f32.gmra.mxu1 %vm953_vm1, %v938_v42  ;;  %v632_v42 = vrot.slane %v549_v0, 7  ;;  %v1073_v49 = vpop.f32.mrf.mxu0  ;;  %v1641_v0 = vadd.f32 %v4962_v25, %v1235_v57 }
 0x14c   : > { %v4987_v53 = vpop.f32.mrf.mxu2  ;;  %v633_v47 = vsel %vm578_vm3, %v630_v26, %v632_v42  ;;  %v1238_v26 = vadd.f32 %v4979_v46, %v4916_v56 }
 0x14f   : > { %v4990_v61 = vpop.f32.mrf.mxu1 }
 0x150   : > { %v914_v45 = vpop.permute.xlu2 %913 }
 0x151   : > { %3902 = vmatmul.msk.f32.gmra.mxu2 %vm953_vm1, %v1439_v54  ;;  %v943_v52 = vmul.f32 %v914_v45, %v633_v47 }
 0x152   : > { %3868 = vmatmul.msk.f32.gmra.mxu1 %vm953_vm1, %v939_v55  ;;  %v5020_v55 = vld [vmem:[%s6154_s2] ss:$0 sm:$0xff] }
 0x154   : > { %v4998_v5 = vpop.f32.mrf.mxu2 }
 0x157   : > { %v5000_v13 = vpop.f32.mrf.mxu1 }
 0x158   : > { %v1244_v57 = vadd.f32 %v5000_v13, %v4951_v20 }
 0x159   : > { %3903 = vmatmul.msk.f32.gmra.mxu2 %vm953_vm1, %v1440_v6  ;;  %v1076_v6 = vpop.f32.mrf.mxu0 }
 0x15a   : > { %3869 = vmatmul.msk.f32.gmra.mxu1 %vm953_vm1, %v940_v8 }
 0x15c   : > { %v5006_v21 = vpop.f32.mrf.mxu2 }
 0x15f   : > { %v5008_v24 = vpop.f32.mrf.mxu1 }
 0x161   : > { %3904 = vmatmul.msk.f32.gmra.mxu2 %vm953_vm1, %v1441_v22  ;;  %v5050_v19 = vpop.f32.mrf.mxu0  ;;  %v1241_v22 = vadd.f32 %v4990_v61, %v4932_v7  ;;  %v1642_v61 = vadd.f32 %v4976_v39, %v1238_v26 }
 0x162   : > { %3870 = vmatmul.msk.f32.gmra.mxu1 %vm953_vm1, %v941_v23 }
 0x163   : > { %v1643_v32 = vadd.f32 %v4987_v53, %v1241_v22  ;;  %v5137_v22 = vadd.f32 %v5020_v55, %v4938_v9 }
 0x164   : > { %v1582_v36 = vpop.f32.mrf.mxu2 }
 0x165   : > { %v5072_v56 = vadd.f32 %v5020_v55, %v1643_v32 }
 0x167   : > { %v1249_v40 = vpop.f32.mrf.mxu1  ;;  %v1703_v42 = vmax.f32 %v5072_v56, 0.0 }
 0x168   : > { %v1250_v44 = vadd.f32 %v1249_v40, %v1061_v48  ;;  %v1232_v48 = vadd.f32 %v4948_v17, %v4885_v27  ;;  %v5038_v17 = vadd.f32 %v5020_v55, %v1641_v0  ;;  %v1644_v0 = vadd.f32 %v4998_v5, %v1244_v57 }
 0x169   : > { %3905 = vmatmul.msk.f32.gmra.mxu2 %vm953_vm1, %v1442_v37  ;;  %v5078_v53 = vpop.f32.mrf.mxu0 }
 0x16a   : > { %3871 = vmatmul.msk.f32.gmra.mxu1 %vm953_vm1, %v942_v38  ;;  %v1646_v51 = vadd.f32 %v1582_v36, %v1250_v44  ;;  %v1640_v8 = vadd.f32 %v4945_v12, %v1232_v48  ;;  %v6180_v11 = vmax.f32 %v5038_v17, 0.0  ;;  %v5081_v38 = vadd.f32 %v5020_v55, %v1642_v61 }
 0x16c   : > { %v1585_v50 = vpop.f32.mrf.mxu2  ;;  %v5027_v60 = vadd.f32 %v5020_v55, %v1646_v51  ;;  %v1702_v45 = vmax.f32 %v5081_v38, 0.0  ;;  %v1247_v51 = vadd.f32 %v5008_v24, %v4968_v34  ;;  %v6195_v38 = vmax.f32 %v5137_v22, 0.0 }
 0x16e   : > { %v1706_v41 = vmax.f32 %v5027_v60, 0.0  ;;  %v1645_v24 = vadd.f32 %v5006_v21, %v1247_v51 }
 0x16f   : > { %v1252_v54 = vpop.f32.mrf.mxu1 }
 0x170   : > { %v1253_v59 = vadd.f32 %v1252_v54, %v1064_v63  ;;  %v5045_v63 = vadd.f32 %v5020_v55, %v1640_v8  ;;  %v5098_v54 = vadd.f32 %v5020_v55, %v4891_v29  ;;  %v5118_v8 = vadd.f32 %v5020_v55, %v1645_v24 }
 0x171   : > { %v5106_v34 = vpop.f32.mrf.mxu0 }
 0x172   : > { %v1647_v62 = vadd.f32 %v1585_v50, %v1253_v59  ;;  %3872 = vmatmul.msk.f32.gmra.mxu1 %vm953_vm1, %v943_v52  ;;  %v6179_v16 = vmax.f32 %v5045_v63, 0.0  ;;  %v5088_v50 = vadd.f32 %v5020_v55, %v4906_v43  ;;  %v6194_v56 = vmax.f32 %v5045_v63, 0.0 }
 0x173   : > { %v6198_v63 = vmax.f32 %v5098_v54, 0.0 }
 0x174   : > { %v5032_v1 = vadd.f32 %v5020_v55, %v1647_v62  ;;  %v1588_v3 = vpop.f32.mrf.mxu2  ;;  %v6176_v29 = vmax.f32 %v5088_v50, 0.0 }
 0x176   : > { %v1707_v33 = vmax.f32 %v5032_v1, 0.0 }
 0x177   : > { %v1255_v27 = vpop.f32.mrf.mxu1 }
 0x178   : > { %v4193_v25 = vpack.i.bf16 %v1706_v41, %v1707_v33  ;;  %v1256_v10 = vadd.f32 %v1255_v27, %v1067_v14  ;;  %v4208_v14 = vpack.i.bf16 %v6179_v16, %v6180_v11  ;;  %v5129_v27 = vadd.f32 %v5020_v55, %v1644_v0 }
 0x17a   : > { %4194 = vrot.lane.b32.xlu0 %v4193_v25, %s4397_s17  ;;  %v1648_v15 = vadd.f32 %v1588_v3, %v1256_v10  ;;  %v6175_v3 = vmax.f32 %v5098_v54, 0.0  ;;  %v1705_v10 = vmax.f32 %v5118_v8, 0.0  ;;  %v1870_v54 = vld [vmem:[%s6156_s4 + $0x30] sm:$0xff] }
 0x17c   : > { %v1591_v12 = vpop.f32.mrf.mxu2  ;;  %v5061_v30 = vadd.f32 %v5020_v55, %v1648_v15  ;;  %v4218_v5 = vpack.i.bf16 %v6175_v3, %v6176_v29  ;;  %v1704_v15 = vmax.f32 %v5129_v27, 0.0 }
 0x17f   : > { %v1258_v18 = vpop.f32.mrf.mxu1 }
 0x180   : > { %v1259_v23 = vadd.f32 %v1258_v18, %v1070_v28  ;;  %v1708_v28 = vmax.f32 %v5061_v30, 0.0 }
 0x182   : > { %v1649_v31 = vadd.f32 %v1591_v12, %v1259_v23  ;;  %4209 = vrot.lane.b32.xlu0 %v4208_v14, %s4397_s17  ;;  %v1088_v12 = vpop.f32.mrf.mxu0  ;;  %v4198_v23 = vpack.i.bf16 %v1704_v15, %v1705_v10  ;;  %v5145_v14 = vadd.f32 %v5020_v55, %v4922_v58 }
 0x184   : > { %v5066_v35 = vadd.f32 %v5020_v55, %v1649_v31  ;;  %v1594_v7 = vpop.f32.mrf.mxu2  ;;  %v6178_v31 = vmax.f32 %v5137_v22, 0.0  ;;  %v6177_v32 = vmax.f32 %v5145_v14, 0.0  ;;  %v1864_v22 = vld [vmem:[%s6156_s4] sm:$0xff] }
 0x186   : > { %v1709_v36 = vmax.f32 %v5066_v35, 0.0  ;;  %v4213_v9 = vpack.i.bf16 %v6177_v32, %v6178_v31 }
 0x187   : > { %v1261_v37 = vpop.f32.mrf.mxu1 }
 0x188   : > { %v4188_v46 = vpack.i.bf16 %v1708_v28, %v1709_v36  ;;  %v1262_v40 = vadd.f32 %v1261_v37, %v1073_v49  ;;  %v4203_v49 = vpack.i.bf16 %v1702_v45, %v1703_v42 }
 0x18a   : > { %4189 = vrot.lane.b32.xlu2 %v4188_v46, %s4397_s17  ;;  %v1650_v44 = vadd.f32 %v1594_v7, %v1262_v40  ;;  %v5150_v61 = vpop.f32.mrf.mxu0 }
 0x18c   : > { %v1597_v39 = vpop.f32.mrf.mxu2  ;;  %v5103_v59 = vadd.f32 %v5020_v55, %v1650_v44 }
 0x18e   : > { %v1710_v20 = vmax.f32 %v5103_v59, 0.0 }
 0x18f   : > { %v1264_v47 = vpop.f32.mrf.mxu1 }
 0x190   : > { %v1265_v52 = vadd.f32 %v1264_v47, %v1076_v6 }
 0x192   : > { %v1651_v43 = vadd.f32 %v1597_v39, %v1265_v52  ;;  %4204 = vrot.lane.b32.xlu2 %v4203_v49, %s4397_s17  ;;  %v5157_v46 = vpop.f32.mrf.mxu0 }
 0x194   : > { %v5110_v48 = vadd.f32 %v5020_v55, %v1651_v43  ;;  %v1600_v62 = vpop.f32.mrf.mxu2 }
 0x196   : > { %v1711_v13 = vmax.f32 %v5110_v48, 0.0 }
 0x197   : > { %v1267_v6 = vpop.f32.mrf.mxu1 }
 0x198   : > { %v4183_v21 = vpack.i.bf16 %v1710_v20, %v1711_v13  ;;  %v1268_v29 = vadd.f32 %v1267_v6, %v5050_v19 }
 0x19a   : > { %4184 = vrot.lane.b32.xlu1 %v4183_v21, %s4397_s17  ;;  %4219 = vrot.lane.b32.xlu2 %v4218_v5, %s4397_s17  ;;  %v1097_v44 = vpop.f32.mrf.mxu0 }
 0x19c   : > { %v1603_v25 = vpop.f32.mrf.mxu2 }
 0x19f   : > { %v1270_v18 = vpop.f32.mrf.mxu1 }
 0x1a2   : > { %4199 = vrot.lane.b32.xlu1 %v4198_v23, %s4397_s17  ;;  %v1100_v49 = vpop.f32.mrf.mxu0  ;;  %v1271_v23 = vadd.f32 %v1270_v18, %v5078_v53 }
 0x1a4   : > { %v1606_v26 = vpop.f32.mrf.mxu2  ;;  %v1653_v31 = vadd.f32 %v1603_v25, %v1271_v23 }
 0x1a6   : > { %v5174_v53 = vadd.f32 %v5020_v55, %v1653_v31 }
 0x1a7   : > { %v1273_v7 = vpop.f32.mrf.mxu1 }
 0x1a8   : > { %v1274_v31 = vadd.f32 %v1273_v7, %v5106_v34 }
 0x1aa   : > { %4214 = vrot.lane.b32.xlu1 %v4213_v9, %s4397_s17  ;;  %v1103_v5 = vpop.f32.mrf.mxu0 }
 0x1ac   : > { %v1609_v37 = vpop.f32.mrf.mxu2 }
 0x1af   : > { %v1276_v58 = vpop.f32.mrf.mxu1 }
 0x1b4   : > { %v5159_v40 = vpop.f32.mrf.mxu2 }
 0x1b7   : > { %v1279_v39 = vpop.f32.mrf.mxu1 }
 0x1bc   : > { %v5161_v47 = vpop.f32.mrf.mxu2 }
 0x1bf   : > { %v1282_v51 = vpop.f32.mrf.mxu1 }
 0x1c4   : > { %v1618_v52 = vpop.f32.mrf.mxu2 }
 0x1c7   : > { %v1285_v57 = vpop.f32.mrf.mxu1 }
 0x1c8   : > { %v1286_v43 = vadd.f32 %v1285_v57, %v1097_v44 }
 0x1ca   : > { %v1658_v24 = vadd.f32 %v1618_v52, %v1286_v43  ;;  %v1652_v52 = vadd.f32 %v1600_v62, %v1268_v29  ;;  %v1713_v29 = vmax.f32 %v5174_v53, 0.0  ;;  %v3922_v53 = vld [vmem:[%s6156_s4 + $0xf0] sm:$0xff] }
 0x1cc   : > { %v1621_v0 = vpop.f32.mrf.mxu2  ;;  %v5165_v9 = vadd.f32 %v5020_v55, %v1658_v24  ;;  %v5181_v6 = vadd.f32 %v5020_v55, %v1652_v52  ;;  %v1277_v24 = vadd.f32 %v1276_v58, %v1088_v12  ;;  %v1654_v52 = vadd.f32 %v1606_v26, %v1274_v31 }
 0x1ce   : > { %v1718_v44 = vmax.f32 %v5165_v9, 0.0 }
 0x1cf   : > { %v1288_v21 = vpop.f32.mrf.mxu1 }
 0x1d0   : > { %v1289_v3 = vadd.f32 %v1288_v21, %v1100_v49 }
 0x1d2   : > { %v1659_v32 = vadd.f32 %v1621_v0, %v1289_v3  ;;  %v1106_v3 = vpop.f32.mrf.mxu0 }
 0x1d4   : > { %v5169_v16 = vadd.f32 %v5020_v55, %v1659_v32  ;;  %v1624_v11 = vpop.f32.mrf.mxu2  ;;  %v1712_v32 = vmax.f32 %v5181_v6, 0.0  ;;  %v1888_v6 = vld [vmem:[%s6156_s4 + $0xc0] sm:$0xff] }
 0x1d6   : > { %v1719_v57 = vmax.f32 %v5169_v16, 0.0 }
 0x1d7   : > { %v1291_v43 = vpop.f32.mrf.mxu1 }
 0x1d8   : > { %v1292_v18 = vadd.f32 %v1291_v43, %v1103_v5  ;;  %v4233_v19 = vpack.i.bf16 %v1718_v44, %v1719_v57  ;;  %v4248_v5 = vpack.i.bf16 %v1712_v32, %v1713_v29  ;;  %v1655_v43 = vadd.f32 %v1609_v37, %v1277_v24  ;;  %v2354_v37 = vld [vmem:[%s6159_s7] sm:$0xff] }
 0x1da   : > { %4234 = vrot.lane.b32.xlu2 %v4233_v19, %s4397_s17  ;;  %v1660_v25 = vadd.f32 %v1624_v11, %v1292_v18  ;;  %v1109_v11 = vpop.f32.mrf.mxu0  ;;  %v5201_v19 = vadd.f32 %v5020_v55, %v1654_v52 }
 0x1dc   : > { %v1627_v62 = vpop.f32.mrf.mxu2  ;;  %v5188_v0 = vadd.f32 %v5020_v55, %v1660_v25  ;;  %v1714_v31 = vmax.f32 %v5201_v19, 0.0  ;;  %v3921_v19 = vld [vmem:[%s6156_s4 + $0xe8] sm:$0xff] }
 0x1de   : > { %v1720_v34 = vmax.f32 %v5188_v0, 0.0 }
 0x1df   : > { %v1294_v49 = vpop.f32.mrf.mxu1 }
 0x1e0   : > { %v1295_v21 = vadd.f32 %v1294_v49, %v1106_v3  ;;  %v5204_v3 = vadd.f32 %v5020_v55, %v1655_v43 }
 0x1e2   : > { %v1661_v23 = vadd.f32 %v1627_v62, %v1295_v21  ;;  %4249 = vrot.lane.b32.xlu2 %v4248_v5, %s4397_s17  ;;  %v1715_v49 = vmax.f32 %v5204_v3, 0.0  ;;  %v1112_v24 = vpop.f32.mrf.mxu0  ;;  %v1280_v21 = vadd.f32 %v1279_v39, %v5150_v61 }
 0x1e4   : > { %v5196_v18 = vadd.f32 %v5020_v55, %v1661_v23  ;;  %v1630_v12 = vpop.f32.mrf.mxu2  ;;  %v1656_v61 = vadd.f32 %v5159_v40, %v1280_v21 }
 0x1e6   : > { %v1721_v7 = vmax.f32 %v5196_v18, 0.0 }
 0x1e7   : > { %v1297_v58 = vpop.f32.mrf.mxu1 }
 0x1e8   : > { %v1298_v25 = vadd.f32 %v1297_v58, %v1109_v11  ;;  %v4228_v26 = vpack.i.bf16 %v1720_v34, %v1721_v7  ;;  %v1283_v11 = vadd.f32 %v1282_v51, %v5157_v46 }
 0x1ea   : > { %4229 = vrot.lane.b32.xlu1 %v4228_v26, %s4397_s17  ;;  %2657 = vperm.xlu2 %4254, %v2354_v37   ;;  %v1662_v62 = vadd.f32 %v1630_v12, %v1298_v25  ;;  %v4243_v12 = vpack.i.bf16 %v1714_v31, %v1715_v49  ;;  %v1657_v39 = vadd.f32 %v5161_v47, %v1283_v11 }
 0x1eb   : > { %v5235_v26 = vadd.f32 %v5020_v55, %v1656_v61 }
 0x1ec   : > { %v1633_v23 = vpop.f32.mrf.mxu2  ;;  %v5219_v52 = vadd.f32 %v5020_v55, %v1662_v62  ;;  %v5238_v62 = vadd.f32 %v5020_v55, %v1657_v39  ;;  %v4195_v61 = vpop.permute.xlu0 %4194 }
 0x1ed   : > { %v1716_v47 = vmax.f32 %v5235_v26, 0.0 }
 0x1ee   : > { %v1722_v51 = vmax.f32 %v5219_v52, 0.0 }
 0x1ef   : > { %v1300_v5 = vpop.f32.mrf.mxu1 }
 0x1f0   : > { %v1301_v43 = vadd.f32 %v1300_v5, %v1112_v24  ;;  %v1717_v24 = vmax.f32 %v5238_v62, 0.0 }
 0x1f2   : > { %v1663_v58 = vadd.f32 %v1633_v23, %v1301_v43  ;;  %4244 = vrot.lane.b32.xlu1 %v4243_v12, %s4397_s17  ;;  %4256 = vset.pattern.permute.xlu2 %v4396_v4  ;;  %v4238_v21 = vpack.i.bf16 %v1716_v47, %v1717_v24 }
 0x1f4   : > { %v5230_v46 = vadd.f32 %v5020_v55, %v1663_v58  ;;  %v4190_v55 = vpop.permute.xlu2 %4189  ;;  %v2356_v58 = vld [vmem:[%s6159_s7 + $0x10] sm:$0xff] }
 0x1f5   : > { %v4191_v43 = vunpack.i.l.bf16 %v4190_v55  ;;  %v4192_v39 = vunpack.i.h.bf16 %v4190_v55 }
 0x1f6   : > { %v1723_v25 = vmax.f32 %v5230_v46, 0.0 }
 0x1f8   : > { %v4223_v40 = vpack.i.bf16 %v1722_v51, %v1723_v25 }
 0x1fa   : > { %4224 = vrot.lane.b32.xlu0 %v4223_v40, %s4397_s17 }
 0x202   : > { %4239 = vrot.lane.b32.xlu0 %v4238_v21, %s4397_s17  ;;  %v1849_v21 = vmax.f32 %v1709_v36, %v4191_v43 }
 0x20a   : > { %2370 = vperm.xlu0 %4180, %v2354_v37   ;;  %v4196_v37 = vunpack.i.l.bf16 %v4195_v61 }
 0x20c   : > { %v4185_v5 = vpop.permute.xlu1 %4184  ;;  %v1847_v59 = vmax.f32 %v1707_v33, %v4196_v37  ;;  %v6197_v37 = vmax.f32 %v5088_v50, 0.0  ;;  %v1868_v50 = vld [vmem:[%s6156_s4 + $0x20] sm:$0xff] }
 0x20d   : > { %v4187_v23 = vunpack.i.h.bf16 %v4185_v5  ;;  %v4186_v11 = vunpack.i.l.bf16 %v4185_v5  ;;  %v1848_v5 = vmax.f32 %v1708_v28, %v4192_v39  ;;  %v4210_v28 = vpop.permute.xlu0 %4209 }
 0x20e   : > { %v4211_v33 = vunpack.i.l.bf16 %v4210_v28  ;;  %v4212_v43 = vunpack.i.h.bf16 %v4210_v28 }
 0x20f   : > { %v1851_v12 = vmax.f32 %v1711_v13, %v4186_v11  ;;  %v1850_v40 = vmax.f32 %v1710_v20, %v4187_v23  ;;  %v4197_v13 = vunpack.i.h.bf16 %v4195_v61  ;;  %v4205_v20 = vpop.permute.xlu2 %4204 }
 0x210   : > { %v4206_v36 = vunpack.i.l.bf16 %v4205_v20  ;;  %v4207_v11 = vunpack.i.h.bf16 %v4205_v20 }
 0x211   : > { %1935 = vmatpush.msra.mxu3 %v1851_v12  ;;  %2124 = vmatpush.msrb.mxu0 %v1851_v12  ;;  %v1846_v35 = vmax.f32 %v1706_v41, %v4197_v13  ;;  %v6193_v12 = vmax.f32 %v5038_v17, 0.0  ;;  %v6196_v17 = vmax.f32 %v5145_v14, 0.0  ;;  %v1866_v14 = vld [vmem:[%s6156_s4 + $0x10] sm:$0xff]  ;;  %v1872_v13 = vld [vmem:[%s6156_s4 + $0x40] sm:$0xff] }
 0x212   : > { %2380 = vperm.xlu0 %4180, %v2356_v58   ;;  %v1843_v60 = vmax.f32 %v1703_v42, %v4206_v36  ;;  %v1842_v8 = vmax.f32 %v1702_v45, %v4207_v11  ;;  %v1840_v42 = vmax.f32 %v6194_v56, %v4212_v43  ;;  %v2355_v56 = vld [vmem:[%s6159_s7 + $0x8] sm:$0xff] }
 0x213   : > { %1936 = vmatpush.msra.mxu3 %v1850_v40  ;;  %2125 = vmatpush.msrb.mxu0 %v1850_v40  ;;  %v1841_v27 = vmax.f32 %v6193_v12, %v4211_v33 }
 0x214   : > { %v4200_v48 = vpop.permute.xlu1 %4199  ;;  %2375 = vperm.xlu1 %4253, %v2355_v56  }
 0x215   : > { %1937 = vmatpush.msra.mxu3 %v1849_v21  ;;  %2126 = vmatpush.msrb.mxu0 %v1849_v21  ;;  %v4201_v55 = vunpack.i.l.bf16 %v4200_v48  ;;  %v4202_v23 = vunpack.i.h.bf16 %v4200_v48 }
 0x217   : > { %1938 = vmatpush.msra.mxu3 %v1848_v5  ;;  %2127 = vmatpush.msrb.mxu0 %v1848_v5  ;;  %v1845_v30 = vmax.f32 %v1705_v10, %v4201_v55  ;;  %v1844_v1 = vmax.f32 %v1704_v15, %v4202_v23  ;;  %v4220_v15 = vpop.permute.xlu2 %4219  ;;  %v1874_v5 = vld [vmem:[%s6156_s4 + $0x50] sm:$0xff]  ;;  %v1876_v55 = vld [vmem:[%s6156_s4 + $0x60] sm:$0xff] }
 0x218   : > { %v4221_v61 = vunpack.i.l.bf16 %v4220_v15  ;;  %v4222_v39 = vunpack.i.h.bf16 %v4220_v15 }
 0x219   : > { %1939 = vmatpush.msra.mxu3 %v1847_v59  ;;  %2128 = vmatpush.msrb.mxu0 %v1847_v59  ;;  %v1878_v59 = vld [vmem:[%s6156_s4 + $0x70] sm:$0xff] }
 0x21a   : > { %4257 = vset.pattern.permute.xlu0 %v4395_v2  ;;  %v1837_v21 = vmax.f32 %v6197_v37, %v4221_v61  ;;  %v1836_v48 = vmax.f32 %v6198_v63, %v4222_v39  ;;  %v1865_v61 = vld [vmem:[%s6156_s4 + $0x8] sm:$0xff]  ;;  %v1867_v39 = vld [vmem:[%s6156_s4 + $0x18] sm:$0xff]  ;;  %v2358_v37 = vld [vmem:[%s6159_s7 + $0x20] sm:$0xff] }
 0x21b   : > { %1940 = vmatpush.msra.mxu3 %v1846_v35  ;;  %2129 = vmatpush.msrb.mxu0 %v1846_v35  ;;  %v3931_v63 = vld [vmem:[%s6156_s4 + $0x138] sm:$0xff] }
 0x21c   : > { %2665 = vperm.xlu0 %4257, %v2356_v58   ;;  %v4215_v41 = vpop.permute.xlu1 %4214  ;;  %4255 = vset.pattern.permute.xlu1 %v4395_v2 }
 0x21d   : > { %1941 = vmatpush.msra.mxu3 %v1845_v30  ;;  %2130 = vmatpush.msrb.mxu0 %v1845_v30  ;;  %v4216_v10 = vunpack.i.l.bf16 %v4215_v41  ;;  %v4217_v58 = vunpack.i.h.bf16 %v4215_v41  ;;  %v1880_v30 = vld [vmem:[%s6156_s4 + $0x80] sm:$0xff] }
 0x21e   : > { %2661 = vperm.xlu1 %4255, %v2355_v56   ;;  %v1889_v56 = vld [vmem:[%s6156_s4 + $0xc8] sm:$0xff] }
 0x21f   : > { %1942 = vmatpush.msra.mxu3 %v1844_v1  ;;  %2131 = vmatpush.msrb.mxu0 %v1844_v1  ;;  %v1839_v45 = vmax.f32 %v6195_v38, %v4216_v10  ;;  %v1838_v40 = vmax.f32 %v6196_v17, %v4217_v58  ;;  %v3927_v38 = vld [vmem:[%s6156_s4 + $0x118] sm:$0xff]  ;;  %v3929_v17 = vld [vmem:[%s6156_s4 + $0x128] sm:$0xff] }
 0x221   : > { %1943 = vmatpush.msra.mxu3 %v1843_v60  ;;  %2132 = vmatpush.msrb.mxu0 %v1843_v60 }
 0x223   : > { %1944 = vmatpush.msra.mxu3 %v1842_v8  ;;  %2133 = vmatpush.msrb.mxu0 %v1842_v8 }
 0x224   : > { %4260 = vset.pattern.permute.xlu0 %v4396_v4 }
 0x225   : > { %1945 = vmatpush.msra.mxu3 %v1841_v27  ;;  %2134 = vmatpush.msrb.mxu0 %v1841_v27 }
 0x226   : > { %4258 = vset.pattern.permute.xlu1 %v4396_v4 }
 0x227   : > { %1946 = vmatpush.msra.mxu3 %v1840_v42  ;;  %2135 = vmatpush.msrb.mxu0 %v1840_v42  ;;  %v3926_v42 = vld [vmem:[%s6156_s4 + $0x110] sm:$0xff] }
 0x228   : > { %2390 = vperm.xlu1 %4258, %v2358_v37  }
 0x229   : > { %1947 = vmatpush.msra.mxu3 %v1839_v45  ;;  %2136 = vmatpush.msrb.mxu0 %v1839_v45  ;;  %v3928_v45 = vld [vmem:[%s6156_s4 + $0x120] sm:$0xff] }
 0x22b   : > { %1948 = vmatpush.msra.mxu3 %v1838_v40  ;;  %2137 = vmatpush.msrb.mxu0 %v1838_v40  ;;  %v3930_v40 = vld [vmem:[%s6156_s4 + $0x130] sm:$0xff] }
 0x22d   : > { %1949 = vmatpush.msra.mxu3 %v1837_v21  ;;  %2138 = vmatpush.msrb.mxu0 %v1837_v21  ;;  %v1869_v21 = vld [vmem:[%s6156_s4 + $0x28] sm:$0xff] }
 0x22f   : > { %1950 = vmatpush.msra.mxu3 %v1836_v48  ;;  %2139 = vmatpush.msrb.mxu0 %v1836_v48 }
 0x230   : > { %1951 = vmatmul.f32.vlgmr.msra.gmra.mxu3 %v1864_v22  ;;  %v3932_v22 = vld [vmem:[%s6156_s4 + $0x140] sm:$0xff] }
 0x234   : > { %v4235_v1 = vpop.permute.xlu2 %4234 }
 0x235   : > { %v4236_v41 = vunpack.i.l.bf16 %v4235_v1  ;;  %v4237_v10 = vunpack.i.h.bf16 %v4235_v1  ;;  %v3938_v1 = vld [vmem:[%s6156_s4 + $0x170] sm:$0xff] }
 0x237   : > { %v1859_v52 = vmax.f32 %v1719_v57, %v4236_v41  ;;  %v1884_v57 = vld [vmem:[%s6156_s4 + $0xa0] sm:$0xff]  ;;  %v2363_v41 = vld [vmem:[%s6159_s7 + $0x48] sm:$0xff] }
 0x238   : > { %1954 = vmatmul.f32.gmra.mxu3 %v1866_v14  ;;  %v2359_v14 = vld [vmem:[%s6159_s7 + $0x28] sm:$0xff] }
 0x239   : > { %2395 = vperm.xlu1 %4258, %v2359_v14  }
 0x23c   : > { %v4250_v27 = vpop.permute.xlu2 %4249 }
 0x23d   : > { %v4251_v58 = vunpack.i.l.bf16 %v4250_v27  ;;  %v4252_v62 = vunpack.i.h.bf16 %v4250_v27  ;;  %v3944_v27 = vld [vmem:[%s6156_s4 + $0x1a0] sm:$0xff] }
 0x23f   : > { %v1852_v3 = vmax.f32 %v1712_v32, %v4252_v62  ;;  %v3924_v32 = vld [vmem:[%s6156_s4 + $0x100] sm:$0xff]  ;;  %v1885_v62 = vld [vmem:[%s6156_s4 + $0xa8] sm:$0xff] }
 0x240   : > { %1957 = vmatmul.f32.gmra.mxu3 %v1868_v50  ;;  %v1871_v50 = vld [vmem:[%s6156_s4 + $0x38] sm:$0xff] }
 0x241   : > { %4261 = vset.pattern.permute.xlu1 %v4395_v2 }
 0x242   : > { %2677 = vperm.xlu1 %4261, %v2359_v14   ;;  %v2453_v14 = vld [vmem:[%s6157_s5 + $0x8] sm:$0xff] }
 0x248   : > { %1960 = vmatmul.f32.gmra.mxu3 %v1870_v54  ;;  %v3933_v54 = vld [vmem:[%s6156_s4 + $0x148] sm:$0xff] }
 0x250   : > { %1963 = vmatmul.f32.gmra.mxu3 %v1872_v13 }
 0x258   : > { %1966 = vmatmul.f32.gmra.mxu3 %v1874_v5  ;;  %v3934_v5 = vld [vmem:[%s6156_s4 + $0x150] sm:$0xff] }
 0x25c   : > { %v4230_v20 = vpop.permute.xlu1 %4229 }
 0x25d   : > { %v4231_v28 = vunpack.i.l.bf16 %v4230_v20  ;;  %v4232_v33 = vunpack.i.h.bf16 %v4230_v20  ;;  %v2357_v20 = vld [vmem:[%s6159_s7 + $0x18] sm:$0xff] }
 0x25e   : > { %2385 = vperm.xlu2 %4256, %v2357_v20  }
 0x25f   : > { %v1861_v43 = vmax.f32 %v1721_v7, %v4231_v28  ;;  %v1860_v46 = vmax.f32 %v1720_v34, %v4232_v33  ;;  %v1858_v7 = vmax.f32 %v1718_v44, %v4237_v10  ;;  %v3920_v44 = vld [vmem:[%s6156_s4 + $0xe0] sm:$0xff]  ;;  %v3937_v28 = vld [vmem:[%s6156_s4 + $0x168] sm:$0xff] }
 0x260   : > { %1969 = vmatmul.f32.gmra.mxu3 %v1876_v55  ;;  %2140 = vmatmul.f32.vlgmr.msrb.gmra.mxu0 %v3920_v44  ;;  %v1873_v55 = vld [vmem:[%s6156_s4 + $0x48] sm:$0xff]  ;;  %v3946_v44 = vld [vmem:[%s6156_s4 + $0x1b0] sm:$0xff] }
 0x261   : > { %v1877_v33 = vld [vmem:[%s6156_s4 + $0x68] sm:$0xff] }
 0x262   : > { %v3968_v10 = vld [vmem:[%s6157_s5 + $0x68] sm:$0xff] }
 0x263   : > { %2505 = vmatpush.msrb.mxu2 %v3968_v10 }
 0x266   : > { %4259 = vset.pattern.permute.xlu2 %v4395_v2 }
 0x267   : > { %2669 = vperm.xlu2 %4259, %v2357_v20  }
 0x268   : > { %1972 = vmatmul.f32.gmra.mxu3 %v1878_v59  ;;  %2143 = vmatmul.f32.gmra.mxu0 %v3922_v53  ;;  %v3935_v59 = vld [vmem:[%s6156_s4 + $0x158] sm:$0xff] }
 0x26c   : > { %v4225_v23 = vpop.permute.xlu0 %4224 }
 0x26d   : > { %v4227_v35 = vunpack.i.h.bf16 %v4225_v23  ;;  %v4226_v36 = vunpack.i.l.bf16 %v4225_v23 }
 0x26f   : > { %v1863_v11 = vmax.f32 %v1723_v25, %v4226_v36  ;;  %v1862_v60 = vmax.f32 %v1722_v51, %v4227_v35  ;;  %v1882_v25 = vld [vmem:[%s6156_s4 + $0x90] sm:$0xff]  ;;  %v4245_v51 = vpop.permute.xlu1 %4244  ;;  %v3936_v35 = vld [vmem:[%s6156_s4 + $0x160] sm:$0xff]  ;;  %2673 = vperm.xlu2 %4259, %v2358_v37   ;;  %v2455_v37 = vld [vmem:[%s6157_s5 + $0x18] sm:$0xff] }
 0x270   : > { %1975 = vmatmul.f32.gmra.mxu3 %v1880_v30  ;;  %v4246_v0 = vunpack.i.l.bf16 %v4245_v51  ;;  %v4247_v15 = vunpack.i.h.bf16 %v4245_v51  ;;  %2146 = vmatmul.f32.gmra.mxu0 %v3924_v32  ;;  %v2360_v36 = vld [vmem:[%s6159_s7 + $0x30] sm:$0xff]  ;;  %v1875_v30 = vld [vmem:[%s6156_s4 + $0x58] sm:$0xff] }
 0x271   : > { %1998 = vmatpush.msrb.mxu3 %v1863_v11  ;;  %2187 = vmatpush.msrb.mxu1 %v1863_v11  ;;  %v2458_v32 = vld [vmem:[%s6157_s5 + $0x30] sm:$0xff] }
 0x272   : > { %v1855_v9 = vmax.f32 %v1715_v49, %v4246_v0  ;;  %v1854_v26 = vmax.f32 %v1714_v31, %v4247_v15  ;;  %v1886_v49 = vld [vmem:[%s6156_s4 + $0xb0] sm:$0xff]  ;;  %2400 = vperm.xlu0 %4260, %v2360_v36   ;;  %2681 = vperm.xlu1 %4261, %v2360_v36   ;;  %v3943_v0 = vld [vmem:[%s6156_s4 + $0x198] sm:$0xff]  ;;  %v3999_v36 = vld [vmem:[%s6157_s5 + $0x80] sm:$0xff] }
 0x273   : > { %1999 = vmatpush.msrb.mxu3 %v1862_v60  ;;  %2188 = vmatpush.msrb.mxu1 %v1862_v60  ;;  %v1890_v31 = vld [vmem:[%s6156_s4 + $0xd0] sm:$0xff]  ;;  %v3939_v60 = vld [vmem:[%s6156_s4 + $0x178] sm:$0xff] }
 0x274   : > { %v4240_v8 = vpop.permute.xlu0 %4239  ;;  %v1883_v15 = vld [vmem:[%s6156_s4 + $0x98] sm:$0xff] }
 0x275   : > { %2000 = vmatpush.msrb.mxu3 %v1861_v43  ;;  %2189 = vmatpush.msrb.mxu1 %v1861_v43  ;;  %v4241_v12 = vunpack.i.l.bf16 %v4240_v8  ;;  %v4242_v18 = vunpack.i.h.bf16 %v4240_v8  ;;  %v3940_v8 = vld [vmem:[%s6156_s4 + $0x180] sm:$0xff] }
 0x277   : > { %2001 = vmatpush.msrb.mxu3 %v1860_v46  ;;  %2190 = vmatpush.msrb.mxu1 %v1860_v46  ;;  %v1857_v34 = vmax.f32 %v1717_v24, %v4241_v12  ;;  %v1856_v16 = vmax.f32 %v1716_v47, %v4242_v18  ;;  %v1853_v47 = vmax.f32 %v1713_v29, %v4251_v58  ;;  %v3923_v29 = vld [vmem:[%s6156_s4 + $0xf8] sm:$0xff]  ;;  %v3925_v24 = vld [vmem:[%s6156_s4 + $0x108] sm:$0xff]  ;;  %v3942_v18 = vld [vmem:[%s6156_s4 + $0x190] sm:$0xff] }
 0x278   : > { %1978 = vmatmul.f32.gmra.mxu3 %v1882_v25  ;;  %2149 = vmatmul.f32.gmra.mxu0 %v3926_v42  ;;  %v2361_v46 = vld [vmem:[%s6159_s7 + $0x38] sm:$0xff]  ;;  %v3941_v12 = vld [vmem:[%s6156_s4 + $0x188] sm:$0xff] }
 0x279   : > { %2002 = vmatpush.msrb.mxu3 %v1859_v52  ;;  %2191 = vmatpush.msrb.mxu1 %v1859_v52  ;;  %v1879_v25 = vld [vmem:[%s6156_s4 + $0x78] sm:$0xff]  ;;  %v2364_v52 = vld [vmem:[%s6159_s7 + $0x50] sm:$0xff]  ;;  %v3964_v42 = vld [vmem:[%s6157_s5 + $0x48] sm:$0xff] }
 0x27a   : > { %4263 = vset.pattern.permute.xlu0 %v4395_v2  ;;  %4264 = vset.pattern.permute.xlu1 %v4396_v4  ;;  %v2365_v58 = vld [vmem:[%s6159_s7 + $0x58] sm:$0xff] }
 0x27b   : > { %2003 = vmatpush.msrb.mxu3 %v1858_v7  ;;  %2192 = vmatpush.msrb.mxu1 %v1858_v7  ;;  %v1881_v7 = vld [vmem:[%s6156_s4 + $0x88] sm:$0xff] }
 0x27c   : > { %2415 = vperm.xlu1 %4264, %v2363_v41   ;;  %2685 = vperm.xlu0 %4263, %v2361_v46  }
 0x27d   : > { %2004 = vmatpush.msrb.mxu3 %v1857_v34  ;;  %2193 = vmatpush.msrb.mxu1 %v1857_v34 }
 0x27e   : > { %4262 = vset.pattern.permute.xlu2 %v4396_v4 }
 0x27f   : > { %2005 = vmatpush.msrb.mxu3 %v1856_v16  ;;  %2194 = vmatpush.msrb.mxu1 %v1856_v16  ;;  %v3945_v16 = vld [vmem:[%s6156_s4 + $0x1a8] sm:$0xff] }
 0x280   : > { %1981 = vmatmul.f32.gmra.mxu3 %v1884_v57  ;;  %2152 = vmatmul.f32.gmra.mxu0 %v3928_v45  ;;  %v2362_v57 = vld [vmem:[%s6159_s7 + $0x40] sm:$0xff] }
 0x281   : > { %2006 = vmatpush.msrb.mxu3 %v1855_v9  ;;  %2195 = vmatpush.msrb.mxu1 %v1855_v9 }
 0x282   : > { %2405 = vperm.xlu2 %4262, %v2361_v46  }
 0x283   : > { %2007 = vmatpush.msrb.mxu3 %v1854_v26  ;;  %2196 = vmatpush.msrb.mxu1 %v1854_v26  ;;  %v3947_v26 = vld [vmem:[%s6156_s4 + $0x1b8] sm:$0xff] }
 0x284   : > { %2420 = vperm.xlu1 %4264, %v2364_v52   ;;  %4266 = vset.pattern.permute.xlu0 %v4396_v4 }
 0x285   : > { %2008 = vmatpush.msrb.mxu3 %v1853_v47  ;;  %2197 = vmatpush.msrb.mxu1 %v1853_v47  ;;  %v2367_v47 = vld [vmem:[%s6159_s7 + $0x68] sm:$0xff] }
 0x286   : > { %2425 = vperm.xlu0 %4266, %v2365_v58  }
 0x287   : > { %2009 = vmatpush.msrb.mxu3 %v1852_v3  ;;  %2198 = vmatpush.msrb.mxu1 %v1852_v3 }
 0x288   : > { %1984 = vmatmul.f32.gmra.mxu3 %v1886_v49  ;;  %3948 = vmatmul.msk.f32.vlgmr.msrb.gmra.mxu1 %vm1892_vm4, %v3921_v19  ;;  %v3967_v49 = vld [vmem:[%s6157_s5 + $0x60] sm:$0xff]  ;;  %v1887_v19 = vld [vmem:[%s6156_s4 + $0xb8] sm:$0xff] }
 0x289   : > { %2155 = vmatmul.f32.gmra.mxu0 %v3930_v40  ;;  %2506 = vmatpush.msrb.mxu2 %v3967_v49 }
 0x28a   : > { %2410 = vperm.xlu2 %4262, %v2362_v57   ;;  %2606 = vmatpush.msra.mxu3 %v2458_v32 }
 0x28c   : > { %4267 = vset.pattern.permute.xlu1 %v4395_v2 }
 0x28d   : > { %2697 = vperm.xlu1 %4267, %v2364_v52  }
 0x28e   : > { %4269 = vset.pattern.permute.xlu0 %v4395_v2 }
 0x290   : > { %1987 = vmatmul.f32.gmra.mxu3 %v1888_v6  ;;  %3949 = vmatmul.msk.f32.gmra.mxu1 %vm1892_vm4, %v3923_v29  ;;  %v3966_v6 = vld [vmem:[%s6157_s5 + $0x58] sm:$0xff]  ;;  %v2366_v29 = vld [vmem:[%s6159_s7 + $0x60] sm:$0xff] }
 0x291   : > { %2158 = vmatmul.f32.gmra.mxu0 %v3932_v22  ;;  %2507 = vmatpush.msrb.mxu2 %v3966_v6  ;;  %v4003_v22 = vld [vmem:[%s6157_s5 + $0xa0] sm:$0xff] }
 0x292   : > { %4265 = vset.pattern.permute.xlu2 %v4395_v2  ;;  %2705 = vperm.xlu0 %4269, %v2366_v29  }
 0x293   : > { %2689 = vperm.xlu2 %4265, %v2362_v57   ;;  %2785 = vmatpush.msra.mxu0 %v4003_v22 }
 0x295   : > { %2701 = vperm.xlu1 %4267, %v2365_v58  }
 0x298   : > { %1990 = vmatmul.f32.gmra.mxu3 %v1890_v31  ;;  %3950 = vmatmul.msk.f32.gmra.mxu1 %vm1892_vm4, %v3925_v24  ;;  %v3965_v31 = vld [vmem:[%s6157_s5 + $0x50] sm:$0xff]  ;;  %v2457_v24 = vld [vmem:[%s6157_s5 + $0x28] sm:$0xff] }
 0x299   : > { %2161 = vmatmul.f32.gmra.mxu0 %v3934_v5  ;;  %2508 = vmatpush.msrb.mxu2 %v3965_v31  ;;  %v2452_v5 = vld [vmem:[%s6157_s5] sm:$0xff] }
 0x29a   : > { %2607 = vmatpush.msra.mxu3 %v2457_v24 }
 0x29b   : > { %2693 = vperm.xlu2 %4265, %v2363_v41   ;;  %2509 = vmatpush.msrb.mxu2 %v3964_v42 }
 0x29d   : > { %2709 = vperm.xlu1 %4267, %v2367_v47  }
 0x2a0   : > { %3906 = vmatmul.msk.f32.vlgmr.msrb.gmra.mxu3 %vm1892_vm4, %v1865_v61  ;;  %3951 = vmatmul.msk.f32.gmra.mxu1 %vm1892_vm4, %v3927_v38  ;;  %v2456_v38 = vld [vmem:[%s6157_s5 + $0x20] sm:$0xff] }
 0x2a1   : > { %2164 = vmatmul.f32.gmra.mxu0 %v3936_v35  ;;  %2608 = vmatpush.msra.mxu3 %v2456_v38 }
 0x2a3   : > { %4268 = vset.pattern.permute.xlu2 %v4396_v4  ;;  %2609 = vmatpush.msra.mxu3 %v2455_v37 }
 0x2a4   : > { %2430 = vperm.xlu2 %4268, %v2366_v29  }
 0x2a8   : > { %3907 = vmatmul.msk.f32.gmra.mxu3 %vm1892_vm4, %v1867_v39  ;;  %3952 = vmatmul.msk.f32.gmra.mxu1 %vm1892_vm4, %v3929_v17  ;;  %v3963_v39 = vld [vmem:[%s6157_s5 + $0x40] sm:$0xff]  ;;  %v1891_v17 = vld [vmem:[%s6156_s4 + $0xd8] sm:$0xff] }
 0x2a9   : > { %2167 = vmatmul.f32.gmra.mxu0 %v3938_v1  ;;  %2510 = vmatpush.msrb.mxu2 %v3963_v39  ;;  %v3997_v1 = vld [vmem:[%s6157_s5 + $0x70] sm:$0xff] }
 0x2ac   : > { %2435 = vperm.xlu2 %4268, %v2367_v47   ;;  %v2658_v47 = vpop.permute.xlu2 %2657 }
 0x2b0   : > { %3908 = vmatmul.msk.f32.gmra.mxu3 %vm1892_vm4, %v1869_v21  ;;  %3953 = vmatmul.msk.f32.gmra.mxu1 %vm1892_vm4, %v3931_v63  ;;  %v3962_v21 = vld [vmem:[%s6157_s5 + $0x38] sm:$0xff]  ;;  %v2454_v63 = vld [vmem:[%s6157_s5 + $0x10] sm:$0xff] }
 0x2b1   : > { %2170 = vmatmul.f32.gmra.mxu0 %v3940_v8  ;;  %2511 = vmatpush.msrb.mxu2 %v3962_v21 }
 0x2b2   : > { %2610 = vmatpush.msra.mxu3 %v2454_v63 }
 0x2b3   : > { %v5417_v48 = vpop.f32.mrf.mxu3 }
 0x2b4   : > { %2611 = vmatpush.msra.mxu3 %v2453_v14 }
 0x2b6   : > { %2612 = vmatpush.msra.mxu3 %v2452_v5 }
 0x2b8   : > { %3909 = vmatmul.msk.f32.gmra.mxu3 %vm1892_vm4, %v1871_v50  ;;  %3954 = vmatmul.msk.f32.gmra.mxu1 %vm1892_vm4, %v3933_v54  ;;  %v4002_v50 = vld [vmem:[%s6157_s5 + $0x98] sm:$0xff] }
 0x2b9   : > { %2173 = vmatmul.f32.gmra.mxu0 %v3942_v18 }
 0x2ba   : > { %2786 = vmatpush.msra.mxu0 %v4002_v50 }
 0x2bb   : > { %v5433_v13 = vpop.f32.mrf.mxu3 }
 0x2c0   : > { %3910 = vmatmul.msk.f32.gmra.mxu3 %vm1892_vm4, %v1873_v55  ;;  %3955 = vmatmul.msk.f32.gmra.mxu1 %vm1892_vm4, %v3935_v59  ;;  %v4001_v55 = vld [vmem:[%s6157_s5 + $0x90] sm:$0xff]  ;;  %v4000_v59 = vld [vmem:[%s6157_s5 + $0x88] sm:$0xff] }
 0x2c1   : > { %2176 = vmatmul.f32.gmra.mxu0 %v3944_v27 }
 0x2c2   : > { %2787 = vmatpush.msra.mxu0 %v4001_v55 }
 0x2c3   : > { %v5450_v23 = vpop.f32.mrf.mxu3 }
 0x2c4   : > { %2788 = vmatpush.msra.mxu0 %v4000_v59  ;;  %v2386_v59 = vpop.permute.xlu2 %2385 }
 0x2c6   : > { %2789 = vmatpush.msra.mxu0 %v3999_v36 }
 0x2c8   : > { %3911 = vmatmul.msk.f32.gmra.mxu3 %vm1892_vm4, %v1875_v30  ;;  %3956 = vmatmul.msk.f32.gmra.mxu1 %vm1892_vm4, %v3937_v28  ;;  %v3998_v30 = vld [vmem:[%s6157_s5 + $0x78] sm:$0xff] }
 0x2c9   : > { %2179 = vmatmul.f32.gmra.mxu0 %v3946_v44 }
 0x2ca   : > { %2790 = vmatpush.msra.mxu0 %v3998_v30 }
 0x2cb   : > { %v5467_v11 = vpop.f32.mrf.mxu3 }
 0x2cc   : > { %2791 = vmatpush.msra.mxu0 %v3997_v1 }
 0x2d0   : > { %3912 = vmatmul.msk.f32.gmra.mxu3 %vm1892_vm4, %v1877_v33  ;;  %3957 = vmatmul.msk.f32.gmra.mxu1 %vm1892_vm4, %v3939_v60 }
 0x2d3   : > { %v5485_v43 = vpop.f32.mrf.mxu3 }
 0x2d8   : > { %3913 = vmatmul.msk.f32.gmra.mxu3 %vm1892_vm4, %v1879_v25  ;;  %3958 = vmatmul.msk.f32.gmra.mxu1 %vm1892_vm4, %v3941_v12 }
 0x2db   : > { %v5508_v51 = vpop.f32.mrf.mxu3 }
 0x2dd   : > { %v2141_v45 = vpop.f32.mrf.mxu0 }
 0x2e0   : > { %3914 = vmatmul.msk.f32.gmra.mxu3 %vm1892_vm4, %v1881_v7  ;;  %3959 = vmatmul.msk.f32.gmra.mxu1 %vm1892_vm4, %v3943_v0  ;;  %v2371_v7 = vpop.permute.xlu0 %2370 }
 0x2e3   : > { %v5523_v34 = vpop.f32.mrf.mxu3 }
 0x2e5   : > { %v2144_v20 = vpop.f32.mrf.mxu0 }
 0x2e8   : > { %3915 = vmatmul.msk.f32.gmra.mxu3 %vm1892_vm4, %v1883_v15  ;;  %3960 = vmatmul.msk.f32.gmra.mxu1 %vm1892_vm4, %v3945_v16  ;;  %v2381_v39 = vpop.permute.xlu0 %2380 }
 0x2eb   : > { %v5542_v9 = vpop.f32.mrf.mxu3 }
 0x2ed   : > { %v2147_v33 = vpop.f32.mrf.mxu0 }
 0x2f0   : > { %3916 = vmatmul.msk.f32.gmra.mxu3 %vm1892_vm4, %v1885_v62  ;;  %3961 = vmatmul.msk.f32.gmra.mxu1 %vm1892_vm4, %v3947_v26  ;;  %v2376_v26 = vpop.permute.xlu1 %2375 }
 0x2f3   : > { %v5560_v3 = vpop.f32.mrf.mxu3 }
 0x2f5   : > { %v2150_v10 = vpop.f32.mrf.mxu0 }
 0x2f8   : > { %3917 = vmatmul.msk.f32.gmra.mxu3 %vm1892_vm4, %v1887_v19 }
 0x2fb   : > { %v5569_v53 = vpop.f32.mrf.mxu3 }
 0x2fd   : > { %v2153_v58 = vpop.f32.mrf.mxu0 }
 0x300   : > { %3918 = vmatmul.msk.f32.gmra.mxu3 %vm1892_vm4, %v1889_v56 }
 0x303   : > { %v5594_v61 = vpop.f32.mrf.mxu3 }
 0x305   : > { %v2200_v40 = vpop.f32.mrf.mxu1 }
 0x306   : > { %v2201_v8 = vadd.f32 %v2200_v40, %v2141_v45  ;;  %v2156_v38 = vpop.f32.mrf.mxu0  ;;  %v2662_v40 = vpop.permute.xlu1 %2661 }
 0x308   : > { %3919 = vmatmul.msk.f32.gmra.mxu3 %vm1892_vm4, %v1891_v17 }
 0x30b   : > { %v5624_v54 = vpop.f32.mrf.mxu3 }
 0x30d   : > { %v2203_v35 = vpop.f32.mrf.mxu1 }
 0x30e   : > { %v2204_v27 = vadd.f32 %v2203_v35, %v2144_v20  ;;  %v2666_v20 = vpop.permute.xlu0 %2665  ;;  %v2159_v30 = vpop.f32.mrf.mxu0 }
 0x313   : > { %v5641_v28 = vpop.f32.mrf.mxu3 }
 0x315   : > { %v2206_v60 = vpop.f32.mrf.mxu1 }
 0x316   : > { %v2207_v32 = vadd.f32 %v2206_v60, %v2147_v33 }
 0x31b   : > { %v5646_v41 = vpop.f32.mrf.mxu3 }
 0x31d   : > { %v2209_v25 = vpop.f32.mrf.mxu1 }
 0x31e   : > { %v2210_v63 = vadd.f32 %v2209_v25, %v2150_v10 }
 0x323   : > { %v2011_v46 = vpop.f32.mrf.mxu3 }
 0x324   : > { %v2012_v12 = vadd.f32 %v2011_v46, %v5417_v48 }
 0x325   : > { %v2212_v44 = vpop.f32.mrf.mxu1 }
 0x326   : > { %v2242_v52 = vmax.f32 %v2012_v12, %v2201_v8  ;;  %v2213_v8 = vadd.f32 %v2212_v44, %v2153_v58  ;;  %v2391_v12 = vpop.permute.xlu1 %2390 }
 0x328   : > { %v2270_v18 = vrot.slane %v2242_v52, 7  ;;  %3969 = vmatmul.msk.f32.vlgmr.msrb.gmra.mxu2 %vm2467_vm5, %v2242_v52  ;;  %v2312_v49 = vrot.slane %v2242_v52, 1 }
 0x32a   : > { %v2311_v0 = vsel %vm578_vm3, 0.0, %v2270_v18 }
 0x32b   : > { %v2438_v15 = vmul.f32 %v2371_v7, %v2311_v0  ;;  %v2014_v16 = vpop.f32.mrf.mxu3  ;;  %v2670_v7 = vpop.permute.xlu2 %2669 }
 0x32c   : > { %v2015_v57 = vadd.f32 %v2014_v16, %v5433_v13 }
 0x32d   : > { %3983 = vmatmul.msk.f32.vlgmr.msra.gmra.mxu3 %vm2467_vm5, %v2438_v15  ;;  %v2215_v45 = vpop.f32.mrf.mxu1 }
 0x32e   : > { %v2243_v62 = vmax.f32 %v2015_v57, %v2204_v27  ;;  %v2216_v16 = vadd.f32 %v2215_v45, %v2156_v38  ;;  %v2162_v57 = vpop.f32.mrf.mxu0 }
 0x330   : > { %3970 = vmatmul.msk.f32.gmra.mxu2 %vm2467_vm5, %v2243_v62  ;;  %v2271_v48 = vrot.slane %v2243_v62, 7  ;;  %v2313_v19 = vrot.slane %v2243_v62, 1 }
 0x332   : > { %v2272_v6 = vsel %vm578_vm3, %v2270_v18, %v2271_v48  ;;  %v2314_v29 = vsel %vm663_vm2, %v2312_v49, %v2313_v19 }
 0x333   : > { %v2439_v31 = vmul.f32 %v2376_v26, %v2272_v6  ;;  %v2712_v24 = vmul.f32 %v2658_v47, %v2314_v29  ;;  %v2017_v13 = vpop.f32.mrf.mxu3  ;;  %v2396_v47 = vpop.permute.xlu1 %2395 }
 0x334   : > { %v2018_v56 = vadd.f32 %v2017_v13, %v5450_v23  ;;  %v2674_v29 = vpop.permute.xlu2 %2673 }
 0x335   : > { %3984 = vmatmul.msk.f32.gmra.mxu3 %vm2467_vm5, %v2439_v31  ;;  %4004 = vmatmul.msk.f32.vlgmr.msra.gmra.mxu0 %vm2467_vm5, %v2712_v24  ;;  %v2218_v1 = vpop.f32.mrf.mxu1 }
 0x336   : > { %v2244_v42 = vmax.f32 %v2018_v56, %v2207_v32  ;;  %v2219_v31 = vadd.f32 %v2218_v1, %v2159_v30 }
 0x338   : > { %v2273_v17 = vrot.slane %v2244_v42, 7  ;;  %3971 = vmatmul.msk.f32.gmra.mxu2 %vm2467_vm5, %v2244_v42  ;;  %v2315_v37 = vrot.slane %v2244_v42, 1  ;;  %v2165_v42 = vpop.f32.mrf.mxu0 }
 0x33a   : > { %v2316_v21 = vsel %vm663_vm2, %v2313_v19, %v2315_v37  ;;  %v2274_v22 = vsel %vm578_vm3, %v2271_v48, %v2273_v17 }
 0x33b   : > { %v2713_v14 = vmul.f32 %v2662_v40, %v2316_v21  ;;  %v2020_v23 = vpop.f32.mrf.mxu3  ;;  %v2440_v50 = vmul.f32 %v2381_v39, %v2274_v22  ;;  %v2401_v39 = vpop.permute.xlu0 %2400 }
 0x33c   : > { %v2021_v5 = vadd.f32 %v2020_v23, %v5467_v11  ;;  %v2678_v40 = vpop.permute.xlu1 %2677 }
 0x33d   : > { %3985 = vmatmul.msk.f32.gmra.mxu3 %vm2467_vm5, %v2440_v50  ;;  %4005 = vmatmul.msk.f32.gmra.mxu0 %vm2467_vm5, %v2713_v14  ;;  %v2221_v62 = vpop.f32.mrf.mxu1 }
 0x33e   : > { %v2245_v55 = vmax.f32 %v2021_v5, %v2210_v63  ;;  %v2222_v22 = vadd.f32 %v2221_v62, %v2162_v57  ;;  %v2406_v5 = vpop.permute.xlu2 %2405 }
 0x340   : > { %3972 = vmatmul.msk.f32.gmra.mxu2 %vm2467_vm5, %v2245_v55  ;;  %v2317_v35 = vrot.slane %v2245_v55, 1  ;;  %v2275_v36 = vrot.slane %v2245_v55, 7 }
 0x342   : > { %v2318_v33 = vsel %vm663_vm2, %v2315_v37, %v2317_v35  ;;  %v2276_v60 = vsel %vm578_vm3, %v2273_v17, %v2275_v36 }
 0x343   : > { %v2714_v10 = vmul.f32 %v2666_v20, %v2318_v33  ;;  %v2441_v11 = vmul.f32 %v2386_v59, %v2276_v60  ;;  %v2023_v46 = vpop.f32.mrf.mxu3  ;;  %v2168_v59 = vpop.f32.mrf.mxu0 }
 0x344   : > { %v2024_v25 = vadd.f32 %v2023_v46, %v5485_v43  ;;  %v2682_v30 = vpop.permute.xlu1 %2681 }
 0x345   : > { %3986 = vmatmul.msk.f32.gmra.mxu3 %vm2467_vm5, %v2441_v11  ;;  %4006 = vmatmul.msk.f32.gmra.mxu0 %vm2467_vm5, %v2714_v10  ;;  %v2224_v38 = vpop.f32.mrf.mxu1 }
 0x346   : > { %v2246_v52 = vmax.f32 %v2024_v25, %v2213_v8  ;;  %v2225_v60 = vadd.f32 %v2224_v38, %v2165_v42  ;;  %v2411_v25 = vpop.permute.xlu2 %2410 }
 0x348   : > { %3973 = vmatmul.msk.f32.gmra.mxu2 %vm2467_vm5, %v2246_v52  ;;  %v2277_v18 = vrot.slane %v2246_v52, 7  ;;  %v2319_v0 = vrot.slane %v2246_v52, 1 }
 0x34a   : > { %v2278_v27 = vsel %vm578_vm3, %v2275_v36, %v2277_v18  ;;  %v2320_v15 = vsel %vm663_vm2, %v2317_v35, %v2319_v0 }
 0x34b   : > { %v2442_v58 = vmul.f32 %v2391_v12, %v2278_v27  ;;  %v2715_v44 = vmul.f32 %v2670_v7, %v2320_v15  ;;  %v2026_v43 = vpop.f32.mrf.mxu3  ;;  %v2686_v12 = vpop.permute.xlu0 %2685 }
 0x34c   : > { %v2027_v26 = vadd.f32 %v2026_v43, %v5508_v51  ;;  %v2171_v7 = vpop.f32.mrf.mxu0  ;;  %v2416_v43 = vpop.permute.xlu1 %2415 }
 0x34d   : > { %3987 = vmatmul.msk.f32.gmra.mxu3 %vm2467_vm5, %v2442_v58  ;;  %4007 = vmatmul.msk.f32.gmra.mxu0 %vm2467_vm5, %v2715_v44  ;;  %v2227_v20 = vpop.f32.mrf.mxu1 }
 0x34e   : > { %v2247_v48 = vmax.f32 %v2027_v26, %v2216_v16  ;;  %v2228_v16 = vadd.f32 %v2227_v20, %v2168_v59 }
 0x350   : > { %3974 = vmatmul.msk.f32.gmra.mxu2 %vm2467_vm5, %v2247_v48  ;;  %v2279_v49 = vrot.slane %v2247_v48, 7  ;;  %v2321_v19 = vrot.slane %v2247_v48, 1  ;;  %v2690_v48 = vpop.permute.xlu2 %2689 }
 0x352   : > { %v2280_v6 = vsel %vm578_vm3, %v2277_v18, %v2279_v49  ;;  %v2322_v32 = vsel %vm663_vm2, %v2319_v0, %v2321_v19 }
 0x353   : > { %v2443_v24 = vmul.f32 %v2396_v47, %v2280_v6  ;;  %v2716_v13 = vmul.f32 %v2674_v29, %v2322_v32  ;;  %v2029_v56 = vpop.f32.mrf.mxu3 }
 0x354   : > { %v2030_v51 = vadd.f32 %v2029_v56, %v5523_v34  ;;  %v2174_v29 = vpop.f32.mrf.mxu0 }
 0x355   : > { %3988 = vmatmul.msk.f32.gmra.mxu3 %vm2467_vm5, %v2443_v24  ;;  %4008 = vmatmul.msk.f32.gmra.mxu0 %vm2467_vm5, %v2716_v13  ;;  %v2230_v0 = vpop.f32.mrf.mxu1 }
 0x356   : > { %v2248_v45 = vmax.f32 %v2030_v51, %v2219_v31  ;;  %v2231_v6 = vadd.f32 %v2230_v0, %v2171_v7  ;;  %v2421_v51 = vpop.permute.xlu1 %2420 }
 0x358   : > { %3975 = vmatmul.msk.f32.gmra.mxu2 %vm2467_vm5, %v2248_v45  ;;  %v2281_v17 = vrot.slane %v2248_v45, 7  ;;  %v2323_v37 = vrot.slane %v2248_v45, 1 }
 0x35a   : > { %v2282_v21 = vsel %vm578_vm3, %v2279_v49, %v2281_v17  ;;  %v2324_v63 = vsel %vm663_vm2, %v2321_v19, %v2323_v37 }
 0x35b   : > { %v2444_v14 = vmul.f32 %v2401_v39, %v2282_v21  ;;  %v2717_v34 = vmul.f32 %v2678_v40, %v2324_v63  ;;  %v2032_v23 = vpop.f32.mrf.mxu3  ;;  %v2694_v39 = vpop.permute.xlu2 %2693 }
 0x35c   : > { %v2033_v50 = vadd.f32 %v2032_v23, %v5542_v9  ;;  %v2426_v23 = vpop.permute.xlu0 %2425 }
 0x35d   : > { %3989 = vmatmul.msk.f32.gmra.mxu3 %vm2467_vm5, %v2444_v14  ;;  %4009 = vmatmul.msk.f32.gmra.mxu0 %vm2467_vm5, %v2717_v34  ;;  %v2233_v24 = vpop.f32.mrf.mxu1 }
 0x35e   : > { %v2249_v55 = vmax.f32 %v2033_v50, %v2222_v22  ;;  %v2234_v40 = vadd.f32 %v2233_v24, %v2174_v29  ;;  %v2177_v22 = vpop.f32.mrf.mxu0 }
 0x360   : > { %3976 = vmatmul.msk.f32.gmra.mxu2 %vm2467_vm5, %v2249_v55  ;;  %v2325_v35 = vrot.slane %v2249_v55, 1  ;;  %v2283_v36 = vrot.slane %v2249_v55, 7 }
 0x362   : > { %v2326_v1 = vsel %vm663_vm2, %v2323_v37, %v2325_v35  ;;  %v2284_v33 = vsel %vm578_vm3, %v2281_v17, %v2283_v36 }
 0x363   : > { %v2718_v8 = vmul.f32 %v2682_v30, %v2326_v1  ;;  %v2445_v9 = vmul.f32 %v2406_v5, %v2284_v33  ;;  %v2035_v10 = vpop.f32.mrf.mxu3  ;;  %v2698_v5 = vpop.permute.xlu1 %2697 }
 0x364   : > { %v2036_v11 = vadd.f32 %v2035_v10, %v5560_v3  ;;  %v2431_v10 = vpop.permute.xlu2 %2430 }
 0x365   : > { %3990 = vmatmul.msk.f32.gmra.mxu3 %vm2467_vm5, %v2445_v9  ;;  %4010 = vmatmul.msk.f32.gmra.mxu0 %vm2467_vm5, %v2718_v8  ;;  %v2236_v14 = vpop.f32.mrf.mxu1 }
 0x366   : > { %v2250_v46 = vmax.f32 %v2036_v11, %v2225_v60  ;;  %v2180_v60 = vpop.f32.mrf.mxu0 }
 0x368   : > { %3977 = vmatmul.msk.f32.gmra.mxu2 %vm2467_vm5, %v2250_v46  ;;  %v2327_v52 = vrot.slane %v2250_v46, 1  ;;  %v2285_v18 = vrot.slane %v2250_v46, 7 }
 0x36a   : > { %v2328_v27 = vsel %vm663_vm2, %v2325_v35, %v2327_v52  ;;  %v2286_v15 = vsel %vm578_vm3, %v2283_v36, %v2285_v18  ;;  %v2237_v35 = vadd.f32 %v2236_v14, %v2177_v22 }
 0x36b   : > { %v2719_v57 = vmul.f32 %v2686_v12, %v2328_v27  ;;  %v2446_v3 = vmul.f32 %v2411_v25, %v2286_v15  ;;  %v2038_v58 = vpop.f32.mrf.mxu3  ;;  %v2702_v46 = vpop.permute.xlu1 %2701 }
 0x36c   : > { %v2039_v44 = vadd.f32 %v2038_v58, %v5569_v53  ;;  %v2706_v15 = vpop.permute.xlu0 %2705  ;;  %v2436_v58 = vpop.permute.xlu2 %2435 }
 0x36d   : > { %3991 = vmatmul.msk.f32.gmra.mxu3 %vm2467_vm5, %v2446_v3  ;;  %4011 = vmatmul.msk.f32.gmra.mxu0 %vm2467_vm5, %v2719_v57  ;;  %v2239_v8 = vpop.f32.mrf.mxu1 }
 0x36e   : > { %v2251_v62 = vmax.f32 %v2039_v44, %v2228_v16 }
 0x370   : > { %3978 = vmatmul.msk.f32.gmra.mxu2 %vm2467_vm5, %v2251_v62  ;;  %v2287_v26 = vrot.slane %v2251_v62, 7  ;;  %v2329_v47 = vrot.slane %v2251_v62, 1 }
 0x372   : > { %v2288_v49 = vsel %vm578_vm3, %v2285_v18, %v2287_v26  ;;  %v2330_v19 = vsel %vm663_vm2, %v2327_v52, %v2329_v47  ;;  %v2240_v52 = vadd.f32 %v2239_v8, %v2180_v60 }
 0x373   : > { %v2447_v32 = vmul.f32 %v2416_v43, %v2288_v49  ;;  %v2720_v31 = vmul.f32 %v2690_v48, %v2330_v19  ;;  %v2041_v53 = vpop.f32.mrf.mxu3 }
 0x374   : > { %v2042_v13 = vadd.f32 %v2041_v53, %v5594_v61 }
 0x375   : > { %3992 = vmatmul.msk.f32.gmra.mxu3 %vm2467_vm5, %v2447_v32  ;;  %4012 = vmatmul.msk.f32.gmra.mxu0 %vm2467_vm5, %v2720_v31 }
 0x376   : > { %v2252_v56 = vmax.f32 %v2042_v13, %v2231_v6 }
 0x378   : > { %3979 = vmatmul.msk.f32.gmra.mxu2 %vm2467_vm5, %v2252_v56  ;;  %v2289_v42 = vrot.slane %v2252_v56, 7  ;;  %v2331_v38 = vrot.slane %v2252_v56, 1  ;;  %v5735_v56 = vld [vmem:[%s6158_s6] ss:$0 sm:$0xff] }
 0x37a   : > { %v2290_v45 = vsel %vm578_vm3, %v2287_v26, %v2289_v42  ;;  %v2332_v17 = vsel %vm663_vm2, %v2329_v47, %v2331_v38  ;;  %v2710_v26 = vpop.permute.xlu1 %2709 }
 0x37b   : > { %v2448_v37 = vmul.f32 %v2421_v51, %v2290_v45  ;;  %v2721_v21 = vmul.f32 %v2694_v39, %v2332_v17  ;;  %v2044_v63 = vpop.f32.mrf.mxu3 }
 0x37c   : > { %v2045_v61 = vadd.f32 %v2044_v63, %v5624_v54 }
 0x37d   : > { %3993 = vmatmul.msk.f32.gmra.mxu3 %vm2467_vm5, %v2448_v37  ;;  %4013 = vmatmul.msk.f32.gmra.mxu0 %vm2467_vm5, %v2721_v21 }
 0x37e   : > { %v2253_v34 = vmax.f32 %v2045_v61, %v2234_v40 }
 0x380   : > { %3980 = vmatmul.msk.f32.gmra.mxu2 %vm2467_vm5, %v2253_v34  ;;  %v2291_v50 = vrot.slane %v2253_v34, 7  ;;  %v2333_v55 = vrot.slane %v2253_v34, 1 }
 0x382   : > { %v2292_v59 = vsel %vm578_vm3, %v2289_v42, %v2291_v50  ;;  %v2334_v20 = vsel %vm663_vm2, %v2331_v38, %v2333_v55 }
 0x383   : > { %v2449_v36 = vmul.f32 %v2426_v23, %v2292_v59  ;;  %v2722_v54 = vmul.f32 %v2698_v5, %v2334_v20  ;;  %v2047_v30 = vpop.f32.mrf.mxu3 }
 0x384   : > { %v2048_v1 = vadd.f32 %v2047_v30, %v5641_v28 }
 0x385   : > { %3994 = vmatmul.msk.f32.gmra.mxu3 %vm2467_vm5, %v2449_v36  ;;  %4014 = vmatmul.msk.f32.gmra.mxu0 %vm2467_vm5, %v2722_v54 }
 0x386   : > { %v2254_v33 = vmax.f32 %v2048_v1, %v2237_v35 }
 0x388   : > { %3981 = vmatmul.msk.f32.gmra.mxu2 %vm2467_vm5, %v2254_v33  ;;  %v2335_v9 = vrot.slane %v2254_v33, 1  ;;  %v2293_v11 = vrot.slane %v2254_v33, 7 }
 0x38a   : > { %v2336_v25 = vsel %vm663_vm2, %v2333_v55, %v2335_v9  ;;  %v2294_v12 = vsel %vm578_vm3, %v2291_v50, %v2293_v11 }
 0x38b   : > { %v2723_v18 = vmul.f32 %v2702_v46, %v2336_v25  ;;  %v2450_v28 = vmul.f32 %v2431_v10, %v2294_v12  ;;  %v2050_v7 = vpop.f32.mrf.mxu3 }
 0x38c   : > { %v2051_v0 = vadd.f32 %v2050_v7, %v5646_v41 }
 0x38d   : > { %3995 = vmatmul.msk.f32.gmra.mxu3 %vm2467_vm5, %v2450_v28  ;;  %4015 = vmatmul.msk.f32.gmra.mxu0 %vm2467_vm5, %v2723_v18 }
 0x38e   : > { %v2255_v27 = vmax.f32 %v2051_v0, %v2240_v52 }
 0x390   : > { %3982 = vmatmul.msk.f32.gmra.mxu2 %vm2467_vm5, %v2255_v27  ;;  %v2337_v16 = vrot.slane %v2255_v27, 1  ;;  %v2295_v57 = vrot.slane %v2255_v27, 7 }
 0x392   : > { %v2338_v3 = vsel %vm663_vm2, %v2335_v9, %v2337_v16  ;;  %v2296_v44 = vsel %vm578_vm3, %v2293_v11, %v2295_v57  ;;  %v2353_v41 = vsel %vm663_vm2, %v2337_v16, 0.0 }
 0x393   : > { %v2724_v43 = vmul.f32 %v2706_v15, %v2338_v3  ;;  %v2451_v62 = vmul.f32 %v2436_v58, %v2296_v44  ;;  %v2725_v48 = vmul.f32 %v2710_v26, %v2353_v41  ;;  %v3142_v41 = vld [vmem:[%s6163_s11 + $0x8] sm:$0xff] }
 0x395   : > { %3996 = vmatmul.msk.f32.gmra.mxu3 %vm2467_vm5, %v2451_v62  ;;  %4016 = vmatmul.msk.f32.gmra.mxu0 %vm2467_vm5, %v2724_v43 }
 0x39d   : > { %4017 = vmatmul.msk.f32.gmra.mxu0 %vm2467_vm5, %v2725_v48 }
 0x3ab   : > { %v2513_v47 = vpop.f32.mrf.mxu2 }
 0x3b0   : > { %v2614_v49 = vpop.f32.mrf.mxu3 }
 0x3b1   : > { %v2615_v60 = vadd.f32 %v2614_v49, %v2513_v47 }
 0x3b2   : > { %v2793_v19 = vpop.f32.mrf.mxu0 }
 0x3b3   : > { %v2516_v6 = vpop.f32.mrf.mxu2  ;;  %v2835_v25 = vadd.f32 %v2793_v19, %v2615_v60 }
 0x3b5   : > { %v5759_v27 = vadd.f32 %v5735_v56, %v2835_v25 }
 0x3b7   : > { %v2867_v57 = vmax.f32 %v5759_v27, 0.0  ;;  %v4026_v27 = vld [vmem:[%s6160_s8 + $0x40] sm:$0xff] }
 0x3b8   : > { %v2617_v29 = vpop.f32.mrf.mxu3 }
 0x3b9   : > { %v2618_v30 = vadd.f32 %v2617_v29, %v2516_v6 }
 0x3ba   : > { %v2796_v32 = vpop.f32.mrf.mxu0 }
 0x3bb   : > { %v2519_v31 = vpop.f32.mrf.mxu2  ;;  %v2836_v11 = vadd.f32 %v2796_v32, %v2618_v30 }
 0x3bd   : > { %v5752_v28 = vadd.f32 %v5735_v56, %v2836_v11  ;;  %v3141_v11 = vld [vmem:[%s6163_s11] sm:$0xff] }
 0x3bf   : > { %v2868_v16 = vmax.f32 %v5752_v28, 0.0  ;;  %v2952_v28 = vld [vmem:[%s6160_s8 + $0x8] sm:$0xff] }
 0x3c0   : > { %v2620_v53 = vpop.f32.mrf.mxu3 }
 0x3c1   : > { %v2621_v24 = vadd.f32 %v2620_v53, %v2519_v31  ;;  %v4300_v58 = vpack.i.bf16 %v2867_v57, %v2868_v16 }
 0x3c2   : > { %v2799_v13 = vpop.f32.mrf.mxu0 }
 0x3c3   : > { %v2837_v51 = vadd.f32 %v2799_v13, %v2621_v24  ;;  %v2522_v42 = vpop.f32.mrf.mxu2 }
 0x3c5   : > { %v5738_v38 = vadd.f32 %v5735_v56, %v2837_v51 }
 0x3c8   : > { %v2623_v45 = vpop.f32.mrf.mxu3 }
 0x3c9   : > { %v2624_v39 = vadd.f32 %v2623_v45, %v2522_v42 }
 0x3ca   : > { %v2802_v17 = vpop.f32.mrf.mxu0 }
 0x3cb   : > { %v2838_v40 = vadd.f32 %v2802_v17, %v2624_v39  ;;  %v2525_v37 = vpop.f32.mrf.mxu2 }
 0x3cd   : > { %v5741_v21 = vadd.f32 %v5735_v56, %v2838_v40 }
 0x3d0   : > { %v2626_v63 = vpop.f32.mrf.mxu3 }
 0x3d1   : > { %v2627_v61 = vadd.f32 %v2626_v63, %v2525_v37 }
 0x3d2   : > { %v2805_v22 = vpop.f32.mrf.mxu0 }
 0x3d3   : > { %v2839_v14 = vadd.f32 %v2805_v22, %v2627_v61  ;;  %v2528_v34 = vpop.f32.mrf.mxu2 }
 0x3d5   : > { %v5782_v63 = vadd.f32 %v5735_v56, %v2839_v14 }
 0x3d8   : > { %v2629_v23 = vpop.f32.mrf.mxu3 }
 0x3d9   : > { %v2630_v6 = vadd.f32 %v2629_v23, %v2528_v34  ;;  %v2871_v34 = vmax.f32 %v5782_v63, 0.0 }
 0x3da   : > { %v2808_v50 = vpop.f32.mrf.mxu0 }
 0x3db   : > { %v2531_v5 = vpop.f32.mrf.mxu2  ;;  %v2840_v24 = vadd.f32 %v2808_v50, %v2630_v6 }
 0x3dd   : > { %v5779_v17 = vadd.f32 %v5735_v56, %v2840_v24 }
 0x3df   : > { %v2872_v22 = vmax.f32 %v5779_v17, 0.0 }
 0x3e0   : > { %v2632_v55 = vpop.f32.mrf.mxu3 }
 0x3e1   : > { %v2633_v20 = vadd.f32 %v2632_v55, %v2531_v5 }
 0x3e2   : > { %v2811_v59 = vpop.f32.mrf.mxu0 }
 0x3e3   : > { %v2534_v35 = vpop.f32.mrf.mxu2  ;;  %v2841_v36 = vadd.f32 %v2811_v59, %v2633_v20  ;;  %v4290_v20 = vpack.i.bf16 %v2871_v34, %v2872_v22 }
 0x3e5   : > { %v5744_v8 = vadd.f32 %v5735_v56, %v2841_v36 }
 0x3e7   : > { %v2873_v12 = vmax.f32 %v5744_v8, 0.0 }
 0x3e8   : > { %v2635_v54 = vpop.f32.mrf.mxu3 }
 0x3e9   : > { %v2636_v1 = vadd.f32 %v2635_v54, %v2534_v35 }
 0x3ea   : > { %v2814_v33 = vpop.f32.mrf.mxu0 }
 0x3eb   : > { %v2842_v9 = vadd.f32 %v2814_v33, %v2636_v1  ;;  %v2537_v10 = vpop.f32.mrf.mxu2 }
 0x3ed   : > { %v5747_v46 = vadd.f32 %v5735_v56, %v2842_v9 }
 0x3ef   : > { %v2874_v52 = vmax.f32 %v5747_v46, 0.0 }
 0x3f0   : > { %v2638_v18 = vpop.f32.mrf.mxu3 }
 0x3f1   : > { %v4285_v7 = vpack.i.bf16 %v2873_v12, %v2874_v52  ;;  %v2639_v14 = vadd.f32 %v2638_v18, %v2537_v10 }
 0x3f2   : > { %v2817_v0 = vpop.f32.mrf.mxu0 }
 0x3f3   : > { %v2540_v15 = vpop.f32.mrf.mxu2  ;;  %4286 = vrot.lane.b32.xlu0 %v4285_v7, %s4397_s17  ;;  %v2843_v33 = vadd.f32 %v2817_v0, %v2639_v14  ;;  %v2870_v0 = vmax.f32 %v5741_v21, 0.0  ;;  %v4045_v14 = vld [vmem:[%s6161_s9 + $0x68] sm:$0xff] }
 0x3f4   : > { %3228 = vmatpush.msrb.mxu3 %v4045_v14 }
 0x3f5   : > { %v2861_v10 = vadd.f32 %v5735_v56, %v2843_v33  ;;  %v3195_v33 = vld [vmem:[%s6161_s9 + $0x28] sm:$0xff] }
 0x3f8   : > { %v2641_v3 = vpop.f32.mrf.mxu3 }
 0x3f9   : > { %v2642_v55 = vadd.f32 %v2641_v3, %v2540_v15  ;;  %v2875_v15 = vmax.f32 %v2861_v10, 0.0  ;;  %v2955_v10 = vld [vmem:[%s6160_s8 + $0x20] sm:$0xff] }
 0x3fa   : > { %v2820_v44 = vpop.f32.mrf.mxu0 }
 0x3fb   : > { %v2543_v43 = vpop.f32.mrf.mxu2  ;;  %4301 = vrot.lane.b32.xlu0 %v4300_v58, %s4397_s17  ;;  %v2844_v30 = vadd.f32 %v2820_v44, %v2642_v55  ;;  %v2869_v58 = vmax.f32 %v5738_v38, 0.0 }
 0x3fd   : > { %v2862_v25 = vadd.f32 %v5735_v56, %v2844_v30  ;;  %v4295_v44 = vpack.i.bf16 %v2869_v58, %v2870_v0  ;;  %v3196_v30 = vld [vmem:[%s6161_s9 + $0x30] sm:$0xff] }
 0x3ff   : > { %v2876_v18 = vmax.f32 %v2862_v25, 0.0  ;;  %v3194_v25 = vld [vmem:[%s6161_s9 + $0x20] sm:$0xff] }
 0x400   : > { %v2644_v62 = vpop.f32.mrf.mxu3 }
 0x401   : > { %v2645_v48 = vadd.f32 %v2644_v62, %v2543_v43  ;;  %v4280_v3 = vpack.i.bf16 %v2875_v15, %v2876_v18 }
 0x402   : > { %v2823_v26 = vpop.f32.mrf.mxu0 }
 0x403   : > { %3321 = vperm.xlu0 %4269, %v3142_v41   ;;  %v2546_v47 = vpop.f32.mrf.mxu2  ;;  %v2845_v49 = vadd.f32 %v2823_v26, %v2645_v48 }
 0x405   : > { %v5773_v31 = vadd.f32 %v5735_v56, %v2845_v49 }
 0x407   : > { %v2877_v42 = vmax.f32 %v5773_v31, 0.0 }
 0x408   : > { %v2647_v19 = vpop.f32.mrf.mxu3 }
 0x409   : > { %v2648_v29 = vadd.f32 %v2647_v19, %v2546_v47 }
 0x40a   : > { %v2826_v32 = vpop.f32.mrf.mxu0 }
 0x40b   : > { %v2846_v53 = vadd.f32 %v2826_v32, %v2648_v29  ;;  %4307 = vset.pattern.permute.xlu0 %v4396_v4  ;;  %v2549_v51 = vpop.f32.mrf.mxu2 }
 0x40d   : > { %v2864_v13 = vadd.f32 %v5735_v56, %v2846_v53 }
 0x40f   : > { %v2878_v45 = vmax.f32 %v2864_v13, 0.0 }
 0x410   : > { %v2650_v39 = vpop.f32.mrf.mxu3 }
 0x411   : > { %v4270_v40 = vpack.i.bf16 %v2877_v42, %v2878_v45  ;;  %v2651_v61 = vadd.f32 %v2650_v39, %v2549_v51 }
 0x412   : > { %v2829_v37 = vpop.f32.mrf.mxu0 }
 0x413   : > { %4271 = vrot.lane.b32.xlu1 %v4270_v40, %s4397_s17  ;;  %v2847_v23 = vadd.f32 %v2829_v37, %v2651_v61  ;;  %v2552_v50 = vpop.f32.mrf.mxu2 }
 0x415   : > { %v2865_v36 = vadd.f32 %v5735_v56, %v2847_v23 }
 0x417   : > { %v2879_v60 = vmax.f32 %v2865_v36, 0.0  ;;  %v4044_v36 = vld [vmem:[%s6161_s9 + $0x60] sm:$0xff] }
 0x418   : > { %v2653_v5 = vpop.f32.mrf.mxu3  ;;  %3229 = vmatpush.msrb.mxu3 %v4044_v36 }
 0x419   : > { %v2654_v59 = vadd.f32 %v2653_v5, %v2552_v50 }
 0x41a   : > { %v2832_v35 = vpop.f32.mrf.mxu0 }
 0x41b   : > { %v2848_v54 = vadd.f32 %v2832_v35, %v2654_v59  ;;  %4291 = vrot.lane.b32.xlu1 %v4290_v20, %s4397_s17  ;;  %v3144_v59 = vld [vmem:[%s6163_s11 + $0x18] sm:$0xff]  ;;  %v4027_v20 = vld [vmem:[%s6160_s8 + $0x48] sm:$0xff] }
 0x41c   : > { %v3146_v35 = vld [vmem:[%s6163_s11 + $0x28] sm:$0xff] }
 0x41d   : > { %v2866_v1 = vadd.f32 %v5735_v56, %v2848_v54  ;;  %v3145_v54 = vld [vmem:[%s6163_s11 + $0x20] sm:$0xff] }
 0x41f   : > { %v2880_v9 = vmax.f32 %v2866_v1, 0.0  ;;  %v4043_v1 = vld [vmem:[%s6161_s9 + $0x58] sm:$0xff] }
 0x420   : > { %3230 = vmatpush.msrb.mxu3 %v4043_v1 }
 0x421   : > { %v4275_v7 = vpack.i.bf16 %v2879_v60, %v2880_v9 }
 0x423   : > { %4276 = vrot.lane.b32.xlu2 %v4275_v7, %s4397_s17  ;;  %3317 = vperm.xlu1 %4267, %v3141_v11   ;;  %v4041_v7 = vld [vmem:[%s6161_s9 + $0x48] sm:$0xff] }
 0x42b   : > { %4281 = vrot.lane.b32.xlu2 %v4280_v3, %s4397_s17  ;;  %4305 = vset.pattern.permute.xlu1 %v4396_v4  ;;  %v2956_v3 = vld [vmem:[%s6160_s8 + $0x28] sm:$0xff] }
 0x42c   : > { %3155 = vperm.xlu1 %4305, %v3142_v41  }
 0x433   : > { %4296 = vrot.lane.b32.xlu2 %v4295_v44, %s4397_s17  ;;  %v3193_v44 = vld [vmem:[%s6161_s9 + $0x18] sm:$0xff]  ;;  %s4398_s17 = smov 80  }
 0x434   : > { %4308 = vset.pattern.permute.xlu1 %v4395_v2 }
 0x435   : > { %3329 = vperm.xlu1 %4308, %v3144_v59  }
 0x43b   : > { %3150 = vperm.xlu2 %4268, %v3141_v11   ;;  %v4042_v11 = vld [vmem:[%s6161_s9 + $0x50] sm:$0xff] }
 0x43c   : > { %3231 = vmatpush.msrb.mxu3 %v4042_v11 }
 0x43d   : > { %3333 = vperm.xlu1 %4308, %v3145_v54  }
 0x43e   : > { %3232 = vmatpush.msrb.mxu3 %v4041_v7 }
 0x443   : > { %4306 = vset.pattern.permute.xlu2 %v4395_v2 }
 0x445   : > { %4311 = vset.pattern.permute.xlu1 %v4396_v4 }
 0x446   : > { %3175 = vperm.xlu1 %4311, %v3146_v35  }
 0x465   : > { %v4287_v6 = vpop.permute.xlu0 %4286 }
 0x466   : > { %v4288_v31 = vunpack.i.l.bf16 %v4287_v6  ;;  %v4289_v13 = vunpack.i.h.bf16 %v4287_v6 }
 0x468   : > { %v2944_v39 = vmax.f32 %v2874_v52, %v4288_v31 }
 0x46d   : > { %v4302_v50 = vpop.permute.xlu0 %4301 }
 0x46e   : > { %v4303_v5 = vunpack.i.l.bf16 %v4302_v50  ;;  %v4304_v8 = vunpack.i.h.bf16 %v4302_v50 }
 0x470   : > { %v2938_v17 = vmax.f32 %v2868_v16, %v4303_v5  ;;  %v2937_v63 = vmax.f32 %v2867_v57, %v4304_v8  ;;  %v3143_v16 = vld [vmem:[%s6163_s11 + $0x10] sm:$0xff] }
 0x471   : > { %3160 = vperm.xlu0 %4307, %v3143_v16   ;;  %3325 = vperm.xlu2 %4306, %v3143_v16   ;;  %v2953_v57 = vld [vmem:[%s6160_s8 + $0x10] sm:$0xff] }
 0x479   : > { %4310 = vset.pattern.permute.xlu0 %v4395_v2  ;;  %4309 = vset.pattern.permute.xlu2 %v4396_v4  ;;  %v4030_v4 = vld [vmem:[%s6160_s8 + $0x60] sm:$0xff] }
 0x47a   : > { %3165 = vperm.xlu2 %4309, %v3144_v59   ;;  %3337 = vperm.xlu0 %4310, %v3146_v35  }
 0x47d   : > { %v4277_v56 = vpop.permute.xlu2 %4276 }
 0x47e   : > { %v4279_v43 = vunpack.i.h.bf16 %v4277_v56  ;;  %v4278_v62 = vunpack.i.l.bf16 %v4277_v56  ;;  %v4039_v56 = vld [vmem:[%s6161_s9 + $0x38] sm:$0xff] }
 0x480   : > { %v2950_v26 = vmax.f32 %v2880_v9, %v4278_v62  ;;  %v2949_v48 = vmax.f32 %v2879_v60, %v4279_v43  ;;  %v2954_v60 = vld [vmem:[%s6160_s8 + $0x18] sm:$0xff]  ;;  %v4028_v9 = vld [vmem:[%s6160_s8 + $0x50] sm:$0xff]  ;;  %v4066_v62 = vld [vmem:[%s6161_s9 + $0xa0] sm:$0xff] }
 0x481   : > { %v3192_v43 = vld [vmem:[%s6161_s9 + $0x10] sm:$0xff] }
 0x482   : > { %2982 = vmatpush.msra.mxu1 %v2950_v26  ;;  %3049 = vmatpush.msra.mxu2 %v2950_v26  ;;  %v3191_v26 = vld [vmem:[%s6161_s9 + $0x8] sm:$0xff] }
 0x483   : > { %3170 = vperm.xlu2 %4309, %v3145_v54  }
 0x484   : > { %2983 = vmatpush.msra.mxu1 %v2949_v48  ;;  %3050 = vmatpush.msra.mxu2 %v2949_v48  ;;  %v4065_v48 = vld [vmem:[%s6161_s9 + $0x98] sm:$0xff] }
 0x485   : > { %v4272_v21 = vpop.permute.xlu1 %4271  ;;  %v4282_v41 = vpop.permute.xlu2 %4281 }
 0x486   : > { %v4274_v38 = vunpack.i.h.bf16 %v4272_v21  ;;  %v4273_v47 = vunpack.i.l.bf16 %v4272_v21  ;;  %v4283_v19 = vunpack.i.l.bf16 %v4282_v41  ;;  %v4284_v32 = vunpack.i.h.bf16 %v4282_v41  ;;  %v3190_v21 = vld [vmem:[%s6161_s9] sm:$0xff]  ;;  %v4064_v41 = vld [vmem:[%s6161_s9 + $0x90] sm:$0xff] }
 0x488   : > { %v2948_v49 = vmax.f32 %v2878_v45, %v4273_v47  ;;  %v2947_v29 = vmax.f32 %v2877_v42, %v4274_v38  ;;  %v2946_v53 = vmax.f32 %v2876_v18, %v4283_v19  ;;  %v2945_v51 = vmax.f32 %v2875_v15, %v4284_v32  ;;  %v4029_v18 = vld [vmem:[%s6160_s8 + $0x58] sm:$0xff]  ;;  %v3147_v15 = vld [vmem:[%s6163_s11 + $0x30] sm:$0xff]  ;;  %v4063_v38 = vld [vmem:[%s6161_s9 + $0x88] sm:$0xff] }
 0x489   : > { %v2943_v42 = vmax.f32 %v2873_v12, %v4289_v13  ;;  %3180 = vperm.xlu1 %4311, %v3147_v15   ;;  %v4062_v47 = vld [vmem:[%s6161_s9 + $0x80] sm:$0xff]  ;;  %v4060_v19 = vld [vmem:[%s6161_s9 + $0x70] sm:$0xff] }
 0x48a   : > { %2984 = vmatpush.msra.mxu1 %v2948_v49  ;;  %3051 = vmatpush.msra.mxu2 %v2948_v49  ;;  %v4061_v49 = vld [vmem:[%s6161_s9 + $0x78] sm:$0xff] }
 0x48b   : > { %4312 = vset.pattern.permute.xlu2 %v4395_v2  ;;  %v2957_v2 = vld [vmem:[%s6160_s8 + $0x30] sm:$0xff] }
 0x48c   : > { %2985 = vmatpush.msra.mxu1 %v2947_v29  ;;  %3052 = vmatpush.msra.mxu2 %v2947_v29 }
 0x48d   : > { %v4292_v24 = vpop.permute.xlu1 %4291  ;;  %v4297_v45 = vpop.permute.xlu2 %4296  ;;  %3341 = vperm.xlu2 %4312, %v3147_v15  }
 0x48e   : > { %2986 = vmatpush.msra.mxu1 %v2946_v53  ;;  %3053 = vmatpush.msra.mxu2 %v2946_v53  ;;  %v4293_v40 = vunpack.i.l.bf16 %v4292_v24  ;;  %v4294_v37 = vunpack.i.h.bf16 %v4292_v24  ;;  %v4298_v23 = vunpack.i.l.bf16 %v4297_v45  ;;  %v4299_v52 = vunpack.i.h.bf16 %v4297_v45 }
 0x490   : > { %2987 = vmatpush.msra.mxu1 %v2945_v51  ;;  %3054 = vmatpush.msra.mxu2 %v2945_v51  ;;  %v2942_v61 = vmax.f32 %v2872_v22, %v4293_v40  ;;  %v2941_v46 = vmax.f32 %v2871_v34, %v4294_v37  ;;  %v2940_v55 = vmax.f32 %v2870_v0, %v4298_v23  ;;  %v2951_v22 = vld [vmem:[%s6160_s8] sm:$0xff]  ;;  %v4025_v34 = vld [vmem:[%s6160_s8 + $0x38] sm:$0xff]  ;;  %v4031_v0 = vld [vmem:[%s6160_s8 + $0x68] sm:$0xff]  ;;  %v3322_v37 = vpop.permute.xlu0 %3321 }
 0x491   : > { %v2939_v12 = vmax.f32 %v2869_v58, %v4299_v52  ;;  %v4040_v58 = vld [vmem:[%s6161_s9 + $0x40] sm:$0xff] }
 0x492   : > { %2988 = vmatpush.msra.mxu1 %v2944_v39  ;;  %3055 = vmatpush.msra.mxu2 %v2944_v39 }
 0x493   : > { %3233 = vmatpush.msrb.mxu3 %v4040_v58 }
 0x494   : > { %2989 = vmatpush.msra.mxu1 %v2943_v42  ;;  %3056 = vmatpush.msra.mxu2 %v2943_v42 }
 0x495   : > { %3234 = vmatpush.msrb.mxu3 %v4039_v56  ;;  %v3318_v53 = vpop.permute.xlu1 %3317  ;;  %v3151_v13 = vpop.permute.xlu2 %3150 }
 0x496   : > { %2990 = vmatpush.msra.mxu1 %v2942_v61  ;;  %3057 = vmatpush.msra.mxu2 %v2942_v61 }
 0x498   : > { %2991 = vmatpush.msra.mxu1 %v2941_v46  ;;  %3058 = vmatpush.msra.mxu2 %v2941_v46 }
 0x49a   : > { %2992 = vmatpush.msra.mxu1 %v2940_v55  ;;  %3059 = vmatpush.msra.mxu2 %v2940_v55 }
 0x49c   : > { %2993 = vmatpush.msra.mxu1 %v2939_v12  ;;  %3060 = vmatpush.msra.mxu2 %v2939_v12 }
 0x49e   : > { %2994 = vmatpush.msra.mxu1 %v2938_v17  ;;  %3061 = vmatpush.msra.mxu2 %v2938_v17  ;;  %v3156_v46 = vpop.permute.xlu1 %3155 }
 0x4a0   : > { %2995 = vmatpush.msra.mxu1 %v2937_v63  ;;  %3062 = vmatpush.msra.mxu2 %v2937_v63 }
 0x4a1   : > { %4018 = vmatmul.msk.f32.vlgmr.msra.gmra.mxu1 %vm2958_vm6, %v2951_v22  ;;  %4032 = vmatmul.msk.f32.vlgmr.msra.gmra.mxu2 %vm2958_vm6, %v4025_v34 }
 0x4a2   : > { %3287 = vmatpush.msrb.mxu1 %v3196_v30  ;;  %3389 = vmatpush.msrb.mxu2 %v4066_v62 }
 0x4a4   : > { %3288 = vmatpush.msrb.mxu1 %v3195_v33  ;;  %3390 = vmatpush.msrb.mxu2 %v4065_v48 }
 0x4a6   : > { %3289 = vmatpush.msrb.mxu1 %v3194_v25  ;;  %3391 = vmatpush.msrb.mxu2 %v4064_v41 }
 0x4a7   : > { %v3330_v59 = vpop.permute.xlu1 %3329 }
 0x4a8   : > { %3290 = vmatpush.msrb.mxu1 %v3193_v44  ;;  %3392 = vmatpush.msrb.mxu2 %v4063_v38 }
 0x4a9   : > { %4019 = vmatmul.msk.f32.gmra.mxu1 %vm2958_vm6, %v2952_v28  ;;  %4033 = vmatmul.msk.f32.gmra.mxu2 %vm2958_vm6, %v4026_v27 }
 0x4aa   : > { %3291 = vmatpush.msrb.mxu1 %v3192_v43  ;;  %3393 = vmatpush.msrb.mxu2 %v4062_v47 }
 0x4ac   : > { %3292 = vmatpush.msrb.mxu1 %v3191_v26  ;;  %3394 = vmatpush.msrb.mxu2 %v4061_v49 }
 0x4ae   : > { %3293 = vmatpush.msrb.mxu1 %v3190_v21  ;;  %3395 = vmatpush.msrb.mxu2 %v4060_v19 }
 0x4af   : > { %v3334_v7 = vpop.permute.xlu1 %3333 }
 0x4b1   : > { %4020 = vmatmul.msk.f32.gmra.mxu1 %vm2958_vm6, %v2953_v57  ;;  %4034 = vmatmul.msk.f32.gmra.mxu2 %vm2958_vm6, %v4027_v20 }
 0x4b8   : > { %v3176_v26 = vpop.permute.xlu1 %3175 }
 0x4b9   : > { %4021 = vmatmul.msk.f32.gmra.mxu1 %vm2958_vm6, %v2954_v60  ;;  %4035 = vmatmul.msk.f32.gmra.mxu2 %vm2958_vm6, %v4028_v9 }
 0x4c1   : > { %4022 = vmatmul.msk.f32.gmra.mxu1 %vm2958_vm6, %v2955_v10  ;;  %4036 = vmatmul.msk.f32.gmra.mxu2 %vm2958_vm6, %v4029_v18 }
 0x4c9   : > { %4023 = vmatmul.msk.f32.gmra.mxu1 %vm2958_vm6, %v2956_v3  ;;  %4037 = vmatmul.msk.f32.gmra.mxu2 %vm2958_vm6, %v4030_v4 }
 0x4cb   : > { %v3326_v12 = vpop.permute.xlu2 %3325 }
 0x4d1   : > { %4024 = vmatmul.msk.f32.gmra.mxu1 %vm2958_vm6, %v2957_v2  ;;  %4038 = vmatmul.msk.f32.gmra.mxu2 %vm2958_vm6, %v4031_v0 }
 0x4d4   : > { %v3166_v54 = vpop.permute.xlu2 %3165 }
 0x4dd   : > { %v3171_v4 = vpop.permute.xlu2 %3170 }
 0x4e3   : > { %v3161_v27 = vpop.permute.xlu0 %3160 }
 0x51e   : > { %v2997_v6 = vpop.f32.mrf.mxu1 }
 0x524   : > { %v3064_v29 = vpop.f32.mrf.mxu2 }
 0x525   : > { %v3085_v32 = vmax.f32 %v2997_v6, %v3064_v29 }
 0x526   : > { %v3000_v31 = vpop.f32.mrf.mxu1 }
 0x527   : > { %v3099_v24 = vrot.slane %v3085_v32, 7  ;;  %4046 = vmatmul.msk.f32.vlgmr.msrb.gmra.mxu3 %vm2467_vm5, %v3085_v32  ;;  %v3120_v61 = vrot.slane %v3085_v32, 1 }
 0x529   : > { %v3119_v51 = vsel %vm578_vm3, 0.0, %v3099_v24 }
 0x52a   : > { %v3183_v39 = vmul.f32 %v3151_v13, %v3119_v51 }
 0x52c   : > { %v3067_v40 = vpop.f32.mrf.mxu2  ;;  %4053 = vmatmul.msk.f32.vlgmr.msrb.gmra.mxu1 %vm2467_vm5, %v3183_v39 }
 0x52d   : > { %v3086_v45 = vmax.f32 %v3000_v31, %v3067_v40 }
 0x52e   : > { %v3003_v42 = vpop.f32.mrf.mxu1 }
 0x52f   : > { %v3100_v23 = vrot.slane %v3086_v45, 7  ;;  %v3121_v50 = vrot.slane %v3086_v45, 1  ;;  %4047 = vmatmul.msk.f32.gmra.mxu3 %vm2467_vm5, %v3086_v45  ;;  %v3342_v45 = vpop.permute.xlu2 %3341 }
 0x531   : > { %v3122_v52 = vsel %vm663_vm2, %v3120_v61, %v3121_v50  ;;  %v3101_v5 = vsel %vm578_vm3, %v3099_v24, %v3100_v23  ;;  %v3181_v24 = vpop.permute.xlu1 %3180 }
 0x532   : > { %v3344_v55 = vmul.f32 %v3318_v53, %v3122_v52  ;;  %v3184_v8 = vmul.f32 %v3156_v46, %v3101_v5  ;;  %v3338_v53 = vpop.permute.xlu0 %3337 }
 0x534   : > { %v3070_v17 = vpop.f32.mrf.mxu2  ;;  %4067 = vmatmul.msk.f32.vlgmr.msrb.gmra.mxu2 %vm2467_vm5, %v3344_v55  ;;  %4054 = vmatmul.msk.f32.gmra.mxu1 %vm2467_vm5, %v3184_v8 }
 0x535   : > { %v3087_v63 = vmax.f32 %v3003_v42, %v3070_v17 }
 0x536   : > { %v3006_v22 = vpop.f32.mrf.mxu1 }
 0x537   : > { %v3102_v34 = vrot.slane %v3087_v63, 7  ;;  %v3123_v28 = vrot.slane %v3087_v63, 1  ;;  %4048 = vmatmul.msk.f32.gmra.mxu3 %vm2467_vm5, %v3087_v63 }
 0x539   : > { %v3124_v16 = vsel %vm663_vm2, %v3121_v50, %v3123_v28  ;;  %v3103_v57 = vsel %vm578_vm3, %v3100_v23, %v3102_v34 }
 0x53a   : > { %v3345_v20 = vmul.f32 %v3322_v37, %v3124_v16  ;;  %v3185_v35 = vmul.f32 %v3161_v27, %v3103_v57  ;;  %v3427_v16 = vld [vmem:[%s6162_s10 + $0x10] sm:$0xff] }
 0x53c   : > { %v3073_v14 = vpop.f32.mrf.mxu2  ;;  %4068 = vmatmul.msk.f32.gmra.mxu2 %vm2467_vm5, %v3345_v20  ;;  %4055 = vmatmul.msk.f32.gmra.mxu1 %vm2467_vm5, %v3185_v35 }
 0x53d   : > { %v3088_v36 = vmax.f32 %v3006_v22, %v3073_v14  ;;  %v3426_v22 = vld [vmem:[%s6162_s10 + $0x8] sm:$0xff] }
 0x53e   : > { %v3009_v30 = vpop.f32.mrf.mxu1 }
 0x53f   : > { %v3104_v1 = vrot.slane %v3088_v36, 7  ;;  %v3125_v33 = vrot.slane %v3088_v36, 1  ;;  %4049 = vmatmul.msk.f32.gmra.mxu3 %vm2467_vm5, %v3088_v36 }
 0x541   : > { %v3126_v60 = vsel %vm663_vm2, %v3123_v28, %v3125_v33  ;;  %v3105_v9 = vsel %vm578_vm3, %v3102_v34, %v3104_v1 }
 0x542   : > { %v3346_v11 = vmul.f32 %v3326_v12, %v3126_v60  ;;  %v3186_v25 = vmul.f32 %v3166_v54, %v3105_v9  ;;  %v3428_v9 = vld [vmem:[%s6162_s10 + $0x18] sm:$0xff] }
 0x544   : > { %v3076_v10 = vpop.f32.mrf.mxu2  ;;  %4069 = vmatmul.msk.f32.gmra.mxu2 %vm2467_vm5, %v3346_v11  ;;  %4056 = vmatmul.msk.f32.gmra.mxu1 %vm2467_vm5, %v3186_v25 }
 0x545   : > { %v3089_v18 = vmax.f32 %v3009_v30, %v3076_v10 }
 0x546   : > { %v3012_v2 = vpop.f32.mrf.mxu1 }
 0x547   : > { %v3106_v15 = vrot.slane %v3089_v18, 7  ;;  %v3127_v3 = vrot.slane %v3089_v18, 1  ;;  %4050 = vmatmul.msk.f32.gmra.mxu3 %vm2467_vm5, %v3089_v18 }
 0x549   : > { %v3128_v0 = vsel %vm663_vm2, %v3125_v33, %v3127_v3  ;;  %v3107_v58 = vsel %vm578_vm3, %v3104_v1, %v3106_v15 }
 0x54a   : > { %v3347_v44 = vmul.f32 %v3330_v59, %v3128_v0  ;;  %v3187_v56 = vmul.f32 %v3171_v4, %v3107_v58 }
 0x54c   : > { %v3079_v43 = vpop.f32.mrf.mxu2  ;;  %4070 = vmatmul.msk.f32.gmra.mxu2 %vm2467_vm5, %v3347_v44  ;;  %4057 = vmatmul.msk.f32.gmra.mxu1 %vm2467_vm5, %v3187_v56 }
 0x54d   : > { %v3090_v62 = vmax.f32 %v3012_v2, %v3079_v43 }
 0x54e   : > { %v3015_v49 = vpop.f32.mrf.mxu1 }
 0x54f   : > { %v3108_v48 = vrot.slane %v3090_v62, 7  ;;  %v3129_v21 = vrot.slane %v3090_v62, 1  ;;  %4051 = vmatmul.msk.f32.gmra.mxu3 %vm2467_vm5, %v3090_v62 }
 0x551   : > { %v3130_v41 = vsel %vm663_vm2, %v3127_v3, %v3129_v21  ;;  %v3109_v38 = vsel %vm578_vm3, %v3106_v15, %v3108_v48 }
 0x552   : > { %v3348_v47 = vmul.f32 %v3334_v7, %v3130_v41  ;;  %v3188_v19 = vmul.f32 %v3176_v26, %v3109_v38  ;;  %v3429_v7 = vld [vmem:[%s6162_s10 + $0x20] sm:$0xff]  ;;  %v3431_v38 = vld [vmem:[%s6162_s10 + $0x30] sm:$0xff] }
 0x554   : > { %v3082_v6 = vpop.f32.mrf.mxu2  ;;  %4071 = vmatmul.msk.f32.gmra.mxu2 %vm2467_vm5, %v3348_v47  ;;  %4058 = vmatmul.msk.f32.gmra.mxu1 %vm2467_vm5, %v3188_v19 }
 0x555   : > { %v3091_v29 = vmax.f32 %v3015_v49, %v3082_v6 }
 0x557   : > { %v3110_v32 = vrot.slane %v3091_v29, 7  ;;  %v3131_v31 = vrot.slane %v3091_v29, 1  ;;  %4052 = vmatmul.msk.f32.gmra.mxu3 %vm2467_vm5, %v3091_v29 }
 0x559   : > { %v3132_v13 = vsel %vm663_vm2, %v3129_v21, %v3131_v31  ;;  %v3111_v51 = vsel %vm578_vm3, %v3108_v48, %v3110_v32  ;;  %v3140_v42 = vsel %vm663_vm2, %v3131_v31, 0.0  ;;  %v3430_v48 = vld [vmem:[%s6162_s10 + $0x28] sm:$0xff] }
 0x55a   : > { %v3349_v39 = vmul.f32 %v3338_v53, %v3132_v13  ;;  %v3189_v40 = vmul.f32 %v3181_v24, %v3111_v51  ;;  %v3350_v37 = vmul.f32 %v3342_v45, %v3140_v42  ;;  %v3425_v24 = vld [vmem:[%s6162_s10] sm:$0xff] }
 0x55c   : > { %4072 = vmatmul.msk.f32.gmra.mxu2 %vm2467_vm5, %v3349_v39  ;;  %4059 = vmatmul.msk.f32.gmra.mxu1 %vm2467_vm5, %v3189_v40 }
 0x564   : > { %4073 = vmatmul.msk.f32.gmra.mxu2 %vm2467_vm5, %v3350_v37 }
 0x5a9   : > { %v3295_v61 = vpop.f32.mrf.mxu1 }
 0x5aa   : > { %v3236_v23 = vpop.f32.mrf.mxu3 }
 0x5ab   : > { %v3296_v6 = vadd.f32 %v3295_v61, %v3236_v23 }
 0x5b1   : > { %v3298_v50 = vpop.f32.mrf.mxu1 }
 0x5b2   : > { %v3239_v46 = vpop.f32.mrf.mxu3 }
 0x5b3   : > { %v3299_v12 = vadd.f32 %v3298_v50, %v3239_v46 }
 0x5b7   : > { %v3397_v52 = vpop.f32.mrf.mxu2 }
 0x5b8   : > { %v3418_v31 = vadd.f32 %v3397_v52, %v3296_v6 }
 0x5b9   : > { %v3301_v5 = vpop.f32.mrf.mxu1 }
 0x5ba   : > { %v3242_v55 = vpop.f32.mrf.mxu3  ;;  %v3432_v13 = vadd.f32 %v3425_v24, %v3418_v31 }
 0x5bb   : > { %v3302_v28 = vadd.f32 %v3301_v5, %v3242_v55 }
 0x5bc   : > { %v3439_v51 = vmax.f32 %v3432_v13, 0.0 }
 0x5bf   : > { %v3400_v8 = vpop.f32.mrf.mxu2 }
 0x5c0   : > { %v3419_v17 = vadd.f32 %v3400_v8, %v3299_v12 }
 0x5c1   : > { %v3304_v63 = vpop.f32.mrf.mxu1 }
 0x5c2   : > { %v3245_v34 = vpop.f32.mrf.mxu3  ;;  %v5998_v57 = vadd.f32 %v3426_v22, %v3419_v17 }
 0x5c3   : > { %v3305_v33 = vadd.f32 %v3304_v63, %v3245_v34  ;;  %v3481_v34 = vld [vmem:[%s6164_s12] sm:$0xff] }
 0x5c4   : > { %v3440_v35 = vmax.f32 %v5998_v57, 0.0  ;;  %v4084_v57 = vld [vmem:[%s6166_s14 + $0x50] sm:$0xff] }
 0x5c7   : > { %v3403_v27 = vpop.f32.mrf.mxu2 }
 0x5c8   : > { %v3420_v59 = vadd.f32 %v3403_v27, %v3302_v28  ;;  %v4078_v28 = vld [vmem:[%s6165_s13 + $0x8] sm:$0xff]  ;;  %v4090_v27 = vld [vmem:[%s6165_s13 + $0x10] sm:$0xff] }
 0x5c9   : > { %v3307_v54 = vpop.f32.mrf.mxu1 }
 0x5ca   : > { %v6000_v20 = vadd.f32 %v3427_v16, %v3420_v59  ;;  %v3248_v1 = vpop.f32.mrf.mxu3  ;;  %v4085_v16 = vld [vmem:[%s6166_s14 + $0x58] sm:$0xff]  ;;  %v3505_v59 = vld [vmem:[%s6165_s13] sm:$0xff] }
 0x5cb   : > { %v3308_v11 = vadd.f32 %v3307_v54, %v3248_v1  ;;  %3608 = vmatpush.msra.mxu1 %v4085_v16  ;;  %v3534_v54 = vld [vmem:[%s6166_s14 + $0x20] sm:$0xff]  ;;  %v3532_v1 = vld [vmem:[%s6166_s14 + $0x10] sm:$0xff] }
 0x5cc   : > { %v3441_v14 = vmax.f32 %v6000_v20, 0.0  ;;  %v4076_v20 = vld [vmem:[%s6164_s12 + $0x8] sm:$0xff] }
 0x5cd   : > { %3609 = vmatpush.msra.mxu1 %v4084_v57 }
 0x5ce   : > { %v4323_v36 = vpack.i.bf16 %v3440_v35, %v3441_v14 }
 0x5cf   : > { %v3406_v30 = vpop.f32.mrf.mxu2 }
 0x5d0   : > { %4324 = vrot.lane.b32.xlu1 %v4323_v36, %s4398_s17  ;;  %v3421_v60 = vadd.f32 %v3406_v30, %v3305_v33  ;;  %v3535_v36 = vld [vmem:[%s6166_s14 + $0x28] sm:$0xff]  ;;  %v3533_v30 = vld [vmem:[%s6166_s14 + $0x18] sm:$0xff] }
 0x5d1   : > { %v3310_v3 = vpop.f32.mrf.mxu1  ;;  %v3531_v33 = vld [vmem:[%s6166_s14 + $0x8] sm:$0xff] }
 0x5d2   : > { %v3435_v10 = vadd.f32 %v3428_v9, %v3421_v60  ;;  %v3251_v15 = vpop.f32.mrf.mxu3  ;;  %v4082_v60 = vld [vmem:[%s6166_s14 + $0x40] sm:$0xff]  ;;  %v4081_v9 = vld [vmem:[%s6166_s14 + $0x38] sm:$0xff] }
 0x5d3   : > { %v3311_v56 = vadd.f32 %v3310_v3, %v3251_v15  ;;  %v4094_v15 = vld [vmem:[%s6166_s14 + $0x70] sm:$0xff] }
 0x5d4   : > { %v3442_v2 = vmax.f32 %v3435_v10, 0.0  ;;  %v4096_v10 = vld [vmem:[%s6166_s14 + $0x80] sm:$0xff] }
 0x5d7   : > { %v3409_v25 = vpop.f32.mrf.mxu2 }
 0x5d8   : > { %v3422_v18 = vadd.f32 %v3409_v25, %v3308_v11  ;;  %v3530_v11 = vld [vmem:[%s6166_s14] sm:$0xff]  ;;  %v4080_v25 = vld [vmem:[%s6166_s14 + $0x30] sm:$0xff] }
 0x5d9   : > { %v3313_v62 = vpop.f32.mrf.mxu1 }
 0x5da   : > { %v3436_v4 = vadd.f32 %v3429_v7, %v3422_v18  ;;  %v3254_v43 = vpop.f32.mrf.mxu3  ;;  %v4097_v7 = vld [vmem:[%s6166_s14 + $0x88] sm:$0xff]  ;;  %v4095_v18 = vld [vmem:[%s6166_s14 + $0x78] sm:$0xff] }
 0x5db   : > { %v3314_v21 = vadd.f32 %v3313_v62, %v3254_v43 }
 0x5dc   : > { %v3443_v0 = vmax.f32 %v3436_v4, 0.0  ;;  %v4093_v4 = vld [vmem:[%s6166_s14 + $0x68] sm:$0xff] }
 0x5de   : > { %v4318_v58 = vpack.i.bf16 %v3442_v2, %v3443_v0 }
 0x5df   : > { %v3412_v44 = vpop.f32.mrf.mxu2 }
 0x5e0   : > { %4319 = vrot.lane.b32.xlu0 %v4318_v58, %s4398_s17  ;;  %v3423_v26 = vadd.f32 %v3412_v44, %v3311_v56 }
 0x5e2   : > { %v3437_v47 = vadd.f32 %v3430_v48, %v3423_v26 }
 0x5e4   : > { %v3444_v29 = vmax.f32 %v3437_v47, 0.0  ;;  %v4330_v47 = vld [vmem:[%s6167_s15] ss:$0 sm:$0xff] }
 0x5e7   : > { %v3415_v41 = vpop.f32.mrf.mxu2 }
 0x5e8   : > { %v3424_v49 = vadd.f32 %v3415_v41, %v3314_v21 }
 0x5ea   : > { %v3438_v19 = vadd.f32 %v3431_v38, %v3424_v49 }
 0x5ec   : > { %v3445_v32 = vmax.f32 %v3438_v19, 0.0 }
 0x5ee   : > { %v4313_v53 = vpack.i.bf16 %v3444_v29, %v3445_v32 }
 0x5f0   : > { %4314 = vrot.lane.b32.xlu2 %v4313_v53, %s4398_s17 }
 0x5f8   : > { %3453 = vrot.lane.b32.xlu2 %v3439_v51, %s4398_s17  ;;  %s3809_s17 = sshll.u32 %s513_s29, 3 }
 0x5f9   : > { %s515_s27 = scalar_lea.vmem [#allocation2], %s3809_s17  ;;  %s4351_s17 = scalar_lea.hbm %s6168_s16, 16 }
 0x5fa   : > { %s3743_s28 = sshll.u32 %s515_s27, 4  ;;  %p4353_p1 = scmp.lt.s32.totalorder %s4351_s17, %s4347_s18  ;;  %s3744_s28 = int_to_ptr.vmem [resolvable:$true] %s3743_s28 }
 0x5fc   : > { %p4354_p2 = por %p4353_p1, %p4352_p0 }
 0x5fe   : > { %p4355_p3 = pnand %p4354_p2, %p4350_p13 }
 0x642   : > { %v4325_v61 = vpop.permute.xlu1 %4324 }
 0x643   : > { %v4326_v52 = vunpack.i.l.bf16 %v4325_v61  ;;  %v4327_v55 = vunpack.i.h.bf16 %v4325_v61 }
 0x645   : > { %v3476_v12 = vmax.f32 %v3441_v14, %v4326_v52  ;;  %v3475_v63 = vmax.f32 %v3440_v35, %v4327_v55  ;;  %v4088_v35 = vld [vmem:[%s6164_s12 + $0x10] sm:$0xff]  ;;  %v4083_v14 = vld [vmem:[%s6166_s14 + $0x48] sm:$0xff] }
 0x646   : > { %3610 = vmatpush.msra.mxu1 %v4083_v14 }
 0x648   : > { %3611 = vmatpush.msra.mxu1 %v4082_v60 }
 0x64a   : > { %v4315_v39 = vpop.permute.xlu2 %4314  ;;  %3612 = vmatpush.msra.mxu1 %v4081_v9 }
 0x64b   : > { %v4317_v40 = vunpack.i.h.bf16 %v4315_v39  ;;  %v4316_v45 = vunpack.i.l.bf16 %v4315_v39 }
 0x64c   : > { %3613 = vmatpush.msra.mxu1 %v4080_v25 }
 0x64d   : > { %v3480_v42 = vmax.f32 %v3445_v32, %v4316_v45  ;;  %v6027_v37 = vmax.f32 %v3444_v29, %v4317_v40 }
 0x64e   : > { %3712 = vmatpush.msrb.mxu1 %v4097_v7 }
 0x64f   : > { %3494 = vmatpush.msra.mxu3 %v3480_v42  ;;  %3575 = vmatpush.msra.mxu2 %v3480_v42 }
 0x650   : > { %3680 = vmatpush.msrb.mxu0 %v3480_v42  ;;  %3713 = vmatpush.msrb.mxu1 %v4096_v10 }
 0x651   : > { %3495 = vmatpush.msra.mxu3 %v6027_v37  ;;  %3576 = vmatpush.msra.mxu2 %v6027_v37 }
 0x652   : > { %3681 = vmatpush.msrb.mxu0 %v6027_v37  ;;  %v4320_v23 = vpop.permute.xlu0 %4319  ;;  %v3454_v17 = vpop.permute.xlu2 %3453  ;;  %3714 = vmatpush.msrb.mxu1 %v4095_v18 }
 0x653   : > { %v4322_v50 = vunpack.i.h.bf16 %v4320_v23  ;;  %v4321_v46 = vunpack.i.l.bf16 %v4320_v23  ;;  %v3474_v22 = vmax.f32 %v3439_v51, %v3454_v17 }
 0x654   : > { %3715 = vmatpush.msrb.mxu1 %v4094_v15 }
 0x655   : > { %v3478_v5 = vmax.f32 %v3443_v0, %v4321_v46  ;;  %v3477_v8 = vmax.f32 %v3442_v2, %v4322_v50  ;;  %v4092_v2 = vld [vmem:[%s6166_s14 + $0x60] sm:$0xff] }
 0x656   : > { %3716 = vmatpush.msrb.mxu1 %v4093_v4 }
 0x657   : > { %3496 = vmatpush.msra.mxu3 %v3478_v5  ;;  %3577 = vmatpush.msra.mxu2 %v3478_v5 }
 0x658   : > { %3682 = vmatpush.msrb.mxu0 %v3478_v5  ;;  %3717 = vmatpush.msrb.mxu1 %v4092_v2 }
 0x659   : > { %3497 = vmatpush.msra.mxu3 %v3477_v8  ;;  %3578 = vmatpush.msra.mxu2 %v3477_v8 }
 0x65a   : > { %3683 = vmatpush.msrb.mxu0 %v3477_v8 }
 0x65b   : > { %3498 = vmatpush.msra.mxu3 %v3476_v12  ;;  %3579 = vmatpush.msra.mxu2 %v3476_v12 }
 0x65c   : > { %3684 = vmatpush.msrb.mxu0 %v3476_v12 }
 0x65d   : > { %3499 = vmatpush.msra.mxu3 %v3475_v63  ;;  %3580 = vmatpush.msra.mxu2 %v3475_v63 }
 0x65e   : > { %3685 = vmatpush.msrb.mxu0 %v3475_v63 }
 0x65f   : > { %3500 = vmatpush.msra.mxu3 %v3474_v22  ;;  %3581 = vmatpush.msra.mxu2 %v3474_v22 }
 0x660   : > { %3686 = vmatpush.msrb.mxu0 %v3474_v22  ;;  %4074 = vmatmul.msk.f32.vlgmr.msra.gmra.mxu3 %vm2467_vm5, %v3481_v34 }
 0x661   : > { %3518 = vmatpush.msrb.mxu3 %v3480_v42  ;;  %4079 = vmatmul.msk.f32.vlgmr.msra.gmra.mxu2 %vm2467_vm5, %v4078_v28 }
 0x662   : > { %4091 = vmatmul.msk.f32.vlgmr.msrb.gmra.mxu0 %vm2467_vm5, %v4090_v27  ;;  %3631 = vmatpush.msrb.mxu2 %v3535_v36 }
 0x663   : > { %3519 = vmatpush.msrb.mxu3 %v6027_v37 }
 0x664   : > { %3632 = vmatpush.msrb.mxu2 %v3534_v54 }
 0x665   : > { %3520 = vmatpush.msrb.mxu3 %v3478_v5 }
 0x666   : > { %3633 = vmatpush.msrb.mxu2 %v3533_v30 }
 0x667   : > { %3521 = vmatpush.msrb.mxu3 %v3477_v8 }
 0x668   : > { %3634 = vmatpush.msrb.mxu2 %v3532_v1 }
 0x669   : > { %3522 = vmatpush.msrb.mxu3 %v3476_v12 }
 0x66a   : > { %3635 = vmatpush.msrb.mxu2 %v3531_v33 }
 0x66b   : > { %3523 = vmatpush.msrb.mxu3 %v3475_v63 }
 0x66c   : > { %3636 = vmatpush.msrb.mxu2 %v3530_v11 }
 0x66d   : > { %3524 = vmatpush.msrb.mxu3 %v3474_v22 }
 0x66e   : > { %4075 = vmatmul.msk.f32.vlgmr.msrb.gmra.mxu3 %vm2467_vm5, %v3505_v59 }
 0x66f   : > { %3550 = vmatpush.msra.mxu3 %v3480_v42 }
 0x671   : > { %3551 = vmatpush.msra.mxu3 %v6027_v37 }
 0x673   : > { %3552 = vmatpush.msra.mxu3 %v3478_v5 }
 0x675   : > { %3553 = vmatpush.msra.mxu3 %v3477_v8 }
 0x677   : > { %3554 = vmatpush.msra.mxu3 %v3476_v12 }
 0x679   : > { %3555 = vmatpush.msra.mxu3 %v3475_v63 }
 0x67b   : > { %3556 = vmatpush.msra.mxu3 %v3474_v22 }
 0x67c   : > { %4077 = vmatmul.msk.f32.vlgmr.msra.gmra.mxu3 %vm2467_vm5, %v4076_v20 }
 0x67d   : > { %3655 = vmatpush.msrb.mxu3 %v3480_v42 }
 0x67f   : > { %3656 = vmatpush.msrb.mxu3 %v6027_v37 }
 0x681   : > { %3657 = vmatpush.msrb.mxu3 %v3478_v5 }
 0x683   : > { %3658 = vmatpush.msrb.mxu3 %v3477_v8 }
 0x685   : > { %3659 = vmatpush.msrb.mxu3 %v3476_v12 }
 0x687   : > { %3660 = vmatpush.msrb.mxu3 %v3475_v63 }
 0x689   : > { %3661 = vmatpush.msrb.mxu3 %v3474_v22 }
 0x68a   : > { %4089 = vmatmul.msk.f32.vlgmr.msrb.gmra.mxu3 %vm2467_vm5, %v4088_v35 }
 0x6df   : > { %v3688_v62 = vpop.f32.mrf.mxu0 }
 0x6e3   : > { %v3502_v3 = vpop.f32.mrf.mxu3 }
 0x6e4   : > { %v3583_v44 = vpop.f32.mrf.mxu2 }
 0x6f1   : > { %v3526_v0 = vpop.f32.mrf.mxu3 }
 0x6f2   : > { %v3529_v58 = vmax.f32 %v3502_v3, %v3526_v0 }
 0x6f4   : > { %4087 = vmatmul.msk.f32.vlgmr.msrb.gmra.mxu2 %vm3594_vm7, %v3529_v58 }
 0x6ff   : > { %v3558_v56 = vpop.f32.mrf.mxu3 }
 0x700   : > { %v3586_v43 = vmax.f32 %v3558_v56, %v3583_v44 }
 0x702   : > { %4086 = vmatmul.msk.f32.vlgmr.msra.gmra.mxu1 %vm3594_vm7, %v3586_v43 }
 0x70d   : > { %v3663_v26 = vpop.f32.mrf.mxu3 }
 0x70e   : > { %v3691_v48 = vmax.f32 %v3663_v26, %v3688_v62 }
 0x710   : > { %4098 = vmatmul.msk.f32.vlgmr.msrb.gmra.mxu1 %vm3594_vm7, %v3691_v48 }
 0x777   : > { %v3638_v41 = vpop.f32.mrf.mxu2 }
 0x77f   : > { %v3615_v21 = vpop.f32.mrf.mxu1 }
 0x780   : > { %v3639_v38 = vadd.f32 %v3638_v41, %v3615_v21 }
 0x78d   : > { %v3719_v49 = vpop.f32.mrf.mxu1 }
 0x78e   : > { %v3722_v19 = vadd.f32 %v3719_v49, %v3639_v38 }
 0x790   : > { %v3727_v6 = vadd.f32 %v4330_v47, %v3722_v19 }
 0x792   : > { %3729 = vst.msk [vmem:[%s515_s27] sm:$0xff] %vm3728_vm8, %v3727_v6 }
 0x793   : > { %4358 = shalt.err (!%p4355_p3)
}
 0x794   : > { %4103 = dma.vmem_to_hbm [thread:$0]  (%p4522_p5), %s3744_s28, 128, %s3746_s24, %s3731_s25  }
 0x795 PF: > { %s6199_s29 = sld [smem:[#allocation7_spill]] }
 0x796   : > { %s6200_s30 = sld [smem:[#allocation5_spill]] }
 0x79b   : > { %p4109_p4 = scmp.ge.s32.totalorder %s6199_s29, 2 }
 0x79c   : > { %s3757_s1 = sand.u32 1, %s6200_s30  }
 0x79d   : > { %p4106_p7 = pnand %p4109_p4, %p4526_p6  ;;  %s3758_s19 = scalar_lea.sflag [#allocation3], %s3757_s1 }
 0x79f   : > { %p4107_p8 = pneg %p4106_p7 }
 0x7a1   : > { %4376 = dma.done.wait (%p4107_p8), %s3758_s19, 128  }
 0x7a2   : > { %4378 = vsyncadd (%p4107_p8), %s3758_s19, 4294967168  ;;  %s6202_s24 = sld [smem:[#allocation8_spill]]  ;;  %s6205_s21 = smov %s4385_s22 }
 0x7a3   : > { %s6203_s18 = sld [smem:[#allocation6_spill]] }
 0x7a4   : > { %s6204_s23 = sld [smem:[#allocation9_spill]] }
 0x7a8   : > { %p26_p9 = scmp.ge.s32.totalorder %s6202_s24, 4  }
 0x7a9   : > { %s6206_s22 = smov %s6203_s18 }
 0x7aa   :  { %28 = sbr.rel (!%p26_p9) target bundleno = 6 (0x6), region = 133 }
 0x7af   :  { %3764 = vsyncpa [#allocation3], 1 }
 0x7b0   :  { %3766 = vsyncpa [#allocation3 + $0x1], 1 }

</bundles_post_ra>
